<compile_context>
chip_gen: v6e
topology: v6e:2x2x1
jax: 0.10.0
libtpu: 0.0.40
codegen_flags: <defaults>
</compile_context>

<pallas_src>
import functools

import jax
import jax.numpy as jnp
from jax import lax
from jax.experimental import pallas as pl
from jax.experimental.pallas import tpu as pltpu


# ---------------------------------------------------------------------------
# Recurrent kernel: Tb time steps per grid iteration, h carried in VMEM.
# ---------------------------------------------------------------------------
def _gru_rec_kernel(gi_ref, h0_ref, wh_ref, bhn_ref, y_ref, h_scratch, *, tb):
    """One GRU layer, Tb time steps per grid iteration.

    gi_ref : (Tb, 3, B, H)  precomputed x@W_i + b_i (+ b_h folded for r/z gates)
    h0_ref : (B, H)         initial hidden state (read only at grid step 0)
    wh_ref : (3, H, H)      hidden->gate weights, one (H, H) matrix per gate
    bhn_ref: (1, H)         hidden bias of the n gate (r/z biases were folded)
    y_ref  : (Tb, B, H)     outputs (new hidden state per step)
    h_scratch: VMEM (B, H) f32, carries h across grid iterations
    """
    t = pl.program_id(0)

    @pl.when(t == 0)
    def _():
        h_scratch[...] = h0_ref[...].astype(jnp.float32)

    # Resident weights — hoisted out of the time loop.
    w_r = wh_ref[0]
    w_z = wh_ref[1]
    w_n = wh_ref[2]
    b_hn = bhn_ref[...].astype(jnp.float32)          # (1, H)

    def step(s, h):
        g = gi_ref[s].astype(jnp.float32)            # (3, B, H), leading-dim
        i_r, i_z, i_n = g[0], g[1], g[2]             # slices are lane-aligned

        h_r = jnp.dot(h, w_r, preferred_element_type=jnp.float32)
        h_z = jnp.dot(h, w_z, preferred_element_type=jnp.float32)
        h_n = jnp.dot(h, w_n, preferred_element_type=jnp.float32) + b_hn

        r = jax.nn.sigmoid(i_r + h_r)
        z = jax.nn.sigmoid(i_z + h_z)
        h_tilde = jnp.tanh(i_n + r * h_n)
        h_new = z * h + (1.0 - z) * h_tilde

        y_ref[s] = h_new.astype(y_ref.dtype)
        return h_new

    h_final = lax.fori_loop(0, tb, step, h_scratch[...], unroll=True)
    h_scratch[...] = h_final


# ---------------------------------------------------------------------------
# pallas_call wrapper for one layer.
# ---------------------------------------------------------------------------
_SINGLE_BUFFER_SUPPORTED = None  # resolved lazily on the first pallas_call


def _const_spec(block_shape, single_buffer):
    """BlockSpec for an operand whose block never changes across the grid."""
    index_map = lambda t: (0,) * len(block_shape)
    if single_buffer:
        # Constant index_map => DMA'd once; single buffering halves its VMEM.
        return pl.BlockSpec(block_shape, index_map,
                            pipeline_mode=pl.Buffered(1))
    return pl.BlockSpec(block_shape, index_map)


def _gru_layer(gi, h0, wh3, bhn, *, tb, single_buffer):
    """Run the recurrence over a (Lp, 3, B, H) precomputed gate stream."""
    Lp, _, B, H = gi.shape
    kernel = functools.partial(_gru_rec_kernel, tb=tb)

    return pl.pallas_call(
        kernel,
        out_shape=jax.ShapeDtypeStruct((Lp, B, H), jnp.float32),
        grid_spec=pltpu.PrefetchScalarGridSpec(
            num_scalar_prefetch=0,
            grid=(Lp // tb,),
            in_specs=[
                pl.BlockSpec((tb, 3, B, H), lambda t: (t, 0, 0, 0)),  # gi
                _const_spec((B, H), single_buffer),                   # h0
                _const_spec((3, H, H), single_buffer),                # W_h
                _const_spec((1, H), single_buffer),                   # b_h (n)
            ],
            out_specs=pl.BlockSpec((tb, B, H), lambda t: (t, 0, 0)),
            scratch_shapes=[pltpu.VMEM((B, H), jnp.float32)],
        ),
        compiler_params=pltpu.CompilerParams(
            # Time recurrence is serial.
            dimension_semantics=("arbitrary",),
            # For large H, set vmem_limit_bytes explicitly and/or cast the
            # weights to bf16 (v7x has only 64 MiB VMEM).
        ),
    )(gi, h0, wh3, bhn)


def _run_gru_layer(gi, h0, wh3, bhn, *, tb):
    """Call the layer kernel, preferring single-buffered resident weights."""
    global _SINGLE_BUFFER_SUPPORTED
    if _SINGLE_BUFFER_SUPPORTED is None:
        try:
            y = jax.block_until_ready(
                _gru_layer(gi, h0, wh3, bhn, tb=tb, single_buffer=True))
            _SINGLE_BUFFER_SUPPORTED = True
            return y
        except Exception:
            # pipeline_mode=pl.Buffered(1) not supported by this JAX build;
            # fall back to default double buffering (correctness unchanged).
            _SINGLE_BUFFER_SUPPORTED = False
    return _gru_layer(gi, h0, wh3, bhn, tb=tb,
                      single_buffer=_SINGLE_BUFFER_SUPPORTED)


# ---------------------------------------------------------------------------
# Public forward pass (matches the PyTorch GRU module semantics).
# ---------------------------------------------------------------------------
def gru_forward(x, params, h_0=None, *, time_block=16):
    """x: (B, L, input_size); params: list of (W_i, b_i, W_h, b_h) per layer.

    Returns (output (B, L, H), h_n (n_layers, B, H)).
    """
    B, L, _ = x.shape
    n_layers = len(params)
    H = params[0][0].shape[1] // 3
    if h_0 is None:
        h_0 = jnp.zeros((n_layers, B, H), dtype=jnp.float32)

    tb = max(1, min(int(time_block), L))
    Lp = pl.cdiv(L, tb) * tb

    layer_in = x.astype(jnp.float32)       # layer 0 input: (B, L, I)
    time_major = False                     # deeper layers: (L, B, H)
    finals = []

    for li, (wi, bi, wh, bh) in enumerate(params):
        in_sz = wi.shape[0]
        wi3 = wi.reshape(in_sz, 3, H).astype(jnp.float32)              # (I,3,H)
        wh3 = jnp.transpose(wh.reshape(H, 3, H), (1, 0, 2)).astype(jnp.float32)
        # Fold the r/z hidden biases into the precomputed input gates; keep the
        # n-gate hidden bias separate (it sits inside r * (h@W_h_n + b_h_n)).
        b_fold = (bi + jnp.concatenate([bh[:2 * H],
                                        jnp.zeros((H,), bh.dtype)])
                  ).reshape(1, 3, 1, H).astype(jnp.float32)
        bhn = bh[2 * H:].reshape(1, H).astype(jnp.float32)

        # Hoisted input projection for the whole sequence -> (L, 3, B, H).
        if time_major:
            gi = jnp.einsum('lbi,igh->lgbh', layer_in, wi3,
                            preferred_element_type=jnp.float32) + b_fold
        else:
            gi = jnp.einsum('bli,igh->lgbh', layer_in, wi3,
                            preferred_element_type=jnp.float32) + b_fold

        if Lp != L:
            gi = jnp.pad(gi, ((0, Lp - L), (0, 0), (0, 0), (0, 0)))

        y = _run_gru_layer(gi, h_0[li].astype(jnp.float32), wh3, bhn, tb=tb)
        y = y[:L]                                   # drop padded time steps
        finals.append(y[L - 1])
        layer_in = y
        time_major = True

    output = jnp.transpose(layer_in, (1, 0, 2))     # (B, L, H) — API layout
    h_n = jnp.stack(finals, axis=0)                 # (n_layers, B, H)
    return output, h_n


# ---------------------------------------------------------------------------
# Parameter init (Xavier-normal weights, zero biases) and pure-JAX reference.
# ---------------------------------------------------------------------------
def init_gru_params(key, input_size, hidden_size, n_layers):
    params = []
    for i in range(n_layers):
        in_sz = input_size if i == 0 else hidden_size
        key, k1, k2 = jax.random.split(key, 3)
        std_i = (2.0 / (in_sz + 3 * hidden_size)) ** 0.5
        std_h = (2.0 / (hidden_size + 3 * hidden_size)) ** 0.5
        wi = std_i * jax.random.normal(k1, (in_sz, 3 * hidden_size), jnp.float32)
        wh = std_h * jax.random.normal(k2, (hidden_size, 3 * hidden_size), jnp.float32)
        bi = jnp.zeros((3 * hidden_size,), jnp.float32)
        bh = jnp.zeros((3 * hidden_size,), jnp.float32)
        params.append((wi, bi, wh, bh))
    return params


def _gru_reference(x, params, h_0):
    """Pure-JAX mirror of the PyTorch loop, for validation."""
    B, L, _ = x.shape
    h_t = [h_0[i] for i in range(len(params))]
    outs = []
    for t in range(L):
        inp = x[:, t]
        for i, (wi, bi, wh, bh) in enumerate(params):
            gi = inp @ wi + bi
            gh = h_t[i] @ wh + bh
            H = h_t[i].shape[-1]
            i_r, i_z, i_n = gi[:, :H], gi[:, H:2 * H], gi[:, 2 * H:]
            h_r, h_z, h_n = gh[:, :H], gh[:, H:2 * H], gh[:, 2 * H:]
            r = jax.nn.sigmoid(i_r + h_r)
            z = jax.nn.sigmoid(i_z + h_z)
            h_tilde = jnp.tanh(i_n + r * h_n)
            h_t[i] = z * h_t[i] + (1 - z) * h_tilde
            inp = h_t[i]
        outs.append(h_t[-1])
    return jnp.stack(outs, axis=1), jnp.stack(h_t, axis=0)


if __name__ == "__main__":
    B, L, INPUT, HIDDEN, N_LAYERS = 2, 8, 16, 32, 2

    key = jax.random.PRNGKey(0)
    key, kx = jax.random.split(key)
    x = jax.random.normal(kx, (B, L, INPUT), jnp.float32)
    params = init_gru_params(key, INPUT, HIDDEN, N_LAYERS)

    out, h_n = gru_forward(x, params)
    out = jax.block_until_ready(out)
    h_n = jax.block_until_ready(h_n)

    # Validate against a pure-JAX reference of the PyTorch semantics.
    h0 = jnp.zeros((N_LAYERS, B, HIDDEN), jnp.float32)
    ref_out, ref_hn = _gru_reference(x, params, h0)
    assert out.shape == (B, L, HIDDEN) and h_n.shape == (N_LAYERS, B, HIDDEN)
    assert jnp.allclose(out, ref_out, atol=1e-4, rtol=1e-4)
    assert jnp.allclose(h_n, ref_hn, atol=1e-4, rtol=1e-4)

    print("KERNEL_OK")
</pallas_src>

<mosaic_0001>
module attributes {stable_mosaic.version = 11 : i64} {
  func.func @_gru_rec_kernel(%arg0: i32, %arg1: memref<8x3x2x32xf32, #tpu.memory_space<vmem>>, %arg2: memref<2x32xf32, #tpu.memory_space<vmem>>, %arg3: memref<3x32x32xf32, #tpu.memory_space<vmem>>, %arg4: memref<1x32xf32, #tpu.memory_space<vmem>>, %arg5: memref<8x2x32xf32, #tpu.memory_space<vmem>>, %arg6: memref<2x32xf32, #tpu.memory_space<vmem>>) attributes {dimension_semantics = [#tpu.dimension_semantics<arbitrary>], iteration_bounds = array<i64: 1>, scalar_prefetch = 0 : i64, scratch_operands = 1 : i64, tpu.core_type = #tpu.core_type<tc>, window_params = [{transform_indices = @transform_0, window_bounds = array<i64: 8, 3, 2, 32>}, {pipeline_mode = #tpu.pipeline_mode<synchronous>, transform_indices = @transform_1, window_bounds = array<i64: 2, 32>}, {pipeline_mode = #tpu.pipeline_mode<synchronous>, transform_indices = @transform_2, window_bounds = array<i64: 3, 32, 32>}, {pipeline_mode = #tpu.pipeline_mode<synchronous>, transform_indices = @transform_3, window_bounds = array<i64: 1, 32>}, {transform_indices = @transform_4, window_bounds = array<i64: 8, 2, 32>}]} {
    %c0_i32 = arith.constant 0 : i32
    %0 = arith.cmpi eq, %arg0, %c0_i32 : i32
    %1 = arith.extui %0 : i1 to i32
    %c0_i32_0 = arith.constant 0 : i32
    %2 = arith.cmpi ne, %1, %c0_i32_0 : i32
    scf.if %2 {
      %c0_101 = arith.constant 0 : index
      %c0_102 = arith.constant 0 : index
      %316 = vector.load %arg2[%c0_101, %c0_102] : memref<2x32xf32, #tpu.memory_space<vmem>>, vector<2x32xf32>
      %c0_103 = arith.constant 0 : index
      %c0_104 = arith.constant 0 : index
      %317 = vector.load %arg6[%c0_103, %c0_104] : memref<2x32xf32, #tpu.memory_space<vmem>>, vector<2x32xf32>
      tpu.vector_store %arg6[%c0_103, %c0_104], %316 {strides = array<i32>} : memref<2x32xf32, #tpu.memory_space<vmem>>, vector<2x32xf32>,
    } else {
    }
    %c0 = arith.constant 0 : index
    %c0_1 = arith.constant 0 : index
    %c0_2 = arith.constant 0 : index
    %3 = vector.load %arg3[%c0, %c0_1, %c0_2] : memref<3x32x32xf32, #tpu.memory_space<vmem>>, vector<1x32x32xf32>
    %4 = vector.shape_cast %3 : vector<1x32x32xf32> to vector<32x32xf32>
    %c1 = arith.constant 1 : index
    %c0_3 = arith.constant 0 : index
    %c0_4 = arith.constant 0 : index
    %5 = vector.load %arg3[%c1, %c0_3, %c0_4] : memref<3x32x32xf32, #tpu.memory_space<vmem>>, vector<1x32x32xf32>
    %6 = vector.shape_cast %5 : vector<1x32x32xf32> to vector<32x32xf32>
    %c2 = arith.constant 2 : index
    %c0_5 = arith.constant 0 : index
    %c0_6 = arith.constant 0 : index
    %7 = vector.load %arg3[%c2, %c0_5, %c0_6] : memref<3x32x32xf32, #tpu.memory_space<vmem>>, vector<1x32x32xf32>
    %8 = vector.shape_cast %7 : vector<1x32x32xf32> to vector<32x32xf32>
    %c0_7 = arith.constant 0 : index
    %c0_8 = arith.constant 0 : index
    %9 = vector.load %arg4[%c0_7, %c0_8] : memref<1x32xf32, #tpu.memory_space<vmem>>, vector<1x32xf32>
    %c0_9 = arith.constant 0 : index
    %c0_10 = arith.constant 0 : index
    %10 = vector.load %arg6[%c0_9, %c0_10] : memref<2x32xf32, #tpu.memory_space<vmem>>, vector<2x32xf32>
    %c0_i32_11 = arith.constant 0 : i32
    %11 = arith.index_cast %c0_i32_11 : i32 to index
    %c0_12 = arith.constant 0 : index
    %c0_13 = arith.constant 0 : index
    %c0_14 = arith.constant 0 : index
    %12 = vector.load %arg1[%11, %c0_12, %c0_13, %c0_14] : memref<8x3x2x32xf32, #tpu.memory_space<vmem>>, vector<1x3x2x32xf32>
    %13 = vector.shape_cast %12 : vector<1x3x2x32xf32> to vector<3x2x32xf32>
    %14 = vector.extract_strided_slice %13 {offsets = [0, 0, 0], sizes = [1, 2, 32], strides = [1, 1, 1]} : vector<3x2x32xf32> to vector<1x2x32xf32>
    %15 = vector.shape_cast %14 : vector<1x2x32xf32> to vector<2x32xf32>
    %16 = vector.extract_strided_slice %13 {offsets = [1, 0, 0], sizes = [1, 2, 32], strides = [1, 1, 1]} : vector<3x2x32xf32> to vector<1x2x32xf32>
    %17 = vector.shape_cast %16 : vector<1x2x32xf32> to vector<2x32xf32>
    %18 = vector.extract_strided_slice %13 {offsets = [2, 0, 0], sizes = [1, 2, 32], strides = [1, 1, 1]} : vector<3x2x32xf32> to vector<1x2x32xf32>
    %19 = vector.shape_cast %18 : vector<1x2x32xf32> to vector<2x32xf32>
    %cst = arith.constant dense<0.000000e+00> : vector<2x32xf32>
    %20 = tpu.matmul %10, %4, %cst {dimension_numbers = #tpu.dot_dimension_numbers<[1], [0], [0], [1], [0, 0, 1, 1], [], []>} : vector<2x32xf32>, vector<32x32xf32>, vector<2x32xf32> -> vector<2x32xf32>
    %cst_15 = arith.constant dense<0.000000e+00> : vector<2x32xf32>
    %21 = tpu.matmul %10, %6, %cst_15 {dimension_numbers = #tpu.dot_dimension_numbers<[1], [0], [0], [1], [0, 0, 1, 1], [], []>} : vector<2x32xf32>, vector<32x32xf32>, vector<2x32xf32> -> vector<2x32xf32>
    %cst_16 = arith.constant dense<0.000000e+00> : vector<2x32xf32>
    %22 = tpu.matmul %10, %8, %cst_16 {dimension_numbers = #tpu.dot_dimension_numbers<[1], [0], [0], [1], [0, 0, 1, 1], [], []>} : vector<2x32xf32>, vector<32x32xf32>, vector<2x32xf32> -> vector<2x32xf32>
    %23 = vector.broadcast %9 : vector<1x32xf32> to vector<2x32xf32>
    %24 = arith.addf %22, %23 : vector<2x32xf32>
    %25 = arith.addf %15, %20 : vector<2x32xf32>
    %26 = arith.negf %25 : vector<2x32xf32>
    %27 = math.exp %26 : vector<2x32xf32>
    %cst_17 = arith.constant 1.000000e+00 : f32
    %28 = vector.broadcast %cst_17 : f32 to vector<2x32xf32>
    %29 = arith.addf %28, %27 : vector<2x32xf32>
    %30 = arith.divf %28, %29 : vector<2x32xf32>
    %31 = arith.addf %17, %21 : vector<2x32xf32>
    %32 = arith.negf %31 : vector<2x32xf32>
    %33 = math.exp %32 : vector<2x32xf32>
    %cst_18 = arith.constant 1.000000e+00 : f32
    %34 = vector.broadcast %cst_18 : f32 to vector<2x32xf32>
    %35 = arith.addf %34, %33 : vector<2x32xf32>
    %36 = arith.divf %34, %35 : vector<2x32xf32>
    %37 = arith.mulf %30, %24 : vector<2x32xf32>
    %38 = arith.addf %19, %37 : vector<2x32xf32>
    %39 = math.tanh %38 : vector<2x32xf32>
    %40 = arith.mulf %36, %10 : vector<2x32xf32>
    %cst_19 = arith.constant 1.000000e+00 : f32
    %41 = vector.broadcast %cst_19 : f32 to vector<2x32xf32>
    %42 = arith.subf %41, %36 : vector<2x32xf32>
    %43 = arith.mulf %42, %39 : vector<2x32xf32>
    %44 = arith.addf %40, %43 : vector<2x32xf32>
    %45 = arith.index_cast %c0_i32_11 : i32 to index
    %c0_20 = arith.constant 0 : index
    %c0_21 = arith.constant 0 : index
    %46 = vector.load %arg5[%45, %c0_20, %c0_21] : memref<8x2x32xf32, #tpu.memory_space<vmem>>, vector<1x2x32xf32>
    %47 = vector.shape_cast %46 : vector<1x2x32xf32> to vector<2x32xf32>
    %48 = vector.shape_cast %44 : vector<2x32xf32> to vector<1x2x32xf32>
    tpu.vector_store %arg5[%45, %c0_20, %c0_21], %48 {strides = array<i32>} : memref<8x2x32xf32, #tpu.memory_space<vmem>>, vector<1x2x32xf32>,
    %c1_i32 = arith.constant 1 : i32
    %49 = arith.index_cast %c1_i32 : i32 to index
    %c0_22 = arith.constant 0 : index
    %c0_23 = arith.constant 0 : index
    %c0_24 = arith.constant 0 : index
    %50 = vector.load %arg1[%49, %c0_22, %c0_23, %c0_24] : memref<8x3x2x32xf32, #tpu.memory_space<vmem>>, vector<1x3x2x32xf32>
    %51 = vector.shape_cast %50 : vector<1x3x2x32xf32> to vector<3x2x32xf32>
    %52 = vector.extract_strided_slice %51 {offsets = [0, 0, 0], sizes = [1, 2, 32], strides = [1, 1, 1]} : vector<3x2x32xf32> to vector<1x2x32xf32>
    %53 = vector.shape_cast %52 : vector<1x2x32xf32> to vector<2x32xf32>
    %54 = vector.extract_strided_slice %51 {offsets = [1, 0, 0], sizes = [1, 2, 32], strides = [1, 1, 1]} : vector<3x2x32xf32> to vector<1x2x32xf32>
    %55 = vector.shape_cast %54 : vector<1x2x32xf32> to vector<2x32xf32>
    %56 = vector.extract_strided_slice %51 {offsets = [2, 0, 0], sizes = [1, 2, 32], strides = [1, 1, 1]} : vector<3x2x32xf32> to vector<1x2x32xf32>
    %57 = vector.shape_cast %56 : vector<1x2x32xf32> to vector<2x32xf32>
    %cst_25 = arith.constant dense<0.000000e+00> : vector<2x32xf32>
    %58 = tpu.matmul %44, %4, %cst_25 {dimension_numbers = #tpu.dot_dimension_numbers<[1], [0], [0], [1], [0, 0, 1, 1], [], []>} : vector<2x32xf32>, vector<32x32xf32>, vector<2x32xf32> -> vector<2x32xf32>
    %cst_26 = arith.constant dense<0.000000e+00> : vector<2x32xf32>
    %59 = tpu.matmul %44, %6, %cst_26 {dimension_numbers = #tpu.dot_dimension_numbers<[1], [0], [0], [1], [0, 0, 1, 1], [], []>} : vector<2x32xf32>, vector<32x32xf32>, vector<2x32xf32> -> vector<2x32xf32>
    %cst_27 = arith.constant dense<0.000000e+00> : vector<2x32xf32>
    %60 = tpu.matmul %44, %8, %cst_27 {dimension_numbers = #tpu.dot_dimension_numbers<[1], [0], [0], [1], [0, 0, 1, 1], [], []>} : vector<2x32xf32>, vector<32x32xf32>, vector<2x32xf32> -> vector<2x32xf32>
    %61 = vector.broadcast %9 : vector<1x32xf32> to vector<2x32xf32>
    %62 = arith.addf %60, %61 : vector<2x32xf32>
    %63 = arith.addf %53, %58 : vector<2x32xf32>
    %64 = arith.negf %63 : vector<2x32xf32>
    %65 = math.exp %64 : vector<2x32xf32>
    %cst_28 = arith.constant 1.000000e+00 : f32
    %66 = vector.broadcast %cst_28 : f32 to vector<2x32xf32>
    %67 = arith.addf %66, %65 : vector<2x32xf32>
    %68 = arith.divf %66, %67 : vector<2x32xf32>
    %69 = arith.addf %55, %59 : vector<2x32xf32>
    %70 = arith.negf %69 : vector<2x32xf32>
    %71 = math.exp %70 : vector<2x32xf32>
    %cst_29 = arith.constant 1.000000e+00 : f32
    %72 = vector.broadcast %cst_29 : f32 to vector<2x32xf32>
    %73 = arith.addf %72, %71 : vector<2x32xf32>
    %74 = arith.divf %72, %73 : vector<2x32xf32>
    %75 = arith.mulf %68, %62 : vector<2x32xf32>
    %76 = arith.addf %57, %75 : vector<2x32xf32>
    %77 = math.tanh %76 : vector<2x32xf32>
    %78 = arith.mulf %74, %44 : vector<2x32xf32>
    %cst_30 = arith.constant 1.000000e+00 : f32
    %79 = vector.broadcast %cst_30 : f32 to vector<2x32xf32>
    %80 = arith.subf %79, %74 : vector<2x32xf32>
    %81 = arith.mulf %80, %77 : vector<2x32xf32>
    %82 = arith.addf %78, %81 : vector<2x32xf32>
    %83 = arith.index_cast %c1_i32 : i32 to index
    %c0_31 = arith.constant 0 : index
    %c0_32 = arith.constant 0 : index
    %84 = vector.load %arg5[%83, %c0_31, %c0_32] : memref<8x2x32xf32, #tpu.memory_space<vmem>>, vector<1x2x32xf32>
    %85 = vector.shape_cast %84 : vector<1x2x32xf32> to vector<2x32xf32>
    %86 = vector.shape_cast %82 : vector<2x32xf32> to vector<1x2x32xf32>
    tpu.vector_store %arg5[%83, %c0_31, %c0_32], %86 {strides = array<i32>} : memref<8x2x32xf32, #tpu.memory_space<vmem>>, vector<1x2x32xf32>,
    %c2_i32 = arith.constant 2 : i32
    %87 = arith.index_cast %c2_i32 : i32 to index
    %c0_33 = arith.constant 0 : index
    %c0_34 = arith.constant 0 : index
    %c0_35 = arith.constant 0 : index
    %88 = vector.load %arg1[%87, %c0_33, %c0_34, %c0_35] : memref<8x3x2x32xf32, #tpu.memory_space<vmem>>, vector<1x3x2x32xf32>
    %89 = vector.shape_cast %88 : vector<1x3x2x32xf32> to vector<3x2x32xf32>
    %90 = vector.extract_strided_slice %89 {offsets = [0, 0, 0], sizes = [1, 2, 32], strides = [1, 1, 1]} : vector<3x2x32xf32> to vector<1x2x32xf32>
    %91 = vector.shape_cast %90 : vector<1x2x32xf32> to vector<2x32xf32>
    %92 = vector.extract_strided_slice %89 {offsets = [1, 0, 0], sizes = [1, 2, 32], strides = [1, 1, 1]} : vector<3x2x32xf32> to vector<1x2x32xf32>
    %93 = vector.shape_cast %92 : vector<1x2x32xf32> to vector<2x32xf32>
    %94 = vector.extract_strided_slice %89 {offsets = [2, 0, 0], sizes = [1, 2, 32], strides = [1, 1, 1]} : vector<3x2x32xf32> to vector<1x2x32xf32>
    %95 = vector.shape_cast %94 : vector<1x2x32xf32> to vector<2x32xf32>
    %cst_36 = arith.constant dense<0.000000e+00> : vector<2x32xf32>
    %96 = tpu.matmul %82, %4, %cst_36 {dimension_numbers = #tpu.dot_dimension_numbers<[1], [0], [0], [1], [0, 0, 1, 1], [], []>} : vector<2x32xf32>, vector<32x32xf32>, vector<2x32xf32> -> vector<2x32xf32>
    %cst_37 = arith.constant dense<0.000000e+00> : vector<2x32xf32>
    %97 = tpu.matmul %82, %6, %cst_37 {dimension_numbers = #tpu.dot_dimension_numbers<[1], [0], [0], [1], [0, 0, 1, 1], [], []>} : vector<2x32xf32>, vector<32x32xf32>, vector<2x32xf32> -> vector<2x32xf32>
    %cst_38 = arith.constant dense<0.000000e+00> : vector<2x32xf32>
    %98 = tpu.matmul %82, %8, %cst_38 {dimension_numbers = #tpu.dot_dimension_numbers<[1], [0], [0], [1], [0, 0, 1, 1], [], []>} : vector<2x32xf32>, vector<32x32xf32>, vector<2x32xf32> -> vector<2x32xf32>
    %99 = vector.broadcast %9 : vector<1x32xf32> to vector<2x32xf32>
    %100 = arith.addf %98, %99 : vector<2x32xf32>
    %101 = arith.addf %91, %96 : vector<2x32xf32>
    %102 = arith.negf %101 : vector<2x32xf32>
    %103 = math.exp %102 : vector<2x32xf32>
    %cst_39 = arith.constant 1.000000e+00 : f32
    %104 = vector.broadcast %cst_39 : f32 to vector<2x32xf32>
    %105 = arith.addf %104, %103 : vector<2x32xf32>
    %106 = arith.divf %104, %105 : vector<2x32xf32>
    %107 = arith.addf %93, %97 : vector<2x32xf32>
    %108 = arith.negf %107 : vector<2x32xf32>
    %109 = math.exp %108 : vector<2x32xf32>
    %cst_40 = arith.constant 1.000000e+00 : f32
    %110 = vector.broadcast %cst_40 : f32 to vector<2x32xf32>
    %111 = arith.addf %110, %109 : vector<2x32xf32>
    %112 = arith.divf %110, %111 : vector<2x32xf32>
    %113 = arith.mulf %106, %100 : vector<2x32xf32>
    %114 = arith.addf %95, %113 : vector<2x32xf32>
    %115 = math.tanh %114 : vector<2x32xf32>
    %116 = arith.mulf %112, %82 : vector<2x32xf32>
    %cst_41 = arith.constant 1.000000e+00 : f32
    %117 = vector.broadcast %cst_41 : f32 to vector<2x32xf32>
    %118 = arith.subf %117, %112 : vector<2x32xf32>
    %119 = arith.mulf %118, %115 : vector<2x32xf32>
    %120 = arith.addf %116, %119 : vector<2x32xf32>
    %121 = arith.index_cast %c2_i32 : i32 to index
    %c0_42 = arith.constant 0 : index
    %c0_43 = arith.constant 0 : index
    %122 = vector.load %arg5[%121, %c0_42, %c0_43] : memref<8x2x32xf32, #tpu.memory_space<vmem>>, vector<1x2x32xf32>
    %123 = vector.shape_cast %122 : vector<1x2x32xf32> to vector<2x32xf32>
    %124 = vector.shape_cast %120 : vector<2x32xf32> to vector<1x2x32xf32>
    tpu.vector_store %arg5[%121, %c0_42, %c0_43], %124 {strides = array<i32>} : memref<8x2x32xf32, #tpu.memory_space<vmem>>, vector<1x2x32xf32>,
    %c3_i32 = arith.constant 3 : i32
    %125 = arith.index_cast %c3_i32 : i32 to index
    %c0_44 = arith.constant 0 : index
    %c0_45 = arith.constant 0 : index
    %c0_46 = arith.constant 0 : index
    %126 = vector.load %arg1[%125, %c0_44, %c0_45, %c0_46] : memref<8x3x2x32xf32, #tpu.memory_space<vmem>>, vector<1x3x2x32xf32>
    %127 = vector.shape_cast %126 : vector<1x3x2x32xf32> to vector<3x2x32xf32>
    %128 = vector.extract_strided_slice %127 {offsets = [0, 0, 0], sizes = [1, 2, 32], strides = [1, 1, 1]} : vector<3x2x32xf32> to vector<1x2x32xf32>
    %129 = vector.shape_cast %128 : vector<1x2x32xf32> to vector<2x32xf32>
    %130 = vector.extract_strided_slice %127 {offsets = [1, 0, 0], sizes = [1, 2, 32], strides = [1, 1, 1]} : vector<3x2x32xf32> to vector<1x2x32xf32>
    %131 = vector.shape_cast %130 : vector<1x2x32xf32> to vector<2x32xf32>
    %132 = vector.extract_strided_slice %127 {offsets = [2, 0, 0], sizes = [1, 2, 32], strides = [1, 1, 1]} : vector<3x2x32xf32> to vector<1x2x32xf32>
    %133 = vector.shape_cast %132 : vector<1x2x32xf32> to vector<2x32xf32>
    %cst_47 = arith.constant dense<0.000000e+00> : vector<2x32xf32>
    %134 = tpu.matmul %120, %4, %cst_47 {dimension_numbers = #tpu.dot_dimension_numbers<[1], [0], [0], [1], [0, 0, 1, 1], [], []>} : vector<2x32xf32>, vector<32x32xf32>, vector<2x32xf32> -> vector<2x32xf32>
    %cst_48 = arith.constant dense<0.000000e+00> : vector<2x32xf32>
    %135 = tpu.matmul %120, %6, %cst_48 {dimension_numbers = #tpu.dot_dimension_numbers<[1], [0], [0], [1], [0, 0, 1, 1], [], []>} : vector<2x32xf32>, vector<32x32xf32>, vector<2x32xf32> -> vector<2x32xf32>
    %cst_49 = arith.constant dense<0.000000e+00> : vector<2x32xf32>
    %136 = tpu.matmul %120, %8, %cst_49 {dimension_numbers = #tpu.dot_dimension_numbers<[1], [0], [0], [1], [0, 0, 1, 1], [], []>} : vector<2x32xf32>, vector<32x32xf32>, vector<2x32xf32> -> vector<2x32xf32>
    %137 = vector.broadcast %9 : vector<1x32xf32> to vector<2x32xf32>
    %138 = arith.addf %136, %137 : vector<2x32xf32>
    %139 = arith.addf %129, %134 : vector<2x32xf32>
    %140 = arith.negf %139 : vector<2x32xf32>
    %141 = math.exp %140 : vector<2x32xf32>
    %cst_50 = arith.constant 1.000000e+00 : f32
    %142 = vector.broadcast %cst_50 : f32 to vector<2x32xf32>
    %143 = arith.addf %142, %141 : vector<2x32xf32>
    %144 = arith.divf %142, %143 : vector<2x32xf32>
    %145 = arith.addf %131, %135 : vector<2x32xf32>
    %146 = arith.negf %145 : vector<2x32xf32>
    %147 = math.exp %146 : vector<2x32xf32>
    %cst_51 = arith.constant 1.000000e+00 : f32
    %148 = vector.broadcast %cst_51 : f32 to vector<2x32xf32>
    %149 = arith.addf %148, %147 : vector<2x32xf32>
    %150 = arith.divf %148, %149 : vector<2x32xf32>
    %151 = arith.mulf %144, %138 : vector<2x32xf32>
    %152 = arith.addf %133, %151 : vector<2x32xf32>
    %153 = math.tanh %152 : vector<2x32xf32>
    %154 = arith.mulf %150, %120 : vector<2x32xf32>
    %cst_52 = arith.constant 1.000000e+00 : f32
    %155 = vector.broadcast %cst_52 : f32 to vector<2x32xf32>
    %156 = arith.subf %155, %150 : vector<2x32xf32>
    %157 = arith.mulf %156, %153 : vector<2x32xf32>
    %158 = arith.addf %154, %157 : vector<2x32xf32>
    %159 = arith.index_cast %c3_i32 : i32 to index
    %c0_53 = arith.constant 0 : index
    %c0_54 = arith.constant 0 : index
    %160 = vector.load %arg5[%159, %c0_53, %c0_54] : memref<8x2x32xf32, #tpu.memory_space<vmem>>, vector<1x2x32xf32>
    %161 = vector.shape_cast %160 : vector<1x2x32xf32> to vector<2x32xf32>
    %162 = vector.shape_cast %158 : vector<2x32xf32> to vector<1x2x32xf32>
    tpu.vector_store %arg5[%159, %c0_53, %c0_54], %162 {strides = array<i32>} : memref<8x2x32xf32, #tpu.memory_space<vmem>>, vector<1x2x32xf32>,
    %c4_i32 = arith.constant 4 : i32
    %163 = arith.index_cast %c4_i32 : i32 to index
    %c0_55 = arith.constant 0 : index
    %c0_56 = arith.constant 0 : index
    %c0_57 = arith.constant 0 : index
    %164 = vector.load %arg1[%163, %c0_55, %c0_56, %c0_57] : memref<8x3x2x32xf32, #tpu.memory_space<vmem>>, vector<1x3x2x32xf32>
    %165 = vector.shape_cast %164 : vector<1x3x2x32xf32> to vector<3x2x32xf32>
    %166 = vector.extract_strided_slice %165 {offsets = [0, 0, 0], sizes = [1, 2, 32], strides = [1, 1, 1]} : vector<3x2x32xf32> to vector<1x2x32xf32>
    %167 = vector.shape_cast %166 : vector<1x2x32xf32> to vector<2x32xf32>
    %168 = vector.extract_strided_slice %165 {offsets = [1, 0, 0], sizes = [1, 2, 32], strides = [1, 1, 1]} : vector<3x2x32xf32> to vector<1x2x32xf32>
    %169 = vector.shape_cast %168 : vector<1x2x32xf32> to vector<2x32xf32>
    %170 = vector.extract_strided_slice %165 {offsets = [2, 0, 0], sizes = [1, 2, 32], strides = [1, 1, 1]} : vector<3x2x32xf32> to vector<1x2x32xf32>
    %171 = vector.shape_cast %170 : vector<1x2x32xf32> to vector<2x32xf32>
    %cst_58 = arith.constant dense<0.000000e+00> : vector<2x32xf32>
    %172 = tpu.matmul %158, %4, %cst_58 {dimension_numbers = #tpu.dot_dimension_numbers<[1], [0], [0], [1], [0, 0, 1, 1], [], []>} : vector<2x32xf32>, vector<32x32xf32>, vector<2x32xf32> -> vector<2x32xf32>
    %cst_59 = arith.constant dense<0.000000e+00> : vector<2x32xf32>
    %173 = tpu.matmul %158, %6, %cst_59 {dimension_numbers = #tpu.dot_dimension_numbers<[1], [0], [0], [1], [0, 0, 1, 1], [], []>} : vector<2x32xf32>, vector<32x32xf32>, vector<2x32xf32> -> vector<2x32xf32>
    %cst_60 = arith.constant dense<0.000000e+00> : vector<2x32xf32>
    %174 = tpu.matmul %158, %8, %cst_60 {dimension_numbers = #tpu.dot_dimension_numbers<[1], [0], [0], [1], [0, 0, 1, 1], [], []>} : vector<2x32xf32>, vector<32x32xf32>, vector<2x32xf32> -> vector<2x32xf32>
    %175 = vector.broadcast %9 : vector<1x32xf32> to vector<2x32xf32>
    %176 = arith.addf %174, %175 : vector<2x32xf32>
    %177 = arith.addf %167, %172 : vector<2x32xf32>
    %178 = arith.negf %177 : vector<2x32xf32>
    %179 = math.exp %178 : vector<2x32xf32>
    %cst_61 = arith.constant 1.000000e+00 : f32
    %180 = vector.broadcast %cst_61 : f32 to vector<2x32xf32>
    %181 = arith.addf %180, %179 : vector<2x32xf32>
    %182 = arith.divf %180, %181 : vector<2x32xf32>
    %183 = arith.addf %169, %173 : vector<2x32xf32>
    %184 = arith.negf %183 : vector<2x32xf32>
    %185 = math.exp %184 : vector<2x32xf32>
    %cst_62 = arith.constant 1.000000e+00 : f32
    %186 = vector.broadcast %cst_62 : f32 to vector<2x32xf32>
    %187 = arith.addf %186, %185 : vector<2x32xf32>
    %188 = arith.divf %186, %187 : vector<2x32xf32>
    %189 = arith.mulf %182, %176 : vector<2x32xf32>
    %190 = arith.addf %171, %189 : vector<2x32xf32>
    %191 = math.tanh %190 : vector<2x32xf32>
    %192 = arith.mulf %188, %158 : vector<2x32xf32>
    %cst_63 = arith.constant 1.000000e+00 : f32
    %193 = vector.broadcast %cst_63 : f32 to vector<2x32xf32>
    %194 = arith.subf %193, %188 : vector<2x32xf32>
    %195 = arith.mulf %194, %191 : vector<2x32xf32>
    %196 = arith.addf %192, %195 : vector<2x32xf32>
    %197 = arith.index_cast %c4_i32 : i32 to index
    %c0_64 = arith.constant 0 : index
    %c0_65 = arith.constant 0 : index
    %198 = vector.load %arg5[%197, %c0_64, %c0_65] : memref<8x2x32xf32, #tpu.memory_space<vmem>>, vector<1x2x32xf32>
    %199 = vector.shape_cast %198 : vector<1x2x32xf32> to vector<2x32xf32>
    %200 = vector.shape_cast %196 : vector<2x32xf32> to vector<1x2x32xf32>
    tpu.vector_store %arg5[%197, %c0_64, %c0_65], %200 {strides = array<i32>} : memref<8x2x32xf32, #tpu.memory_space<vmem>>, vector<1x2x32xf32>,
    %c5_i32 = arith.constant 5 : i32
    %201 = arith.index_cast %c5_i32 : i32 to index
    %c0_66 = arith.constant 0 : index
    %c0_67 = arith.constant 0 : index
    %c0_68 = arith.constant 0 : index
    %202 = vector.load %arg1[%201, %c0_66, %c0_67, %c0_68] : memref<8x3x2x32xf32, #tpu.memory_space<vmem>>, vector<1x3x2x32xf32>
    %203 = vector.shape_cast %202 : vector<1x3x2x32xf32> to vector<3x2x32xf32>
    %204 = vector.extract_strided_slice %203 {offsets = [0, 0, 0], sizes = [1, 2, 32], strides = [1, 1, 1]} : vector<3x2x32xf32> to vector<1x2x32xf32>
    %205 = vector.shape_cast %204 : vector<1x2x32xf32> to vector<2x32xf32>
    %206 = vector.extract_strided_slice %203 {offsets = [1, 0, 0], sizes = [1, 2, 32], strides = [1, 1, 1]} : vector<3x2x32xf32> to vector<1x2x32xf32>
    %207 = vector.shape_cast %206 : vector<1x2x32xf32> to vector<2x32xf32>
    %208 = vector.extract_strided_slice %203 {offsets = [2, 0, 0], sizes = [1, 2, 32], strides = [1, 1, 1]} : vector<3x2x32xf32> to vector<1x2x32xf32>
    %209 = vector.shape_cast %208 : vector<1x2x32xf32> to vector<2x32xf32>
    %cst_69 = arith.constant dense<0.000000e+00> : vector<2x32xf32>
    %210 = tpu.matmul %196, %4, %cst_69 {dimension_numbers = #tpu.dot_dimension_numbers<[1], [0], [0], [1], [0, 0, 1, 1], [], []>} : vector<2x32xf32>, vector<32x32xf32>, vector<2x32xf32> -> vector<2x32xf32>
    %cst_70 = arith.constant dense<0.000000e+00> : vector<2x32xf32>
    %211 = tpu.matmul %196, %6, %cst_70 {dimension_numbers = #tpu.dot_dimension_numbers<[1], [0], [0], [1], [0, 0, 1, 1], [], []>} : vector<2x32xf32>, vector<32x32xf32>, vector<2x32xf32> -> vector<2x32xf32>
    %cst_71 = arith.constant dense<0.000000e+00> : vector<2x32xf32>
    %212 = tpu.matmul %196, %8, %cst_71 {dimension_numbers = #tpu.dot_dimension_numbers<[1], [0], [0], [1], [0, 0, 1, 1], [], []>} : vector<2x32xf32>, vector<32x32xf32>, vector<2x32xf32> -> vector<2x32xf32>
    %213 = vector.broadcast %9 : vector<1x32xf32> to vector<2x32xf32>
    %214 = arith.addf %212, %213 : vector<2x32xf32>
    %215 = arith.addf %205, %210 : vector<2x32xf32>
    %216 = arith.negf %215 : vector<2x32xf32>
    %217 = math.exp %216 : vector<2x32xf32>
    %cst_72 = arith.constant 1.000000e+00 : f32
    %218 = vector.broadcast %cst_72 : f32 to vector<2x32xf32>
    %219 = arith.addf %218, %217 : vector<2x32xf32>
    %220 = arith.divf %218, %219 : vector<2x32xf32>
    %221 = arith.addf %207, %211 : vector<2x32xf32>
    %222 = arith.negf %221 : vector<2x32xf32>
    %223 = math.exp %222 : vector<2x32xf32>
    %cst_73 = arith.constant 1.000000e+00 : f32
    %224 = vector.broadcast %cst_73 : f32 to vector<2x32xf32>
    %225 = arith.addf %224, %223 : vector<2x32xf32>
    %226 = arith.divf %224, %225 : vector<2x32xf32>
    %227 = arith.mulf %220, %214 : vector<2x32xf32>
    %228 = arith.addf %209, %227 : vector<2x32xf32>
    %229 = math.tanh %228 : vector<2x32xf32>
    %230 = arith.mulf %226, %196 : vector<2x32xf32>
    %cst_74 = arith.constant 1.000000e+00 : f32
    %231 = vector.broadcast %cst_74 : f32 to vector<2x32xf32>
    %232 = arith.subf %231, %226 : vector<2x32xf32>
    %233 = arith.mulf %232, %229 : vector<2x32xf32>
    %234 = arith.addf %230, %233 : vector<2x32xf32>
    %235 = arith.index_cast %c5_i32 : i32 to index
    %c0_75 = arith.constant 0 : index
    %c0_76 = arith.constant 0 : index
    %236 = vector.load %arg5[%235, %c0_75, %c0_76] : memref<8x2x32xf32, #tpu.memory_space<vmem>>, vector<1x2x32xf32>
    %237 = vector.shape_cast %236 : vector<1x2x32xf32> to vector<2x32xf32>
    %238 = vector.shape_cast %234 : vector<2x32xf32> to vector<1x2x32xf32>
    tpu.vector_store %arg5[%235, %c0_75, %c0_76], %238 {strides = array<i32>} : memref<8x2x32xf32, #tpu.memory_space<vmem>>, vector<1x2x32xf32>,
    %c6_i32 = arith.constant 6 : i32
    %239 = arith.index_cast %c6_i32 : i32 to index
    %c0_77 = arith.constant 0 : index
    %c0_78 = arith.constant 0 : index
    %c0_79 = arith.constant 0 : index
    %240 = vector.load %arg1[%239, %c0_77, %c0_78, %c0_79] : memref<8x3x2x32xf32, #tpu.memory_space<vmem>>, vector<1x3x2x32xf32>
    %241 = vector.shape_cast %240 : vector<1x3x2x32xf32> to vector<3x2x32xf32>
    %242 = vector.extract_strided_slice %241 {offsets = [0, 0, 0], sizes = [1, 2, 32], strides = [1, 1, 1]} : vector<3x2x32xf32> to vector<1x2x32xf32>
    %243 = vector.shape_cast %242 : vector<1x2x32xf32> to vector<2x32xf32>
    %244 = vector.extract_strided_slice %241 {offsets = [1, 0, 0], sizes = [1, 2, 32], strides = [1, 1, 1]} : vector<3x2x32xf32> to vector<1x2x32xf32>
    %245 = vector.shape_cast %244 : vector<1x2x32xf32> to vector<2x32xf32>
    %246 = vector.extract_strided_slice %241 {offsets = [2, 0, 0], sizes = [1, 2, 32], strides = [1, 1, 1]} : vector<3x2x32xf32> to vector<1x2x32xf32>
    %247 = vector.shape_cast %246 : vector<1x2x32xf32> to vector<2x32xf32>
    %cst_80 = arith.constant dense<0.000000e+00> : vector<2x32xf32>
    %248 = tpu.matmul %234, %4, %cst_80 {dimension_numbers = #tpu.dot_dimension_numbers<[1], [0], [0], [1], [0, 0, 1, 1], [], []>} : vector<2x32xf32>, vector<32x32xf32>, vector<2x32xf32> -> vector<2x32xf32>
    %cst_81 = arith.constant dense<0.000000e+00> : vector<2x32xf32>
    %249 = tpu.matmul %234, %6, %cst_81 {dimension_numbers = #tpu.dot_dimension_numbers<[1], [0], [0], [1], [0, 0, 1, 1], [], []>} : vector<2x32xf32>, vector<32x32xf32>, vector<2x32xf32> -> vector<2x32xf32>
    %cst_82 = arith.constant dense<0.000000e+00> : vector<2x32xf32>
    %250 = tpu.matmul %234, %8, %cst_82 {dimension_numbers = #tpu.dot_dimension_numbers<[1], [0], [0], [1], [0, 0, 1, 1], [], []>} : vector<2x32xf32>, vector<32x32xf32>, vector<2x32xf32> -> vector<2x32xf32>
    %251 = vector.broadcast %9 : vector<1x32xf32> to vector<2x32xf32>
    %252 = arith.addf %250, %251 : vector<2x32xf32>
    %253 = arith.addf %243, %248 : vector<2x32xf32>
    %254 = arith.negf %253 : vector<2x32xf32>
    %255 = math.exp %254 : vector<2x32xf32>
    %cst_83 = arith.constant 1.000000e+00 : f32
    %256 = vector.broadcast %cst_83 : f32 to vector<2x32xf32>
    %257 = arith.addf %256, %255 : vector<2x32xf32>
    %258 = arith.divf %256, %257 : vector<2x32xf32>
    %259 = arith.addf %245, %249 : vector<2x32xf32>
    %260 = arith.negf %259 : vector<2x32xf32>
    %261 = math.exp %260 : vector<2x32xf32>
    %cst_84 = arith.constant 1.000000e+00 : f32
    %262 = vector.broadcast %cst_84 : f32 to vector<2x32xf32>
    %263 = arith.addf %262, %261 : vector<2x32xf32>
    %264 = arith.divf %262, %263 : vector<2x32xf32>
    %265 = arith.mulf %258, %252 : vector<2x32xf32>
    %266 = arith.addf %247, %265 : vector<2x32xf32>
    %267 = math.tanh %266 : vector<2x32xf32>
    %268 = arith.mulf %264, %234 : vector<2x32xf32>
    %cst_85 = arith.constant 1.000000e+00 : f32
    %269 = vector.broadcast %cst_85 : f32 to vector<2x32xf32>
    %270 = arith.subf %269, %264 : vector<2x32xf32>
    %271 = arith.mulf %270, %267 : vector<2x32xf32>
    %272 = arith.addf %268, %271 : vector<2x32xf32>
    %273 = arith.index_cast %c6_i32 : i32 to index
    %c0_86 = arith.constant 0 : index
    %c0_87 = arith.constant 0 : index
    %274 = vector.load %arg5[%273, %c0_86, %c0_87] : memref<8x2x32xf32, #tpu.memory_space<vmem>>, vector<1x2x32xf32>
    %275 = vector.shape_cast %274 : vector<1x2x32xf32> to vector<2x32xf32>
    %276 = vector.shape_cast %272 : vector<2x32xf32> to vector<1x2x32xf32>
    tpu.vector_store %arg5[%273, %c0_86, %c0_87], %276 {strides = array<i32>} : memref<8x2x32xf32, #tpu.memory_space<vmem>>, vector<1x2x32xf32>,
    %c7_i32 = arith.constant 7 : i32
    %277 = arith.index_cast %c7_i32 : i32 to index
    %c0_88 = arith.constant 0 : index
    %c0_89 = arith.constant 0 : index
    %c0_90 = arith.constant 0 : index
    %278 = vector.load %arg1[%277, %c0_88, %c0_89, %c0_90] : memref<8x3x2x32xf32, #tpu.memory_space<vmem>>, vector<1x3x2x32xf32>
    %279 = vector.shape_cast %278 : vector<1x3x2x32xf32> to vector<3x2x32xf32>
    %280 = vector.extract_strided_slice %279 {offsets = [0, 0, 0], sizes = [1, 2, 32], strides = [1, 1, 1]} : vector<3x2x32xf32> to vector<1x2x32xf32>
    %281 = vector.shape_cast %280 : vector<1x2x32xf32> to vector<2x32xf32>
    %282 = vector.extract_strided_slice %279 {offsets = [1, 0, 0], sizes = [1, 2, 32], strides = [1, 1, 1]} : vector<3x2x32xf32> to vector<1x2x32xf32>
    %283 = vector.shape_cast %282 : vector<1x2x32xf32> to vector<2x32xf32>
    %284 = vector.extract_strided_slice %279 {offsets = [2, 0, 0], sizes = [1, 2, 32], strides = [1, 1, 1]} : vector<3x2x32xf32> to vector<1x2x32xf32>
    %285 = vector.shape_cast %284 : vector<1x2x32xf32> to vector<2x32xf32>
    %cst_91 = arith.constant dense<0.000000e+00> : vector<2x32xf32>
    %286 = tpu.matmul %272, %4, %cst_91 {dimension_numbers = #tpu.dot_dimension_numbers<[1], [0], [0], [1], [0, 0, 1, 1], [], []>} : vector<2x32xf32>, vector<32x32xf32>, vector<2x32xf32> -> vector<2x32xf32>
    %cst_92 = arith.constant dense<0.000000e+00> : vector<2x32xf32>
    %287 = tpu.matmul %272, %6, %cst_92 {dimension_numbers = #tpu.dot_dimension_numbers<[1], [0], [0], [1], [0, 0, 1, 1], [], []>} : vector<2x32xf32>, vector<32x32xf32>, vector<2x32xf32> -> vector<2x32xf32>
    %cst_93 = arith.constant dense<0.000000e+00> : vector<2x32xf32>
    %288 = tpu.matmul %272, %8, %cst_93 {dimension_numbers = #tpu.dot_dimension_numbers<[1], [0], [0], [1], [0, 0, 1, 1], [], []>} : vector<2x32xf32>, vector<32x32xf32>, vector<2x32xf32> -> vector<2x32xf32>
    %289 = vector.broadcast %9 : vector<1x32xf32> to vector<2x32xf32>
    %290 = arith.addf %288, %289 : vector<2x32xf32>
    %291 = arith.addf %281, %286 : vector<2x32xf32>
    %292 = arith.negf %291 : vector<2x32xf32>
    %293 = math.exp %292 : vector<2x32xf32>
    %cst_94 = arith.constant 1.000000e+00 : f32
    %294 = vector.broadcast %cst_94 : f32 to vector<2x32xf32>
    %295 = arith.addf %294, %293 : vector<2x32xf32>
    %296 = arith.divf %294, %295 : vector<2x32xf32>
    %297 = arith.addf %283, %287 : vector<2x32xf32>
    %298 = arith.negf %297 : vector<2x32xf32>
    %299 = math.exp %298 : vector<2x32xf32>
    %cst_95 = arith.constant 1.000000e+00 : f32
    %300 = vector.broadcast %cst_95 : f32 to vector<2x32xf32>
    %301 = arith.addf %300, %299 : vector<2x32xf32>
    %302 = arith.divf %300, %301 : vector<2x32xf32>
    %303 = arith.mulf %296, %290 : vector<2x32xf32>
    %304 = arith.addf %285, %303 : vector<2x32xf32>
    %305 = math.tanh %304 : vector<2x32xf32>
    %306 = arith.mulf %302, %272 : vector<2x32xf32>
    %cst_96 = arith.constant 1.000000e+00 : f32
    %307 = vector.broadcast %cst_96 : f32 to vector<2x32xf32>
    %308 = arith.subf %307, %302 : vector<2x32xf32>
    %309 = arith.mulf %308, %305 : vector<2x32xf32>
    %310 = arith.addf %306, %309 : vector<2x32xf32>
    %311 = arith.index_cast %c7_i32 : i32 to index
    %c0_97 = arith.constant 0 : index
    %c0_98 = arith.constant 0 : index
    %312 = vector.load %arg5[%311, %c0_97, %c0_98] : memref<8x2x32xf32, #tpu.memory_space<vmem>>, vector<1x2x32xf32>
    %313 = vector.shape_cast %312 : vector<1x2x32xf32> to vector<2x32xf32>
    %314 = vector.shape_cast %310 : vector<2x32xf32> to vector<1x2x32xf32>
    tpu.vector_store %arg5[%311, %c0_97, %c0_98], %314 {strides = array<i32>} : memref<8x2x32xf32, #tpu.memory_space<vmem>>, vector<1x2x32xf32>,
    %c8_i32 = arith.constant 8 : i32
    %c0_99 = arith.constant 0 : index
    %c0_100 = arith.constant 0 : index
    %315 = vector.load %arg6[%c0_99, %c0_100] : memref<2x32xf32, #tpu.memory_space<vmem>>, vector<2x32xf32>
    tpu.vector_store %arg6[%c0_99, %c0_100], %310 {strides = array<i32>} : memref<2x32xf32, #tpu.memory_space<vmem>>, vector<2x32xf32>,
    return
  }
  func.func @transform_0(%arg0: i32) -> (i32, i32, i32, i32) {
    %c0_i32 = arith.constant 0 : i32
    %c0_i32_0 = arith.constant 0 : i32
    %c0_i32_1 = arith.constant 0 : i32
    %c0_i32_2 = arith.constant 0 : i32
    return %arg0, %c0_i32, %c0_i32_0, %c0_i32_1 : i32, i32, i32, i32
  }
  func.func @transform_1(%arg0: i32) -> (i32, i32) {
    %c0_i32 = arith.constant 0 : i32
    %c0_i32_0 = arith.constant 0 : i32
    %c0_i32_1 = arith.constant 0 : i32
    return %c0_i32, %c0_i32_0 : i32, i32
  }
  func.func @transform_2(%arg0: i32) -> (i32, i32, i32) {
    %c0_i32 = arith.constant 0 : i32
    %c0_i32_0 = arith.constant 0 : i32
    %c0_i32_1 = arith.constant 0 : i32
    %c0_i32_2 = arith.constant 0 : i32
    return %c0_i32, %c0_i32_0, %c0_i32_1 : i32, i32, i32
  }
  func.func @transform_3(%arg0: i32) -> (i32, i32) {
    %c0_i32 = arith.constant 0 : i32
    %c0_i32_0 = arith.constant 0 : i32
    %c0_i32_1 = arith.constant 0 : i32
    return %c0_i32, %c0_i32_0 : i32, i32
  }
  func.func @transform_4(%arg0: i32) -> (i32, i32, i32) {
    %c0_i32 = arith.constant 0 : i32
    %c0_i32_0 = arith.constant 0 : i32
    %c0_i32_1 = arith.constant 0 : i32
    return %arg0, %c0_i32, %c0_i32_0 : i32, i32, i32
  }
}

module attributes {stable_mosaic.version = 11 : i64} {
  func.func @_gru_rec_kernel(%arg0: i32, %arg1: memref<8x3x2x32xf32, #tpu.memory_space<vmem>>, %arg2: memref<2x32xf32, #tpu.memory_space<vmem>>, %arg3: memref<3x32x32xf32, #tpu.memory_space<vmem>>, %arg4: memref<1x32xf32, #tpu.memory_space<vmem>>, %arg5: memref<8x2x32xf32, #tpu.memory_space<vmem>>, %arg6: memref<2x32xf32, #tpu.memory_space<vmem>>) attributes {dimension_semantics = [#tpu.dimension_semantics<arbitrary>], iteration_bounds = array<i64: 1>, scalar_prefetch = 0 : i64, scratch_operands = 1 : i64, tpu.core_type = #tpu.core_type<tc>, window_params = [{transform_indices = @transform_0, window_bounds = array<i64: 8, 3, 2, 32>}, {pipeline_mode = #tpu.pipeline_mode<synchronous>, transform_indices = @transform_1, window_bounds = array<i64: 2, 32>}, {pipeline_mode = #tpu.pipeline_mode<synchronous>, transform_indices = @transform_2, window_bounds = array<i64: 3, 32, 32>}, {pipeline_mode = #tpu.pipeline_mode<synchronous>, transform_indices = @transform_3, window_bounds = array<i64: 1, 32>}, {transform_indices = @transform_4, window_bounds = array<i64: 8, 2, 32>}]} {
    %c0_i32 = arith.constant 0 : i32
    %0 = arith.cmpi eq, %arg0, %c0_i32 : i32
    %1 = arith.extui %0 : i1 to i32
    %c0_i32_0 = arith.constant 0 : i32
    %2 = arith.cmpi ne, %1, %c0_i32_0 : i32
    scf.if %2 {
      %c0_101 = arith.constant 0 : index
      %c0_102 = arith.constant 0 : index
      %316 = vector.load %arg2[%c0_101, %c0_102] : memref<2x32xf32, #tpu.memory_space<vmem>>, vector<2x32xf32>
      %c0_103 = arith.constant 0 : index
      %c0_104 = arith.constant 0 : index
      %317 = vector.load %arg6[%c0_103, %c0_104] : memref<2x32xf32, #tpu.memory_space<vmem>>, vector<2x32xf32>
      tpu.vector_store %arg6[%c0_103, %c0_104], %316 {strides = array<i32>} : memref<2x32xf32, #tpu.memory_space<vmem>>, vector<2x32xf32>,
    } else {
    }
    %c0 = arith.constant 0 : index
    %c0_1 = arith.constant 0 : index
    %c0_2 = arith.constant 0 : index
    %3 = vector.load %arg3[%c0, %c0_1, %c0_2] : memref<3x32x32xf32, #tpu.memory_space<vmem>>, vector<1x32x32xf32>
    %4 = vector.shape_cast %3 : vector<1x32x32xf32> to vector<32x32xf32>
    %c1 = arith.constant 1 : index
    %c0_3 = arith.constant 0 : index
    %c0_4 = arith.constant 0 : index
    %5 = vector.load %arg3[%c1, %c0_3, %c0_4] : memref<3x32x32xf32, #tpu.memory_space<vmem>>, vector<1x32x32xf32>
    %6 = vector.shape_cast %5 : vector<1x32x32xf32> to vector<32x32xf32>
    %c2 = arith.constant 2 : index
    %c0_5 = arith.constant 0 : index
    %c0_6 = arith.constant 0 : index
    %7 = vector.load %arg3[%c2, %c0_5, %c0_6] : memref<3x32x32xf32, #tpu.memory_space<vmem>>, vector<1x32x32xf32>
    %8 = vector.shape_cast %7 : vector<1x32x32xf32> to vector<32x32xf32>
    %c0_7 = arith.constant 0 : index
    %c0_8 = arith.constant 0 : index
    %9 = vector.load %arg4[%c0_7, %c0_8] : memref<1x32xf32, #tpu.memory_space<vmem>>, vector<1x32xf32>
    %c0_9 = arith.constant 0 : index
    %c0_10 = arith.constant 0 : index
    %10 = vector.load %arg6[%c0_9, %c0_10] : memref<2x32xf32, #tpu.memory_space<vmem>>, vector<2x32xf32>
    %c0_i32_11 = arith.constant 0 : i32
    %11 = arith.index_cast %c0_i32_11 : i32 to index
    %c0_12 = arith.constant 0 : index
    %c0_13 = arith.constant 0 : index
    %c0_14 = arith.constant 0 : index
    %12 = vector.load %arg1[%11, %c0_12, %c0_13, %c0_14] : memref<8x3x2x32xf32, #tpu.memory_space<vmem>>, vector<1x3x2x32xf32>
    %13 = vector.shape_cast %12 : vector<1x3x2x32xf32> to vector<3x2x32xf32>
    %14 = vector.extract_strided_slice %13 {offsets = [0, 0, 0], sizes = [1, 2, 32], strides = [1, 1, 1]} : vector<3x2x32xf32> to vector<1x2x32xf32>
    %15 = vector.shape_cast %14 : vector<1x2x32xf32> to vector<2x32xf32>
    %16 = vector.extract_strided_slice %13 {offsets = [1, 0, 0], sizes = [1, 2, 32], strides = [1, 1, 1]} : vector<3x2x32xf32> to vector<1x2x32xf32>
    %17 = vector.shape_cast %16 : vector<1x2x32xf32> to vector<2x32xf32>
    %18 = vector.extract_strided_slice %13 {offsets = [2, 0, 0], sizes = [1, 2, 32], strides = [1, 1, 1]} : vector<3x2x32xf32> to vector<1x2x32xf32>
    %19 = vector.shape_cast %18 : vector<1x2x32xf32> to vector<2x32xf32>
    %cst = arith.constant dense<0.000000e+00> : vector<2x32xf32>
    %20 = tpu.matmul %10, %4, %cst {dimension_numbers = #tpu.dot_dimension_numbers<[1], [0], [0], [1], [0, 0, 1, 1], [], []>} : vector<2x32xf32>, vector<32x32xf32>, vector<2x32xf32> -> vector<2x32xf32>
    %cst_15 = arith.constant dense<0.000000e+00> : vector<2x32xf32>
    %21 = tpu.matmul %10, %6, %cst_15 {dimension_numbers = #tpu.dot_dimension_numbers<[1], [0], [0], [1], [0, 0, 1, 1], [], []>} : vector<2x32xf32>, vector<32x32xf32>, vector<2x32xf32> -> vector<2x32xf32>
    %cst_16 = arith.constant dense<0.000000e+00> : vector<2x32xf32>
    %22 = tpu.matmul %10, %8, %cst_16 {dimension_numbers = #tpu.dot_dimension_numbers<[1], [0], [0], [1], [0, 0, 1, 1], [], []>} : vector<2x32xf32>, vector<32x32xf32>, vector<2x32xf32> -> vector<2x32xf32>
    %23 = vector.broadcast %9 : vector<1x32xf32> to vector<2x32xf32>
    %24 = arith.addf %22, %23 : vector<2x32xf32>
    %25 = arith.addf %15, %20 : vector<2x32xf32>
    %26 = arith.negf %25 : vector<2x32xf32>
    %27 = math.exp %26 : vector<2x32xf32>
    %cst_17 = arith.constant 1.000000e+00 : f32
    %28 = vector.broadcast %cst_17 : f32 to vector<2x32xf32>
    %29 = arith.addf %28, %27 : vector<2x32xf32>
    %30 = arith.divf %28, %29 : vector<2x32xf32>
    %31 = arith.addf %17, %21 : vector<2x32xf32>
    %32 = arith.negf %31 : vector<2x32xf32>
    %33 = math.exp %32 : vector<2x32xf32>
    %cst_18 = arith.constant 1.000000e+00 : f32
    %34 = vector.broadcast %cst_18 : f32 to vector<2x32xf32>
    %35 = arith.addf %34, %33 : vector<2x32xf32>
    %36 = arith.divf %34, %35 : vector<2x32xf32>
    %37 = arith.mulf %30, %24 : vector<2x32xf32>
    %38 = arith.addf %19, %37 : vector<2x32xf32>
    %39 = math.tanh %38 : vector<2x32xf32>
    %40 = arith.mulf %36, %10 : vector<2x32xf32>
    %cst_19 = arith.constant 1.000000e+00 : f32
    %41 = vector.broadcast %cst_19 : f32 to vector<2x32xf32>
    %42 = arith.subf %41, %36 : vector<2x32xf32>
    %43 = arith.mulf %42, %39 : vector<2x32xf32>
    %44 = arith.addf %40, %43 : vector<2x32xf32>
    %45 = arith.index_cast %c0_i32_11 : i32 to index
    %c0_20 = arith.constant 0 : index
    %c0_21 = arith.constant 0 : index
    %46 = vector.load %arg5[%45, %c0_20, %c0_21] : memref<8x2x32xf32, #tpu.memory_space<vmem>>, vector<1x2x32xf32>
    %47 = vector.shape_cast %46 : vector<1x2x32xf32> to vector<2x32xf32>
    %48 = vector.shape_cast %44 : vector<2x32xf32> to vector<1x2x32xf32>
    tpu.vector_store %arg5[%45, %c0_20, %c0_21], %48 {strides = array<i32>} : memref<8x2x32xf32, #tpu.memory_space<vmem>>, vector<1x2x32xf32>,
    %c1_i32 = arith.constant 1 : i32
    %49 = arith.index_cast %c1_i32 : i32 to index
    %c0_22 = arith.constant 0 : index
    %c0_23 = arith.constant 0 : index
    %c0_24 = arith.constant 0 : index
    %50 = vector.load %arg1[%49, %c0_22, %c0_23, %c0_24] : memref<8x3x2x32xf32, #tpu.memory_space<vmem>>, vector<1x3x2x32xf32>
    %51 = vector.shape_cast %50 : vector<1x3x2x32xf32> to vector<3x2x32xf32>
    %52 = vector.extract_strided_slice %51 {offsets = [0, 0, 0], sizes = [1, 2, 32], strides = [1, 1, 1]} : vector<3x2x32xf32> to vector<1x2x32xf32>
    %53 = vector.shape_cast %52 : vector<1x2x32xf32> to vector<2x32xf32>
    %54 = vector.extract_strided_slice %51 {offsets = [1, 0, 0], sizes = [1, 2, 32], strides = [1, 1, 1]} : vector<3x2x32xf32> to vector<1x2x32xf32>
    %55 = vector.shape_cast %54 : vector<1x2x32xf32> to vector<2x32xf32>
    %56 = vector.extract_strided_slice %51 {offsets = [2, 0, 0], sizes = [1, 2, 32], strides = [1, 1, 1]} : vector<3x2x32xf32> to vector<1x2x32xf32>
    %57 = vector.shape_cast %56 : vector<1x2x32xf32> to vector<2x32xf32>
    %cst_25 = arith.constant dense<0.000000e+00> : vector<2x32xf32>
    %58 = tpu.matmul %44, %4, %cst_25 {dimension_numbers = #tpu.dot_dimension_numbers<[1], [0], [0], [1], [0, 0, 1, 1], [], []>} : vector<2x32xf32>, vector<32x32xf32>, vector<2x32xf32> -> vector<2x32xf32>
    %cst_26 = arith.constant dense<0.000000e+00> : vector<2x32xf32>
    %59 = tpu.matmul %44, %6, %cst_26 {dimension_numbers = #tpu.dot_dimension_numbers<[1], [0], [0], [1], [0, 0, 1, 1], [], []>} : vector<2x32xf32>, vector<32x32xf32>, vector<2x32xf32> -> vector<2x32xf32>
    %cst_27 = arith.constant dense<0.000000e+00> : vector<2x32xf32>
    %60 = tpu.matmul %44, %8, %cst_27 {dimension_numbers = #tpu.dot_dimension_numbers<[1], [0], [0], [1], [0, 0, 1, 1], [], []>} : vector<2x32xf32>, vector<32x32xf32>, vector<2x32xf32> -> vector<2x32xf32>
    %61 = vector.broadcast %9 : vector<1x32xf32> to vector<2x32xf32>
    %62 = arith.addf %60, %61 : vector<2x32xf32>
    %63 = arith.addf %53, %58 : vector<2x32xf32>
    %64 = arith.negf %63 : vector<2x32xf32>
    %65 = math.exp %64 : vector<2x32xf32>
    %cst_28 = arith.constant 1.000000e+00 : f32
    %66 = vector.broadcast %cst_28 : f32 to vector<2x32xf32>
    %67 = arith.addf %66, %65 : vector<2x32xf32>
    %68 = arith.divf %66, %67 : vector<2x32xf32>
    %69 = arith.addf %55, %59 : vector<2x32xf32>
    %70 = arith.negf %69 : vector<2x32xf32>
    %71 = math.exp %70 : vector<2x32xf32>
    %cst_29 = arith.constant 1.000000e+00 : f32
    %72 = vector.broadcast %cst_29 : f32 to vector<2x32xf32>
    %73 = arith.addf %72, %71 : vector<2x32xf32>
    %74 = arith.divf %72, %73 : vector<2x32xf32>
    %75 = arith.mulf %68, %62 : vector<2x32xf32>
    %76 = arith.addf %57, %75 : vector<2x32xf32>
    %77 = math.tanh %76 : vector<2x32xf32>
    %78 = arith.mulf %74, %44 : vector<2x32xf32>
    %cst_30 = arith.constant 1.000000e+00 : f32
    %79 = vector.broadcast %cst_30 : f32 to vector<2x32xf32>
    %80 = arith.subf %79, %74 : vector<2x32xf32>
    %81 = arith.mulf %80, %77 : vector<2x32xf32>
    %82 = arith.addf %78, %81 : vector<2x32xf32>
    %83 = arith.index_cast %c1_i32 : i32 to index
    %c0_31 = arith.constant 0 : index
    %c0_32 = arith.constant 0 : index
    %84 = vector.load %arg5[%83, %c0_31, %c0_32] : memref<8x2x32xf32, #tpu.memory_space<vmem>>, vector<1x2x32xf32>
    %85 = vector.shape_cast %84 : vector<1x2x32xf32> to vector<2x32xf32>
    %86 = vector.shape_cast %82 : vector<2x32xf32> to vector<1x2x32xf32>
    tpu.vector_store %arg5[%83, %c0_31, %c0_32], %86 {strides = array<i32>} : memref<8x2x32xf32, #tpu.memory_space<vmem>>, vector<1x2x32xf32>,
    %c2_i32 = arith.constant 2 : i32
    %87 = arith.index_cast %c2_i32 : i32 to index
    %c0_33 = arith.constant 0 : index
    %c0_34 = arith.constant 0 : index
    %c0_35 = arith.constant 0 : index
    %88 = vector.load %arg1[%87, %c0_33, %c0_34, %c0_35] : memref<8x3x2x32xf32, #tpu.memory_space<vmem>>, vector<1x3x2x32xf32>
    %89 = vector.shape_cast %88 : vector<1x3x2x32xf32> to vector<3x2x32xf32>
    %90 = vector.extract_strided_slice %89 {offsets = [0, 0, 0], sizes = [1, 2, 32], strides = [1, 1, 1]} : vector<3x2x32xf32> to vector<1x2x32xf32>
    %91 = vector.shape_cast %90 : vector<1x2x32xf32> to vector<2x32xf32>
    %92 = vector.extract_strided_slice %89 {offsets = [1, 0, 0], sizes = [1, 2, 32], strides = [1, 1, 1]} : vector<3x2x32xf32> to vector<1x2x32xf32>
    %93 = vector.shape_cast %92 : vector<1x2x32xf32> to vector<2x32xf32>
    %94 = vector.extract_strided_slice %89 {offsets = [2, 0, 0], sizes = [1, 2, 32], strides = [1, 1, 1]} : vector<3x2x32xf32> to vector<1x2x32xf32>
    %95 = vector.shape_cast %94 : vector<1x2x32xf32> to vector<2x32xf32>
    %cst_36 = arith.constant dense<0.000000e+00> : vector<2x32xf32>
    %96 = tpu.matmul %82, %4, %cst_36 {dimension_numbers = #tpu.dot_dimension_numbers<[1], [0], [0], [1], [0, 0, 1, 1], [], []>} : vector<2x32xf32>, vector<32x32xf32>, vector<2x32xf32> -> vector<2x32xf32>
    %cst_37 = arith.constant dense<0.000000e+00> : vector<2x32xf32>
    %97 = tpu.matmul %82, %6, %cst_37 {dimension_numbers = #tpu.dot_dimension_numbers<[1], [0], [0], [1], [0, 0, 1, 1], [], []>} : vector<2x32xf32>, vector<32x32xf32>, vector<2x32xf32> -> vector<2x32xf32>
    %cst_38 = arith.constant dense<0.000000e+00> : vector<2x32xf32>
    %98 = tpu.matmul %82, %8, %cst_38 {dimension_numbers = #tpu.dot_dimension_numbers<[1], [0], [0], [1], [0, 0, 1, 1], [], []>} : vector<2x32xf32>, vector<32x32xf32>, vector<2x32xf32> -> vector<2x32xf32>
    %99 = vector.broadcast %9 : vector<1x32xf32> to vector<2x32xf32>
    %100 = arith.addf %98, %99 : vector<2x32xf32>
    %101 = arith.addf %91, %96 : vector<2x32xf32>
    %102 = arith.negf %101 : vector<2x32xf32>
    %103 = math.exp %102 : vector<2x32xf32>
    %cst_39 = arith.constant 1.000000e+00 : f32
    %104 = vector.broadcast %cst_39 : f32 to vector<2x32xf32>
    %105 = arith.addf %104, %103 : vector<2x32xf32>
    %106 = arith.divf %104, %105 : vector<2x32xf32>
    %107 = arith.addf %93, %97 : vector<2x32xf32>
    %108 = arith.negf %107 : vector<2x32xf32>
    %109 = math.exp %108 : vector<2x32xf32>
    %cst_40 = arith.constant 1.000000e+00 : f32
    %110 = vector.broadcast %cst_40 : f32 to vector<2x32xf32>
    %111 = arith.addf %110, %109 : vector<2x32xf32>
    %112 = arith.divf %110, %111 : vector<2x32xf32>
    %113 = arith.mulf %106, %100 : vector<2x32xf32>
    %114 = arith.addf %95, %113 : vector<2x32xf32>
    %115 = math.tanh %114 : vector<2x32xf32>
    %116 = arith.mulf %112, %82 : vector<2x32xf32>
    %cst_41 = arith.constant 1.000000e+00 : f32
    %117 = vector.broadcast %cst_41 : f32 to vector<2x32xf32>
    %118 = arith.subf %117, %112 : vector<2x32xf32>
    %119 = arith.mulf %118, %115 : vector<2x32xf32>
    %120 = arith.addf %116, %119 : vector<2x32xf32>
    %121 = arith.index_cast %c2_i32 : i32 to index
    %c0_42 = arith.constant 0 : index
    %c0_43 = arith.constant 0 : index
    %122 = vector.load %arg5[%121, %c0_42, %c0_43] : memref<8x2x32xf32, #tpu.memory_space<vmem>>, vector<1x2x32xf32>
    %123 = vector.shape_cast %122 : vector<1x2x32xf32> to vector<2x32xf32>
    %124 = vector.shape_cast %120 : vector<2x32xf32> to vector<1x2x32xf32>
    tpu.vector_store %arg5[%121, %c0_42, %c0_43], %124 {strides = array<i32>} : memref<8x2x32xf32, #tpu.memory_space<vmem>>, vector<1x2x32xf32>,
    %c3_i32 = arith.constant 3 : i32
    %125 = arith.index_cast %c3_i32 : i32 to index
    %c0_44 = arith.constant 0 : index
    %c0_45 = arith.constant 0 : index
    %c0_46 = arith.constant 0 : index
    %126 = vector.load %arg1[%125, %c0_44, %c0_45, %c0_46] : memref<8x3x2x32xf32, #tpu.memory_space<vmem>>, vector<1x3x2x32xf32>
    %127 = vector.shape_cast %126 : vector<1x3x2x32xf32> to vector<3x2x32xf32>
    %128 = vector.extract_strided_slice %127 {offsets = [0, 0, 0], sizes = [1, 2, 32], strides = [1, 1, 1]} : vector<3x2x32xf32> to vector<1x2x32xf32>
    %129 = vector.shape_cast %128 : vector<1x2x32xf32> to vector<2x32xf32>
    %130 = vector.extract_strided_slice %127 {offsets = [1, 0, 0], sizes = [1, 2, 32], strides = [1, 1, 1]} : vector<3x2x32xf32> to vector<1x2x32xf32>
    %131 = vector.shape_cast %130 : vector<1x2x32xf32> to vector<2x32xf32>
    %132 = vector.extract_strided_slice %127 {offsets = [2, 0, 0], sizes = [1, 2, 32], strides = [1, 1, 1]} : vector<3x2x32xf32> to vector<1x2x32xf32>
    %133 = vector.shape_cast %132 : vector<1x2x32xf32> to vector<2x32xf32>
    %cst_47 = arith.constant dense<0.000000e+00> : vector<2x32xf32>
    %134 = tpu.matmul %120, %4, %cst_47 {dimension_numbers = #tpu.dot_dimension_numbers<[1], [0], [0], [1], [0, 0, 1, 1], [], []>} : vector<2x32xf32>, vector<32x32xf32>, vector<2x32xf32> -> vector<2x32xf32>
    %cst_48 = arith.constant dense<0.000000e+00> : vector<2x32xf32>
    %135 = tpu.matmul %120, %6, %cst_48 {dimension_numbers = #tpu.dot_dimension_numbers<[1], [0], [0], [1], [0, 0, 1, 1], [], []>} : vector<2x32xf32>, vector<32x32xf32>, vector<2x32xf32> -> vector<2x32xf32>
    %cst_49 = arith.constant dense<0.000000e+00> : vector<2x32xf32>
    %136 = tpu.matmul %120, %8, %cst_49 {dimension_numbers = #tpu.dot_dimension_numbers<[1], [0], [0], [1], [0, 0, 1, 1], [], []>} : vector<2x32xf32>, vector<32x32xf32>, vector<2x32xf32> -> vector<2x32xf32>
    %137 = vector.broadcast %9 : vector<1x32xf32> to vector<2x32xf32>
    %138 = arith.addf %136, %137 : vector<2x32xf32>
    %139 = arith.addf %129, %134 : vector<2x32xf32>
    %140 = arith.negf %139 : vector<2x32xf32>
    %141 = math.exp %140 : vector<2x32xf32>
    %cst_50 = arith.constant 1.000000e+00 : f32
    %142 = vector.broadcast %cst_50 : f32 to vector<2x32xf32>
    %143 = arith.addf %142, %141 : vector<2x32xf32>
    %144 = arith.divf %142, %143 : vector<2x32xf32>
    %145 = arith.addf %131, %135 : vector<2x32xf32>
    %146 = arith.negf %145 : vector<2x32xf32>
    %147 = math.exp %146 : vector<2x32xf32>
    %cst_51 = arith.constant 1.000000e+00 : f32
    %148 = vector.broadcast %cst_51 : f32 to vector<2x32xf32>
    %149 = arith.addf %148, %147 : vector<2x32xf32>
    %150 = arith.divf %148, %149 : vector<2x32xf32>
    %151 = arith.mulf %144, %138 : vector<2x32xf32>
    %152 = arith.addf %133, %151 : vector<2x32xf32>
    %153 = math.tanh %152 : vector<2x32xf32>
    %154 = arith.mulf %150, %120 : vector<2x32xf32>
    %cst_52 = arith.constant 1.000000e+00 : f32
    %155 = vector.broadcast %cst_52 : f32 to vector<2x32xf32>
    %156 = arith.subf %155, %150 : vector<2x32xf32>
    %157 = arith.mulf %156, %153 : vector<2x32xf32>
    %158 = arith.addf %154, %157 : vector<2x32xf32>
    %159 = arith.index_cast %c3_i32 : i32 to index
    %c0_53 = arith.constant 0 : index
    %c0_54 = arith.constant 0 : index
    %160 = vector.load %arg5[%159, %c0_53, %c0_54] : memref<8x2x32xf32, #tpu.memory_space<vmem>>, vector<1x2x32xf32>
    %161 = vector.shape_cast %160 : vector<1x2x32xf32> to vector<2x32xf32>
    %162 = vector.shape_cast %158 : vector<2x32xf32> to vector<1x2x32xf32>
    tpu.vector_store %arg5[%159, %c0_53, %c0_54], %162 {strides = array<i32>} : memref<8x2x32xf32, #tpu.memory_space<vmem>>, vector<1x2x32xf32>,
    %c4_i32 = arith.constant 4 : i32
    %163 = arith.index_cast %c4_i32 : i32 to index
    %c0_55 = arith.constant 0 : index
    %c0_56 = arith.constant 0 : index
    %c0_57 = arith.constant 0 : index
    %164 = vector.load %arg1[%163, %c0_55, %c0_56, %c0_57] : memref<8x3x2x32xf32, #tpu.memory_space<vmem>>, vector<1x3x2x32xf32>
    %165 = vector.shape_cast %164 : vector<1x3x2x32xf32> to vector<3x2x32xf32>
    %166 = vector.extract_strided_slice %165 {offsets = [0, 0, 0], sizes = [1, 2, 32], strides = [1, 1, 1]} : vector<3x2x32xf32> to vector<1x2x32xf32>
    %167 = vector.shape_cast %166 : vector<1x2x32xf32> to vector<2x32xf32>
    %168 = vector.extract_strided_slice %165 {offsets = [1, 0, 0], sizes = [1, 2, 32], strides = [1, 1, 1]} : vector<3x2x32xf32> to vector<1x2x32xf32>
    %169 = vector.shape_cast %168 : vector<1x2x32xf32> to vector<2x32xf32>
    %170 = vector.extract_strided_slice %165 {offsets = [2, 0, 0], sizes = [1, 2, 32], strides = [1, 1, 1]} : vector<3x2x32xf32> to vector<1x2x32xf32>
    %171 = vector.shape_cast %170 : vector<1x2x32xf32> to vector<2x32xf32>
    %cst_58 = arith.constant dense<0.000000e+00> : vector<2x32xf32>
    %172 = tpu.matmul %158, %4, %cst_58 {dimension_numbers = #tpu.dot_dimension_numbers<[1], [0], [0], [1], [0, 0, 1, 1], [], []>} : vector<2x32xf32>, vector<32x32xf32>, vector<2x32xf32> -> vector<2x32xf32>
    %cst_59 = arith.constant dense<0.000000e+00> : vector<2x32xf32>
    %173 = tpu.matmul %158, %6, %cst_59 {dimension_numbers = #tpu.dot_dimension_numbers<[1], [0], [0], [1], [0, 0, 1, 1], [], []>} : vector<2x32xf32>, vector<32x32xf32>, vector<2x32xf32> -> vector<2x32xf32>
    %cst_60 = arith.constant dense<0.000000e+00> : vector<2x32xf32>
    %174 = tpu.matmul %158, %8, %cst_60 {dimension_numbers = #tpu.dot_dimension_numbers<[1], [0], [0], [1], [0, 0, 1, 1], [], []>} : vector<2x32xf32>, vector<32x32xf32>, vector<2x32xf32> -> vector<2x32xf32>
    %175 = vector.broadcast %9 : vector<1x32xf32> to vector<2x32xf32>
    %176 = arith.addf %174, %175 : vector<2x32xf32>
    %177 = arith.addf %167, %172 : vector<2x32xf32>
    %178 = arith.negf %177 : vector<2x32xf32>
    %179 = math.exp %178 : vector<2x32xf32>
    %cst_61 = arith.constant 1.000000e+00 : f32
    %180 = vector.broadcast %cst_61 : f32 to vector<2x32xf32>
    %181 = arith.addf %180, %179 : vector<2x32xf32>
    %182 = arith.divf %180, %181 : vector<2x32xf32>
    %183 = arith.addf %169, %173 : vector<2x32xf32>
    %184 = arith.negf %183 : vector<2x32xf32>
    %185 = math.exp %184 : vector<2x32xf32>
    %cst_62 = arith.constant 1.000000e+00 : f32
    %186 = vector.broadcast %cst_62 : f32 to vector<2x32xf32>
    %187 = arith.addf %186, %185 : vector<2x32xf32>
    %188 = arith.divf %186, %187 : vector<2x32xf32>
    %189 = arith.mulf %182, %176 : vector<2x32xf32>
    %190 = arith.addf %171, %189 : vector<2x32xf32>
    %191 = math.tanh %190 : vector<2x32xf32>
    %192 = arith.mulf %188, %158 : vector<2x32xf32>
    %cst_63 = arith.constant 1.000000e+00 : f32
    %193 = vector.broadcast %cst_63 : f32 to vector<2x32xf32>
    %194 = arith.subf %193, %188 : vector<2x32xf32>
    %195 = arith.mulf %194, %191 : vector<2x32xf32>
    %196 = arith.addf %192, %195 : vector<2x32xf32>
    %197 = arith.index_cast %c4_i32 : i32 to index
    %c0_64 = arith.constant 0 : index
    %c0_65 = arith.constant 0 : index
    %198 = vector.load %arg5[%197, %c0_64, %c0_65] : memref<8x2x32xf32, #tpu.memory_space<vmem>>, vector<1x2x32xf32>
    %199 = vector.shape_cast %198 : vector<1x2x32xf32> to vector<2x32xf32>
    %200 = vector.shape_cast %196 : vector<2x32xf32> to vector<1x2x32xf32>
    tpu.vector_store %arg5[%197, %c0_64, %c0_65], %200 {strides = array<i32>} : memref<8x2x32xf32, #tpu.memory_space<vmem>>, vector<1x2x32xf32>,
    %c5_i32 = arith.constant 5 : i32
    %201 = arith.index_cast %c5_i32 : i32 to index
    %c0_66 = arith.constant 0 : index
    %c0_67 = arith.constant 0 : index
    %c0_68 = arith.constant 0 : index
    %202 = vector.load %arg1[%201, %c0_66, %c0_67, %c0_68] : memref<8x3x2x32xf32, #tpu.memory_space<vmem>>, vector<1x3x2x32xf32>
    %203 = vector.shape_cast %202 : vector<1x3x2x32xf32> to vector<3x2x32xf32>
    %204 = vector.extract_strided_slice %203 {offsets = [0, 0, 0], sizes = [1, 2, 32], strides = [1, 1, 1]} : vector<3x2x32xf32> to vector<1x2x32xf32>
    %205 = vector.shape_cast %204 : vector<1x2x32xf32> to vector<2x32xf32>
    %206 = vector.extract_strided_slice %203 {offsets = [1, 0, 0], sizes = [1, 2, 32], strides = [1, 1, 1]} : vector<3x2x32xf32> to vector<1x2x32xf32>
    %207 = vector.shape_cast %206 : vector<1x2x32xf32> to vector<2x32xf32>
    %208 = vector.extract_strided_slice %203 {offsets = [2, 0, 0], sizes = [1, 2, 32], strides = [1, 1, 1]} : vector<3x2x32xf32> to vector<1x2x32xf32>
    %209 = vector.shape_cast %208 : vector<1x2x32xf32> to vector<2x32xf32>
    %cst_69 = arith.constant dense<0.000000e+00> : vector<2x32xf32>
    %210 = tpu.matmul %196, %4, %cst_69 {dimension_numbers = #tpu.dot_dimension_numbers<[1], [0], [0], [1], [0, 0, 1, 1], [], []>} : vector<2x32xf32>, vector<32x32xf32>, vector<2x32xf32> -> vector<2x32xf32>
    %cst_70 = arith.constant dense<0.000000e+00> : vector<2x32xf32>
    %211 = tpu.matmul %196, %6, %cst_70 {dimension_numbers = #tpu.dot_dimension_numbers<[1], [0], [0], [1], [0, 0, 1, 1], [], []>} : vector<2x32xf32>, vector<32x32xf32>, vector<2x32xf32> -> vector<2x32xf32>
    %cst_71 = arith.constant dense<0.000000e+00> : vector<2x32xf32>
    %212 = tpu.matmul %196, %8, %cst_71 {dimension_numbers = #tpu.dot_dimension_numbers<[1], [0], [0], [1], [0, 0, 1, 1], [], []>} : vector<2x32xf32>, vector<32x32xf32>, vector<2x32xf32> -> vector<2x32xf32>
    %213 = vector.broadcast %9 : vector<1x32xf32> to vector<2x32xf32>
    %214 = arith.addf %212, %213 : vector<2x32xf32>
    %215 = arith.addf %205, %210 : vector<2x32xf32>
    %216 = arith.negf %215 : vector<2x32xf32>
    %217 = math.exp %216 : vector<2x32xf32>
    %cst_72 = arith.constant 1.000000e+00 : f32
    %218 = vector.broadcast %cst_72 : f32 to vector<2x32xf32>
    %219 = arith.addf %218, %217 : vector<2x32xf32>
    %220 = arith.divf %218, %219 : vector<2x32xf32>
    %221 = arith.addf %207, %211 : vector<2x32xf32>
    %222 = arith.negf %221 : vector<2x32xf32>
    %223 = math.exp %222 : vector<2x32xf32>
    %cst_73 = arith.constant 1.000000e+00 : f32
    %224 = vector.broadcast %cst_73 : f32 to vector<2x32xf32>
    %225 = arith.addf %224, %223 : vector<2x32xf32>
    %226 = arith.divf %224, %225 : vector<2x32xf32>
    %227 = arith.mulf %220, %214 : vector<2x32xf32>
    %228 = arith.addf %209, %227 : vector<2x32xf32>
    %229 = math.tanh %228 : vector<2x32xf32>
    %230 = arith.mulf %226, %196 : vector<2x32xf32>
    %cst_74 = arith.constant 1.000000e+00 : f32
    %231 = vector.broadcast %cst_74 : f32 to vector<2x32xf32>
    %232 = arith.subf %231, %226 : vector<2x32xf32>
    %233 = arith.mulf %232, %229 : vector<2x32xf32>
    %234 = arith.addf %230, %233 : vector<2x32xf32>
    %235 = arith.index_cast %c5_i32 : i32 to index
    %c0_75 = arith.constant 0 : index
    %c0_76 = arith.constant 0 : index
    %236 = vector.load %arg5[%235, %c0_75, %c0_76] : memref<8x2x32xf32, #tpu.memory_space<vmem>>, vector<1x2x32xf32>
    %237 = vector.shape_cast %236 : vector<1x2x32xf32> to vector<2x32xf32>
    %238 = vector.shape_cast %234 : vector<2x32xf32> to vector<1x2x32xf32>
    tpu.vector_store %arg5[%235, %c0_75, %c0_76], %238 {strides = array<i32>} : memref<8x2x32xf32, #tpu.memory_space<vmem>>, vector<1x2x32xf32>,
    %c6_i32 = arith.constant 6 : i32
    %239 = arith.index_cast %c6_i32 : i32 to index
    %c0_77 = arith.constant 0 : index
    %c0_78 = arith.constant 0 : index
    %c0_79 = arith.constant 0 : index
    %240 = vector.load %arg1[%239, %c0_77, %c0_78, %c0_79] : memref<8x3x2x32xf32, #tpu.memory_space<vmem>>, vector<1x3x2x32xf32>
    %241 = vector.shape_cast %240 : vector<1x3x2x32xf32> to vector<3x2x32xf32>
    %242 = vector.extract_strided_slice %241 {offsets = [0, 0, 0], sizes = [1, 2, 32], strides = [1, 1, 1]} : vector<3x2x32xf32> to vector<1x2x32xf32>
    %243 = vector.shape_cast %242 : vector<1x2x32xf32> to vector<2x32xf32>
    %244 = vector.extract_strided_slice %241 {offsets = [1, 0, 0], sizes = [1, 2, 32], strides = [1, 1, 1]} : vector<3x2x32xf32> to vector<1x2x32xf32>
    %245 = vector.shape_cast %244 : vector<1x2x32xf32> to vector<2x32xf32>
    %246 = vector.extract_strided_slice %241 {offsets = [2, 0, 0], sizes = [1, 2, 32], strides = [1, 1, 1]} : vector<3x2x32xf32> to vector<1x2x32xf32>
    %247 = vector.shape_cast %246 : vector<1x2x32xf32> to vector<2x32xf32>
    %cst_80 = arith.constant dense<0.000000e+00> : vector<2x32xf32>
    %248 = tpu.matmul %234, %4, %cst_80 {dimension_numbers = #tpu.dot_dimension_numbers<[1], [0], [0], [1], [0, 0, 1, 1], [], []>} : vector<2x32xf32>, vector<32x32xf32>, vector<2x32xf32> -> vector<2x32xf32>
    %cst_81 = arith.constant dense<0.000000e+00> : vector<2x32xf32>
    %249 = tpu.matmul %234, %6, %cst_81 {dimension_numbers = #tpu.dot_dimension_numbers<[1], [0], [0], [1], [0, 0, 1, 1], [], []>} : vector<2x32xf32>, vector<32x32xf32>, vector<2x32xf32> -> vector<2x32xf32>
    %cst_82 = arith.constant dense<0.000000e+00> : vector<2x32xf32>
    %250 = tpu.matmul %234, %8, %cst_82 {dimension_numbers = #tpu.dot_dimension_numbers<[1], [0], [0], [1], [0, 0, 1, 1], [], []>} : vector<2x32xf32>, vector<32x32xf32>, vector<2x32xf32> -> vector<2x32xf32>
    %251 = vector.broadcast %9 : vector<1x32xf32> to vector<2x32xf32>
    %252 = arith.addf %250, %251 : vector<2x32xf32>
    %253 = arith.addf %243, %248 : vector<2x32xf32>
    %254 = arith.negf %253 : vector<2x32xf32>
    %255 = math.exp %254 : vector<2x32xf32>
    %cst_83 = arith.constant 1.000000e+00 : f32
    %256 = vector.broadcast %cst_83 : f32 to vector<2x32xf32>
    %257 = arith.addf %256, %255 : vector<2x32xf32>
    %258 = arith.divf %256, %257 : vector<2x32xf32>
    %259 = arith.addf %245, %249 : vector<2x32xf32>
    %260 = arith.negf %259 : vector<2x32xf32>
    %261 = math.exp %260 : vector<2x32xf32>
    %cst_84 = arith.constant 1.000000e+00 : f32
    %262 = vector.broadcast %cst_84 : f32 to vector<2x32xf32>
    %263 = arith.addf %262, %261 : vector<2x32xf32>
    %264 = arith.divf %262, %263 : vector<2x32xf32>
    %265 = arith.mulf %258, %252 : vector<2x32xf32>
    %266 = arith.addf %247, %265 : vector<2x32xf32>
    %267 = math.tanh %266 : vector<2x32xf32>
    %268 = arith.mulf %264, %234 : vector<2x32xf32>
    %cst_85 = arith.constant 1.000000e+00 : f32
    %269 = vector.broadcast %cst_85 : f32 to vector<2x32xf32>
    %270 = arith.subf %269, %264 : vector<2x32xf32>
    %271 = arith.mulf %270, %267 : vector<2x32xf32>
    %272 = arith.addf %268, %271 : vector<2x32xf32>
    %273 = arith.index_cast %c6_i32 : i32 to index
    %c0_86 = arith.constant 0 : index
    %c0_87 = arith.constant 0 : index
    %274 = vector.load %arg5[%273, %c0_86, %c0_87] : memref<8x2x32xf32, #tpu.memory_space<vmem>>, vector<1x2x32xf32>
    %275 = vector.shape_cast %274 : vector<1x2x32xf32> to vector<2x32xf32>
    %276 = vector.shape_cast %272 : vector<2x32xf32> to vector<1x2x32xf32>
    tpu.vector_store %arg5[%273, %c0_86, %c0_87], %276 {strides = array<i32>} : memref<8x2x32xf32, #tpu.memory_space<vmem>>, vector<1x2x32xf32>,
    %c7_i32 = arith.constant 7 : i32
    %277 = arith.index_cast %c7_i32 : i32 to index
    %c0_88 = arith.constant 0 : index
    %c0_89 = arith.constant 0 : index
    %c0_90 = arith.constant 0 : index
    %278 = vector.load %arg1[%277, %c0_88, %c0_89, %c0_90] : memref<8x3x2x32xf32, #tpu.memory_space<vmem>>, vector<1x3x2x32xf32>
    %279 = vector.shape_cast %278 : vector<1x3x2x32xf32> to vector<3x2x32xf32>
    %280 = vector.extract_strided_slice %279 {offsets = [0, 0, 0], sizes = [1, 2, 32], strides = [1, 1, 1]} : vector<3x2x32xf32> to vector<1x2x32xf32>
    %281 = vector.shape_cast %280 : vector<1x2x32xf32> to vector<2x32xf32>
    %282 = vector.extract_strided_slice %279 {offsets = [1, 0, 0], sizes = [1, 2, 32], strides = [1, 1, 1]} : vector<3x2x32xf32> to vector<1x2x32xf32>
    %283 = vector.shape_cast %282 : vector<1x2x32xf32> to vector<2x32xf32>
    %284 = vector.extract_strided_slice %279 {offsets = [2, 0, 0], sizes = [1, 2, 32], strides = [1, 1, 1]} : vector<3x2x32xf32> to vector<1x2x32xf32>
    %285 = vector.shape_cast %284 : vector<1x2x32xf32> to vector<2x32xf32>
    %cst_91 = arith.constant dense<0.000000e+00> : vector<2x32xf32>
    %286 = tpu.matmul %272, %4, %cst_91 {dimension_numbers = #tpu.dot_dimension_numbers<[1], [0], [0], [1], [0, 0, 1, 1], [], []>} : vector<2x32xf32>, vector<32x32xf32>, vector<2x32xf32> -> vector<2x32xf32>
    %cst_92 = arith.constant dense<0.000000e+00> : vector<2x32xf32>
    %287 = tpu.matmul %272, %6, %cst_92 {dimension_numbers = #tpu.dot_dimension_numbers<[1], [0], [0], [1], [0, 0, 1, 1], [], []>} : vector<2x32xf32>, vector<32x32xf32>, vector<2x32xf32> -> vector<2x32xf32>
    %cst_93 = arith.constant dense<0.000000e+00> : vector<2x32xf32>
    %288 = tpu.matmul %272, %8, %cst_93 {dimension_numbers = #tpu.dot_dimension_numbers<[1], [0], [0], [1], [0, 0, 1, 1], [], []>} : vector<2x32xf32>, vector<32x32xf32>, vector<2x32xf32> -> vector<2x32xf32>
    %289 = vector.broadcast %9 : vector<1x32xf32> to vector<2x32xf32>
    %290 = arith.addf %288, %289 : vector<2x32xf32>
    %291 = arith.addf %281, %286 : vector<2x32xf32>
    %292 = arith.negf %291 : vector<2x32xf32>
    %293 = math.exp %292 : vector<2x32xf32>
    %cst_94 = arith.constant 1.000000e+00 : f32
    %294 = vector.broadcast %cst_94 : f32 to vector<2x32xf32>
    %295 = arith.addf %294, %293 : vector<2x32xf32>
    %296 = arith.divf %294, %295 : vector<2x32xf32>
    %297 = arith.addf %283, %287 : vector<2x32xf32>
    %298 = arith.negf %297 : vector<2x32xf32>
    %299 = math.exp %298 : vector<2x32xf32>
    %cst_95 = arith.constant 1.000000e+00 : f32
    %300 = vector.broadcast %cst_95 : f32 to vector<2x32xf32>
    %301 = arith.addf %300, %299 : vector<2x32xf32>
    %302 = arith.divf %300, %301 : vector<2x32xf32>
    %303 = arith.mulf %296, %290 : vector<2x32xf32>
    %304 = arith.addf %285, %303 : vector<2x32xf32>
    %305 = math.tanh %304 : vector<2x32xf32>
    %306 = arith.mulf %302, %272 : vector<2x32xf32>
    %cst_96 = arith.constant 1.000000e+00 : f32
    %307 = vector.broadcast %cst_96 : f32 to vector<2x32xf32>
    %308 = arith.subf %307, %302 : vector<2x32xf32>
    %309 = arith.mulf %308, %305 : vector<2x32xf32>
    %310 = arith.addf %306, %309 : vector<2x32xf32>
    %311 = arith.index_cast %c7_i32 : i32 to index
    %c0_97 = arith.constant 0 : index
    %c0_98 = arith.constant 0 : index
    %312 = vector.load %arg5[%311, %c0_97, %c0_98] : memref<8x2x32xf32, #tpu.memory_space<vmem>>, vector<1x2x32xf32>
    %313 = vector.shape_cast %312 : vector<1x2x32xf32> to vector<2x32xf32>
    %314 = vector.shape_cast %310 : vector<2x32xf32> to vector<1x2x32xf32>
    tpu.vector_store %arg5[%311, %c0_97, %c0_98], %314 {strides = array<i32>} : memref<8x2x32xf32, #tpu.memory_space<vmem>>, vector<1x2x32xf32>,
    %c8_i32 = arith.constant 8 : i32
    %c0_99 = arith.constant 0 : index
    %c0_100 = arith.constant 0 : index
    %315 = vector.load %arg6[%c0_99, %c0_100] : memref<2x32xf32, #tpu.memory_space<vmem>>, vector<2x32xf32>
    tpu.vector_store %arg6[%c0_99, %c0_100], %310 {strides = array<i32>} : memref<2x32xf32, #tpu.memory_space<vmem>>, vector<2x32xf32>,
    return
  }
  func.func @transform_0(%arg0: i32) -> (i32, i32, i32, i32) {
    %c0_i32 = arith.constant 0 : i32
    %c0_i32_0 = arith.constant 0 : i32
    %c0_i32_1 = arith.constant 0 : i32
    %c0_i32_2 = arith.constant 0 : i32
    return %arg0, %c0_i32, %c0_i32_0, %c0_i32_1 : i32, i32, i32, i32
  }
  func.func @transform_1(%arg0: i32) -> (i32, i32) {
    %c0_i32 = arith.constant 0 : i32
    %c0_i32_0 = arith.constant 0 : i32
    %c0_i32_1 = arith.constant 0 : i32
    return %c0_i32, %c0_i32_0 : i32, i32
  }
  func.func @transform_2(%arg0: i32) -> (i32, i32, i32) {
    %c0_i32 = arith.constant 0 : i32
    %c0_i32_0 = arith.constant 0 : i32
    %c0_i32_1 = arith.constant 0 : i32
    %c0_i32_2 = arith.constant 0 : i32
    return %c0_i32, %c0_i32_0, %c0_i32_1 : i32, i32, i32
  }
  func.func @transform_3(%arg0: i32) -> (i32, i32) {
    %c0_i32 = arith.constant 0 : i32
    %c0_i32_0 = arith.constant 0 : i32
    %c0_i32_1 = arith.constant 0 : i32
    return %c0_i32, %c0_i32_0 : i32, i32
  }
  func.func @transform_4(%arg0: i32) -> (i32, i32, i32) {
    %c0_i32 = arith.constant 0 : i32
    %c0_i32_0 = arith.constant 0 : i32
    %c0_i32_1 = arith.constant 0 : i32
    return %arg0, %c0_i32, %c0_i32_0 : i32, i32, i32
  }
}

</mosaic_0001>

<bundles_post_ra>
// kernel: tpu_custom_call.1
= control target key start
LH: loop header
LB: loop body
LE: loop exit
PB: predicated region body
PF: predicated region fallthrough
CT: control target
= control target key end

     0   :  { %9 = vsyncpa [#allocation4], 0  ;;  %s2996_s0 = inlined_call_operand.hbm [shape: f32[8,3,2,32], index: 0, kind: input, shape index: {}]   ;;  %s2997_s1 = inlined_call_operand.hbm [shape: f32[2,32], index: 1, kind: input, shape index: {}]   ;;  %s2998_s2 = inlined_call_operand.hbm [shape: f32[3,32,32], index: 2, kind: input, shape index: {}]   ;;  %s2999_s3 = inlined_call_operand.vmem [shape: f32[1,32], index: 3, kind: input, shape index: {}]   ;;  %s3000_s4 = inlined_call_operand.hbm [shape: f32[8,2,32], index: 4, kind: output, shape index: {}]  }
   0x1   :  { %10 = vsyncpa [#allocation7], 0 }
   0x2   :  { %11 = vsyncpa [#allocation5], 0  ;;  %s2626_s15 = smov [#allocation6]   ;;  %s2627_s17 = smov [#allocation3]  }
   0x3   :  { %s30_s16 = sshll.u32 %s2626_s15, 4  ;;  %s17_s18 = sshll.u32 %s2627_s17, 4  ;;  %s31_s16 = int_to_ptr.vmem [resolvable:$true] %s30_s16  ;;  %s18_s18 = int_to_ptr.vmem [resolvable:$true] %s17_s18 }
   0x4   :  { %s2548_s19 = scalar_lea.vmem %s31_s16, 32  ;;  %p2553_p1 = scmp.lt.s32.totalorder %s31_s16, %s31_s16 }
   0x5   :  { %p2549_p0 = scmp.ne.s32.totalorder %s31_s16, %s2548_s19  ;;  %p2554_p2 = scmp.lt.s32.totalorder %s2548_s19, %s2548_s19 }
   0x7   :  { %p2555_p3 = por %p2554_p2, %p2553_p1 }
   0x9   :  { %p2556_p4 = pnand %p2555_p3, %p2549_p0 }
   0xb   :  { %2559 = shalt.err (!%p2556_p4)
}
   0xc   :  { %33 = dma.hbm_to_vmem [thread:$0]  %s2997_s1, 32, %s31_s16, [#allocation7]  }
   0xd   :  { %s2568_s22 = scalar_lea.vmem %s18_s18, 768  ;;  %p2573_p6 = scmp.lt.s32.totalorder %s18_s18, %s18_s18 }
   0xe   :  { %p2569_p5 = scmp.ne.s32.totalorder %s18_s18, %s2568_s22  ;;  %p2574_p7 = scmp.lt.s32.totalorder %s2568_s22, %s2568_s22 }
  0x10   :  { %p2575_p8 = por %p2574_p7, %p2573_p6 }
  0x12   :  { %p2576_p9 = pnand %p2575_p8, %p2569_p5 }
  0x14   :  { %2579 = shalt.err (!%p2576_p9)
}
  0x15   :  { %s2628_s23 = smov 32   ;;  %s2629_s24 = smov 2  }
  0x16   :  { %23 = dma.hbm_to_vmem [thread:$0]  %s2996_s0, 768, %s18_s18, [#allocation4], %s2628_s23, %s2628_s23, %s2629_s24  }
  0x17   :  { %s2630_s27 = smov [#allocation8]  }
  0x18   :  { %s39_s28 = sshll.u32 %s2630_s27, 4  ;;  %s40_s28 = int_to_ptr.vmem [resolvable:$true] %s39_s28 }
  0x19   :  { %s2588_s1 = scalar_lea.vmem %s40_s28, 1536  ;;  %p2593_p11 = scmp.lt.s32.totalorder %s40_s28, %s40_s28 }
  0x1a   :  { %p2589_p10 = scmp.ne.s32.totalorder %s40_s28, %s2588_s1  ;;  %p2594_p12 = scmp.lt.s32.totalorder %s2588_s1, %s2588_s1 }
  0x1c   :  { %p2595_p13 = por %p2594_p12, %p2593_p11 }
  0x1e   :  { %p2596_p0 = pnand %p2595_p13, %p2589_p10 }
  0x20   :  { %2599 = shalt.err (!%p2596_p0)
}
  0x21   :  { %s2631_s29 = smov 128   ;;  %s2632_s30 = smov 8  }
  0x22   :  { %45 = dma.hbm_to_vmem [thread:$0]  %s2998_s2, 1536, %s40_s28, [#allocation7], %s2631_s29, %s2631_s29, %s2632_s30  }
  0x23   :  { %2620 = dma.done.wait [#allocation4], 768  }
  0x24   :  { %2621 = vsyncadd [#allocation4], 4294966528 }
  0x25   :  { %2622 = dma.done.wait [#allocation7], 1568  }
  0x26   :  { %2623 = vsyncadd [#allocation7], 4294965728  ;;  %v2633_v0 = vmov 0.0   ;;  %vm2634_vm0 = vmmov 0   ;;  %vm62_vm1 = vcmask 254976   ;;  %v2679_v1 = vld [vmem:[#allocation8 + $0x18] sm:$0xff] }
  0x27   :  { %2186 = vmatprep.subr.mxu0 %v2633_v0  ;;  %2194 = vmatprep.mubr.msk.f32.mxu0 %vm2634_vm0, %v2633_v0  ;;  %v2681_v2 = vld [vmem:[#allocation8 + $0x10] sm:$0xff]  ;;  %v61_v3 = vld [vmem:[#allocation6] sm:$0x3]  ;;  %v2687_v5 = vld [vmem:[#allocation8 + $0x8] sm:$0xff]  ;;  %vm83_vm2 = vcmask 261120  }
  0x28   :  { %2197 = vmatprep.subr.mxu1 %v2633_v0  ;;  %2205 = vmatprep.mubr.msk.f32.mxu1 %vm2634_vm0, %v2633_v0  ;;  %v2684_v4 = vld [vmem:[#allocation8 + $0x38] sm:$0xff]  ;;  %63 = vst.msk [vmem:[#allocation2] sm:$0x3] %vm62_vm1, %v61_v3  ;;  %v2691_v6 = vld [vmem:[#allocation8 + $0x30] sm:$0xff]  ;;  %v2695_v7 = vld [vmem:[#allocation8 + $0x28] sm:$0xff] }
  0x29   :  { %2187 = vmatpush3.msra.mxu0 %v2679_v1  ;;  %2198 = vmatpush3.msra.mxu1 %v2684_v4  ;;  %v2698_v8 = vld [vmem:[#allocation8] sm:$0xff]  ;;  %v2711_v10 = vld [vmem:[#allocation8 + $0x58] sm:$0xff]  ;;  %v2720_v12 = vld [vmem:[#allocation8 + $0x50] sm:$0xff] }
  0x2a   :  { %2188 = vmatprep.subr.mxu0 %v2633_v0  ;;  %2199 = vmatprep.subr.mxu1 %v2633_v0  ;;  %v2703_v9 = vld [vmem:[#allocation8 + $0x20] sm:$0xff]  ;;  %v2726_v13 = vld [vmem:[#allocation8 + $0x48] sm:$0xff]  ;;  %v81_v20 = vld [vmem:[#allocation3 + $0x2] sm:$0x3] }
  0x2b   :  { %2189 = vmatpush3.msra.mxu0 %v2681_v2  ;;  %2200 = vmatpush3.msra.mxu1 %v2691_v6  ;;  %v2732_v14 = vld [vmem:[#allocation8 + $0x40] sm:$0xff]  ;;  %v80_v15 = vld [vmem:[#allocation3] sm:$0x3]  ;;  %v2761_v30 = vld [vmem:[%s2999_s3] ss:$0 sm:$0xff]  ;;  %s2635_s3 = smov [#allocation9]  }
  0x2c   :  { %2190 = vmatprep.subr.mxu0 %v2633_v0  ;;  %2201 = vmatprep.subr.mxu1 %v2633_v0  ;;  %v82_v34 = vld [vmem:[#allocation3 + $0x4] sm:$0x3]  ;;  %v327_v43 = vld [vmem:[#allocation3 + $0x6] sm:$0x3]  ;;  %v328_v50 = vld [vmem:[#allocation3 + $0x8] sm:$0x3] }
  0x2d   :  { %2191 = vmatpush3.msra.mxu0 %v2687_v5  ;;  %2202 = vmatpush3.msra.mxu1 %v2695_v7  ;;  %v329_v61 = vld [vmem:[#allocation3 + $0xa] sm:$0x3]  ;;  %s2012_s7 = sshll.u32 %s2635_s3, 4  ;;  %s2013_s7 = int_to_ptr.vmem [resolvable:$true] %s2012_s7 }
  0x2e   :  { %2192 = vmatprep.subr.mxu0 %v2633_v0  ;;  %2203 = vmatprep.subr.mxu1 %v2633_v0  ;;  %s2600_s8 = scalar_lea.vmem %s2013_s7, 256  ;;  %p2605_p2 = scmp.lt.s32.totalorder %s2013_s7, %s2013_s7 }
  0x2f   :  { %2193 = vmatpush3.msra.mxu0 %v2698_v8  ;;  %2204 = vmatpush3.msra.mxu1 %v2703_v9  ;;  %v2713_v11 = vld [vmem:[#allocation2] sm:$0x3]  ;;  %p2601_p1 = scmp.ne.s32.totalorder %s2013_s7, %s2600_s8  ;;  %p2606_p3 = scmp.lt.s32.totalorder %s2600_s8, %s2600_s8 }
  0x30   :  { %2208 = vmatprep.subr.mxu0 %v2633_v0  ;;  %2219 = vmatprep.subr.mxu1 %v2633_v0 }
  0x31   :  { %2195 = vmatmul.mubr.msk.f32.vlgmr.msra.gmra.mxu0 %vm83_vm2, %v2713_v11  ;;  %2206 = vmatmul.mubr.msk.f32.vlgmr.msra.gmra.mxu1 %vm83_vm2, %v2713_v11  ;;  %p2607_p4 = por %p2606_p3, %p2605_p2 }
  0x32   :  { %2209 = vmatpush3.msra.mxu0 %v2711_v10  ;;  %2216 = vmatprep.mubr.msk.f32.mxu0 %vm2634_vm0, %v2633_v0 }
  0x33   :  { %2210 = vmatprep.subr.mxu0 %v2633_v0  ;;  %2220 = vmatpush3.msra.mxu1 %v2679_v1  ;;  %p2608_p5 = pnand %p2607_p4, %p2601_p1 }
  0x34   :  { %2211 = vmatpush3.msra.mxu0 %v2720_v12  ;;  %2221 = vmatprep.subr.mxu1 %v2633_v0 }
  0x35   :  { %2212 = vmatprep.subr.mxu0 %v2633_v0  ;;  %2222 = vmatpush3.msra.mxu1 %v2681_v2 }
  0x36   :  { %2213 = vmatpush3.msra.mxu0 %v2726_v13  ;;  %2223 = vmatprep.subr.mxu1 %v2633_v0 }
  0x37   :  { %2214 = vmatprep.subr.mxu0 %v2633_v0  ;;  %2224 = vmatpush3.msra.mxu1 %v2687_v5 }
  0x38   :  { %2215 = vmatpush3.msra.mxu0 %v2732_v14  ;;  %2225 = vmatprep.subr.mxu1 %v2633_v0 }
  0x39   :  { %2217 = vmatmul.mubr.msk.f32.vlgmr.msra.gmra.mxu0 %vm83_vm2, %v2713_v11  ;;  %2230 = vmatprep.subr.mxu0 %v2633_v0 }
  0x3a   :  { %2231 = vmatpush3.msra.mxu0 %v2684_v4  ;;  %2226 = vmatpush3.msra.mxu1 %v2698_v8 }
  0x3b   :  { %2232 = vmatprep.subr.mxu0 %v2633_v0  ;;  %2227 = vmatprep.mubr.msk.f32.mxu1 %vm2634_vm0, %v2633_v0 }
  0x3c   :  { %2233 = vmatpush3.msra.mxu0 %v2691_v6  ;;  %2238 = vmatprep.mubr.msk.f32.mxu0 %vm2634_vm0, %v2633_v0 }
  0x3d   :  { %2234 = vmatprep.subr.mxu0 %v2633_v0  ;;  %2241 = vmatprep.subr.mxu1 %v2633_v0 }
  0x3e   :  { %2235 = vmatpush3.msra.mxu0 %v2695_v7 }
  0x3f   :  { %2236 = vmatprep.subr.mxu0 %v2633_v0 }
  0x40   :  { %2237 = vmatpush3.msra.mxu0 %v2703_v9 }
  0x41   :  { %2252 = vmatprep.subr.mxu0 %v2633_v0 }
  0xf1   :  { %v153_v16 = vpop.f32.mrf.mxu0  ;;  %v223_v17 = vpop.f32.mrf.mxu1 }
  0xf2   :  { %v303_v18 = vadd.f32 %v153_v16, %v80_v15  ;;  %v310_v23 = vadd.f32 %v223_v17, %v81_v20 }
  0xf3   :  { %v2196_v19 = vpop.f32.mrf.mxu0  ;;  %v2207_v21 = vpop.f32.mrf.mxu1 }
  0xf4   :  { %v2029_v22 = vmul.f32 -1.442695, %v303_v18  ;;  %v2030_v25 = vmul.f32 -1.442695, %v310_v23  ;;  %v567_v19 = vld [vmem:[#allocation3 + $0xc] sm:$0x3] }
  0xf6   :  { %2460 = vpow2.f32 %v2029_v22 }
  0xf7   :  { %2462 = vpow2.f32 %v2030_v25 }
  0xf9   :  { %v299_v24 = vpop.f32.mrf.mxu0 }
  0xfa   :  { %v300_v32 = vadd.f32 %v2761_v30, %v299_v24 }
  0xfb   :  { %v2218_v26 = vpop.f32.mrf.mxu0 }
  0xfc   :  { %v568_v26 = vld [vmem:[#allocation3 + $0xe] sm:$0x3] }
 0x103   :  { %v2461_v27 = vpop.eup %2460 }
 0x104   :  { %v307_v28 = vadd.f32 1.0, %v2461_v27  ;;  %v2463_v29 = vpop.eup %2462 }
 0x105   :  { %v314_v31 = vadd.f32 1.0, %v2463_v29 }
 0x106   :  { %2464 = vrcp.f32 %v307_v28 }
 0x107   :  { %2466 = vrcp.f32 %v314_v31 }
 0x113   :  { %v2465_v33 = vpop.eup %2464 }
 0x114   :  { %v317_v35 = vmul.f32 %v2465_v33, %v300_v32  ;;  %v2467_v37 = vpop.eup %2466 }
 0x115   :  { %v321_v38 = vsub.f32 1.0, %v2467_v37  ;;  %v320_v40 = vmul.f32 %v2467_v37, %v2713_v11 }
 0x116   :  { %v318_v36 = vadd.f32 %v317_v35, %v82_v34 }
 0x118   :  { %2468 = vtanh.f32 %v318_v36 }
 0x125   :  { %v2469_v39 = vpop.eup %2468 }
 0x126   :  { %v322_v41 = vmul.f32 %v2469_v39, %v321_v38  ;;  %v569_v38 = vld [vmem:[#allocation3 + $0x10] sm:$0x3] }
 0x128   :  { %v323_v42 = vadd.f32 %v322_v41, %v320_v40 }
 0x12a   :  { %2228 = vmatmul.mubr.msk.f32.vlgmr.msra.gmra.mxu1 %vm83_vm2, %v323_v42  ;;  %325 = vst.msk [vmem:[#allocation9] sm:$0x3] %vm62_vm1, %v323_v42  ;;  %2239 = vmatmul.mubr.msk.f32.vlgmr.msra.gmra.mxu0 %vm83_vm2, %v323_v42 }
 0x12b   :  { %2242 = vmatpush3.msra.mxu1 %v2711_v10  ;;  %2249 = vmatprep.mubr.msk.f32.mxu1 %vm2634_vm0, %v2633_v0 }
 0x12c   :  { %2243 = vmatprep.subr.mxu1 %v2633_v0  ;;  %2253 = vmatpush3.msra.mxu0 %v2679_v1 }
 0x12d   :  { %2244 = vmatpush3.msra.mxu1 %v2720_v12  ;;  %2254 = vmatprep.subr.mxu0 %v2633_v0 }
 0x12e   :  { %2245 = vmatprep.subr.mxu1 %v2633_v0  ;;  %2255 = vmatpush3.msra.mxu0 %v2681_v2 }
 0x12f   :  { %2246 = vmatpush3.msra.mxu1 %v2726_v13  ;;  %2256 = vmatprep.subr.mxu0 %v2633_v0 }
 0x130   :  { %2247 = vmatprep.subr.mxu1 %v2633_v0  ;;  %2257 = vmatpush3.msra.mxu0 %v2687_v5 }
 0x131   :  { %2248 = vmatpush3.msra.mxu1 %v2732_v14  ;;  %2258 = vmatprep.subr.mxu0 %v2633_v0 }
 0x132   :  { %2250 = vmatmul.mubr.msk.f32.vlgmr.msra.gmra.mxu1 %vm83_vm2, %v323_v42  ;;  %2263 = vmatprep.subr.mxu1 %v2633_v0 }
 0x133   :  { %2264 = vmatpush3.msra.mxu1 %v2684_v4  ;;  %2259 = vmatpush3.msra.mxu0 %v2698_v8 }
 0x134   :  { %2265 = vmatprep.subr.mxu1 %v2633_v0  ;;  %2260 = vmatprep.mubr.msk.f32.mxu0 %vm2634_vm0, %v2633_v0 }
 0x135   :  { %2266 = vmatpush3.msra.mxu1 %v2691_v6  ;;  %2271 = vmatprep.mubr.msk.f32.mxu1 %vm2634_vm0, %v2633_v0 }
 0x136   :  { %2267 = vmatprep.subr.mxu1 %v2633_v0  ;;  %2274 = vmatprep.subr.mxu0 %v2633_v0 }
 0x137   :  { %2268 = vmatpush3.msra.mxu1 %v2695_v7 }
 0x138   :  { %2269 = vmatprep.subr.mxu1 %v2633_v0 }
 0x139   :  { %2270 = vmatpush3.msra.mxu1 %v2703_v9 }
 0x13a   :  { %2285 = vmatprep.subr.mxu1 %v2633_v0 }
 0x1ea   :  { %v399_v44 = vpop.f32.mrf.mxu1  ;;  %v469_v45 = vpop.f32.mrf.mxu0 }
 0x1eb   :  { %v543_v46 = vadd.f32 %v399_v44, %v327_v43  ;;  %v550_v51 = vadd.f32 %v469_v45, %v328_v50 }
 0x1ec   :  { %v2229_v47 = vpop.f32.mrf.mxu1  ;;  %v2240_v48 = vpop.f32.mrf.mxu0 }
 0x1ed   :  { %v2034_v49 = vmul.f32 -1.442695, %v543_v46  ;;  %v2035_v54 = vmul.f32 -1.442695, %v550_v51  ;;  %v807_v47 = vld [vmem:[#allocation3 + $0x12] sm:$0x3] }
 0x1ef   :  { %2470 = vpow2.f32 %v2034_v49 }
 0x1f0   :  { %2472 = vpow2.f32 %v2035_v54  ;;  %v808_v54 = vld [vmem:[#allocation3 + $0x14] sm:$0x3] }
 0x1f2   :  { %v539_v52 = vpop.f32.mrf.mxu1 }
 0x1f3   :  { %v540_v59 = vadd.f32 %v2761_v30, %v539_v52 }
 0x1f4   :  { %v2251_v53 = vpop.f32.mrf.mxu1 }
 0x1fc   :  { %v2471_v55 = vpop.eup %2470 }
 0x1fd   :  { %v547_v56 = vadd.f32 1.0, %v2471_v55  ;;  %v2473_v57 = vpop.eup %2472 }
 0x1fe   :  { %v554_v58 = vadd.f32 1.0, %v2473_v57 }
 0x1ff   :  { %2474 = vrcp.f32 %v547_v56 }
 0x200   :  { %2476 = vrcp.f32 %v554_v58 }
 0x20c   :  { %v2475_v60 = vpop.eup %2474 }
 0x20d   :  { %v557_v62 = vmul.f32 %v2475_v60, %v540_v59  ;;  %v2477_v3 = vpop.eup %2476 }
 0x20e   :  { %v561_v11 = vsub.f32 1.0, %v2477_v3  ;;  %v560_v16 = vmul.f32 %v2477_v3, %v323_v42 }
 0x20f   :  { %v558_v63 = vadd.f32 %v557_v62, %v329_v61 }
 0x211   :  { %2478 = vtanh.f32 %v558_v63 }
 0x21e   :  { %v2479_v15 = vpop.eup %2478 }
 0x21f   :  { %v562_v17 = vmul.f32 %v2479_v15, %v561_v11  ;;  %v809_v11 = vld [vmem:[#allocation3 + $0x16] sm:$0x3] }
 0x221   :  { %v563_v18 = vadd.f32 %v562_v17, %v560_v16 }
 0x223   :  { %2261 = vmatmul.mubr.msk.f32.vlgmr.msra.gmra.mxu0 %vm83_vm2, %v563_v18  ;;  %565 = vst.msk [vmem:[#allocation9 + $0x2] sm:$0x3] %vm62_vm1, %v563_v18  ;;  %2272 = vmatmul.mubr.msk.f32.vlgmr.msra.gmra.mxu1 %vm83_vm2, %v563_v18 }
 0x224   :  { %2275 = vmatpush3.msra.mxu0 %v2711_v10  ;;  %2282 = vmatprep.mubr.msk.f32.mxu0 %vm2634_vm0, %v2633_v0 }
 0x225   :  { %2276 = vmatprep.subr.mxu0 %v2633_v0  ;;  %2286 = vmatpush3.msra.mxu1 %v2679_v1 }
 0x226   :  { %2277 = vmatpush3.msra.mxu0 %v2720_v12  ;;  %2287 = vmatprep.subr.mxu1 %v2633_v0 }
 0x227   :  { %2278 = vmatprep.subr.mxu0 %v2633_v0  ;;  %2288 = vmatpush3.msra.mxu1 %v2681_v2 }
 0x228   :  { %2279 = vmatpush3.msra.mxu0 %v2726_v13  ;;  %2289 = vmatprep.subr.mxu1 %v2633_v0 }
 0x229   :  { %2280 = vmatprep.subr.mxu0 %v2633_v0  ;;  %2290 = vmatpush3.msra.mxu1 %v2687_v5 }
 0x22a   :  { %2281 = vmatpush3.msra.mxu0 %v2732_v14  ;;  %2291 = vmatprep.subr.mxu1 %v2633_v0 }
 0x22b   :  { %2283 = vmatmul.mubr.msk.f32.vlgmr.msra.gmra.mxu0 %vm83_vm2, %v563_v18  ;;  %2296 = vmatprep.subr.mxu0 %v2633_v0 }
 0x22c   :  { %2297 = vmatpush3.msra.mxu0 %v2684_v4  ;;  %2292 = vmatpush3.msra.mxu1 %v2698_v8 }
 0x22d   :  { %2298 = vmatprep.subr.mxu0 %v2633_v0  ;;  %2293 = vmatprep.mubr.msk.f32.mxu1 %vm2634_vm0, %v2633_v0 }
 0x22e   :  { %2299 = vmatpush3.msra.mxu0 %v2691_v6  ;;  %2304 = vmatprep.mubr.msk.f32.mxu0 %vm2634_vm0, %v2633_v0 }
 0x22f   :  { %2300 = vmatprep.subr.mxu0 %v2633_v0  ;;  %2307 = vmatprep.subr.mxu1 %v2633_v0 }
 0x230   :  { %2301 = vmatpush3.msra.mxu0 %v2695_v7 }
 0x231   :  { %2302 = vmatprep.subr.mxu0 %v2633_v0 }
 0x232   :  { %2303 = vmatpush3.msra.mxu0 %v2703_v9 }
 0x233   :  { %2318 = vmatprep.subr.mxu0 %v2633_v0 }
 0x2e3   :  { %v639_v20 = vpop.f32.mrf.mxu0  ;;  %v709_v21 = vpop.f32.mrf.mxu1 }
 0x2e4   :  { %v783_v22 = vadd.f32 %v639_v20, %v567_v19  ;;  %v790_v27 = vadd.f32 %v709_v21, %v568_v26 }
 0x2e5   :  { %v2262_v23 = vpop.f32.mrf.mxu0  ;;  %v2273_v24 = vpop.f32.mrf.mxu1 }
 0x2e6   :  { %v2039_v25 = vmul.f32 -1.442695, %v783_v22  ;;  %v2040_v31 = vmul.f32 -1.442695, %v790_v27  ;;  %v1047_v23 = vld [vmem:[#allocation3 + $0x18] sm:$0x3] }
 0x2e8   :  { %2480 = vpow2.f32 %v2039_v25 }
 0x2e9   :  { %2482 = vpow2.f32 %v2040_v31  ;;  %v1048_v31 = vld [vmem:[#allocation3 + $0x1a] sm:$0x3] }
 0x2eb   :  { %v779_v28 = vpop.f32.mrf.mxu0 }
 0x2ec   :  { %v780_v36 = vadd.f32 %v2761_v30, %v779_v28 }
 0x2ed   :  { %v2284_v29 = vpop.f32.mrf.mxu0 }
 0x2f5   :  { %v2481_v32 = vpop.eup %2480 }
 0x2f6   :  { %v787_v33 = vadd.f32 1.0, %v2481_v32  ;;  %v2483_v34 = vpop.eup %2482 }
 0x2f7   :  { %v794_v35 = vadd.f32 1.0, %v2483_v34 }
 0x2f8   :  { %2484 = vrcp.f32 %v787_v33 }
 0x2f9   :  { %2486 = vrcp.f32 %v794_v35 }
 0x305   :  { %v2485_v37 = vpop.eup %2484 }
 0x306   :  { %v797_v39 = vmul.f32 %v2485_v37, %v780_v36  ;;  %v2487_v41 = vpop.eup %2486 }
 0x307   :  { %v801_v42 = vsub.f32 1.0, %v2487_v41  ;;  %v800_v44 = vmul.f32 %v2487_v41, %v563_v18 }
 0x308   :  { %v798_v40 = vadd.f32 %v797_v39, %v569_v38 }
 0x30a   :  { %2488 = vtanh.f32 %v798_v40 }
 0x317   :  { %v2489_v43 = vpop.eup %2488 }
 0x318   :  { %v802_v45 = vmul.f32 %v2489_v43, %v801_v42  ;;  %v1049_v42 = vld [vmem:[#allocation3 + $0x1c] sm:$0x3] }
 0x31a   :  { %v803_v46 = vadd.f32 %v802_v45, %v800_v44 }
 0x31c   :  { %2294 = vmatmul.mubr.msk.f32.vlgmr.msra.gmra.mxu1 %vm83_vm2, %v803_v46  ;;  %805 = vst.msk [vmem:[#allocation9 + $0x4] sm:$0x3] %vm62_vm1, %v803_v46  ;;  %2305 = vmatmul.mubr.msk.f32.vlgmr.msra.gmra.mxu0 %vm83_vm2, %v803_v46 }
 0x31d   :  { %2308 = vmatpush3.msra.mxu1 %v2711_v10  ;;  %2315 = vmatprep.mubr.msk.f32.mxu1 %vm2634_vm0, %v2633_v0 }
 0x31e   :  { %2309 = vmatprep.subr.mxu1 %v2633_v0  ;;  %2319 = vmatpush3.msra.mxu0 %v2679_v1 }
 0x31f   :  { %2310 = vmatpush3.msra.mxu1 %v2720_v12  ;;  %2320 = vmatprep.subr.mxu0 %v2633_v0 }
 0x320   :  { %2311 = vmatprep.subr.mxu1 %v2633_v0  ;;  %2321 = vmatpush3.msra.mxu0 %v2681_v2 }
 0x321   :  { %2312 = vmatpush3.msra.mxu1 %v2726_v13  ;;  %2322 = vmatprep.subr.mxu0 %v2633_v0 }
 0x322   :  { %2313 = vmatprep.subr.mxu1 %v2633_v0  ;;  %2323 = vmatpush3.msra.mxu0 %v2687_v5 }
 0x323   :  { %2314 = vmatpush3.msra.mxu1 %v2732_v14  ;;  %2324 = vmatprep.subr.mxu0 %v2633_v0 }
 0x324   :  { %2316 = vmatmul.mubr.msk.f32.vlgmr.msra.gmra.mxu1 %vm83_vm2, %v803_v46  ;;  %2329 = vmatprep.subr.mxu1 %v2633_v0 }
 0x325   :  { %2330 = vmatpush3.msra.mxu1 %v2684_v4  ;;  %2325 = vmatpush3.msra.mxu0 %v2698_v8 }
 0x326   :  { %2331 = vmatprep.subr.mxu1 %v2633_v0  ;;  %2326 = vmatprep.mubr.msk.f32.mxu0 %vm2634_vm0, %v2633_v0 }
 0x327   :  { %2332 = vmatpush3.msra.mxu1 %v2691_v6  ;;  %2337 = vmatprep.mubr.msk.f32.mxu1 %vm2634_vm0, %v2633_v0 }
 0x328   :  { %2333 = vmatprep.subr.mxu1 %v2633_v0  ;;  %2340 = vmatprep.subr.mxu0 %v2633_v0 }
 0x329   :  { %2334 = vmatpush3.msra.mxu1 %v2695_v7 }
 0x32a   :  { %2335 = vmatprep.subr.mxu1 %v2633_v0 }
 0x32b   :  { %2336 = vmatpush3.msra.mxu1 %v2703_v9 }
 0x32c   :  { %2351 = vmatprep.subr.mxu1 %v2633_v0 }
 0x3dc   :  { %v879_v48 = vpop.f32.mrf.mxu1  ;;  %v949_v49 = vpop.f32.mrf.mxu0 }
 0x3dd   :  { %v1023_v50 = vadd.f32 %v879_v48, %v807_v47  ;;  %v1030_v55 = vadd.f32 %v949_v49, %v808_v54 }
 0x3de   :  { %v2295_v51 = vpop.f32.mrf.mxu1  ;;  %v2306_v52 = vpop.f32.mrf.mxu0 }
 0x3df   :  { %v2044_v53 = vmul.f32 -1.442695, %v1023_v50  ;;  %v2045_v58 = vmul.f32 -1.442695, %v1030_v55  ;;  %v1287_v51 = vld [vmem:[#allocation3 + $0x1e] sm:$0x3] }
 0x3e1   :  { %2490 = vpow2.f32 %v2044_v53 }
 0x3e2   :  { %2492 = vpow2.f32 %v2045_v58  ;;  %v1288_v58 = vld [vmem:[#allocation3 + $0x20] sm:$0x3] }
 0x3e4   :  { %v1019_v56 = vpop.f32.mrf.mxu1 }
 0x3e5   :  { %v1020_v63 = vadd.f32 %v2761_v30, %v1019_v56 }
 0x3e6   :  { %v2317_v57 = vpop.f32.mrf.mxu1 }
 0x3ee   :  { %v2491_v59 = vpop.eup %2490 }
 0x3ef   :  { %v1027_v60 = vadd.f32 1.0, %v2491_v59  ;;  %v2493_v61 = vpop.eup %2492 }
 0x3f0   :  { %v1034_v62 = vadd.f32 1.0, %v2493_v61 }
 0x3f1   :  { %2494 = vrcp.f32 %v1027_v60 }
 0x3f2   :  { %2496 = vrcp.f32 %v1034_v62 }
 0x3fe   :  { %v2495_v3 = vpop.eup %2494 }
 0x3ff   :  { %v1037_v15 = vmul.f32 %v2495_v3, %v1020_v63  ;;  %v2497_v17 = vpop.eup %2496 }
 0x400   :  { %v1041_v18 = vsub.f32 1.0, %v2497_v17  ;;  %v1040_v20 = vmul.f32 %v2497_v17, %v803_v46 }
 0x401   :  { %v1038_v16 = vadd.f32 %v1037_v15, %v809_v11 }
 0x403   :  { %2498 = vtanh.f32 %v1038_v16 }
 0x410   :  { %v2499_v19 = vpop.eup %2498 }
 0x411   :  { %v1042_v21 = vmul.f32 %v2499_v19, %v1041_v18  ;;  %v1289_v18 = vld [vmem:[#allocation3 + $0x22] sm:$0x3] }
 0x413   :  { %v1043_v22 = vadd.f32 %v1042_v21, %v1040_v20 }
 0x415   :  { %2327 = vmatmul.mubr.msk.f32.vlgmr.msra.gmra.mxu0 %vm83_vm2, %v1043_v22  ;;  %1045 = vst.msk [vmem:[#allocation9 + $0x6] sm:$0x3] %vm62_vm1, %v1043_v22  ;;  %2338 = vmatmul.mubr.msk.f32.vlgmr.msra.gmra.mxu1 %vm83_vm2, %v1043_v22 }
 0x416   :  { %2341 = vmatpush3.msra.mxu0 %v2711_v10  ;;  %2348 = vmatprep.mubr.msk.f32.mxu0 %vm2634_vm0, %v2633_v0 }
 0x417   :  { %2342 = vmatprep.subr.mxu0 %v2633_v0  ;;  %2352 = vmatpush3.msra.mxu1 %v2679_v1 }
 0x418   :  { %2343 = vmatpush3.msra.mxu0 %v2720_v12  ;;  %2353 = vmatprep.subr.mxu1 %v2633_v0 }
 0x419   :  { %2344 = vmatprep.subr.mxu0 %v2633_v0  ;;  %2354 = vmatpush3.msra.mxu1 %v2681_v2 }
 0x41a   :  { %2345 = vmatpush3.msra.mxu0 %v2726_v13  ;;  %2355 = vmatprep.subr.mxu1 %v2633_v0 }
 0x41b   :  { %2346 = vmatprep.subr.mxu0 %v2633_v0  ;;  %2356 = vmatpush3.msra.mxu1 %v2687_v5 }
 0x41c   :  { %2347 = vmatpush3.msra.mxu0 %v2732_v14  ;;  %2357 = vmatprep.subr.mxu1 %v2633_v0 }
 0x41d   :  { %2349 = vmatmul.mubr.msk.f32.vlgmr.msra.gmra.mxu0 %vm83_vm2, %v1043_v22  ;;  %2362 = vmatprep.subr.mxu0 %v2633_v0 }
 0x41e   :  { %2363 = vmatpush3.msra.mxu0 %v2684_v4  ;;  %2358 = vmatpush3.msra.mxu1 %v2698_v8 }
 0x41f   :  { %2364 = vmatprep.subr.mxu0 %v2633_v0  ;;  %2359 = vmatprep.mubr.msk.f32.mxu1 %vm2634_vm0, %v2633_v0 }
 0x420   :  { %2365 = vmatpush3.msra.mxu0 %v2691_v6  ;;  %2370 = vmatprep.mubr.msk.f32.mxu0 %vm2634_vm0, %v2633_v0 }
 0x421   :  { %2366 = vmatprep.subr.mxu0 %v2633_v0  ;;  %2373 = vmatprep.subr.mxu1 %v2633_v0 }
 0x422   :  { %2367 = vmatpush3.msra.mxu0 %v2695_v7 }
 0x423   :  { %2368 = vmatprep.subr.mxu0 %v2633_v0 }
 0x424   :  { %2369 = vmatpush3.msra.mxu0 %v2703_v9 }
 0x425   :  { %2384 = vmatprep.subr.mxu0 %v2633_v0 }
 0x4d5   :  { %v1119_v24 = vpop.f32.mrf.mxu0  ;;  %v1189_v25 = vpop.f32.mrf.mxu1 }
 0x4d6   :  { %v1263_v26 = vadd.f32 %v1119_v24, %v1047_v23  ;;  %v1270_v32 = vadd.f32 %v1189_v25, %v1048_v31 }
 0x4d7   :  { %v2328_v27 = vpop.f32.mrf.mxu0  ;;  %v2339_v28 = vpop.f32.mrf.mxu1 }
 0x4d8   :  { %v2049_v29 = vmul.f32 -1.442695, %v1263_v26  ;;  %v2050_v35 = vmul.f32 -1.442695, %v1270_v32  ;;  %v1528_v28 = vld [vmem:[#allocation3 + $0x26] sm:$0x3] }
 0x4da   :  { %2500 = vpow2.f32 %v2049_v29 }
 0x4db   :  { %2502 = vpow2.f32 %v2050_v35 }
 0x4dd   :  { %v1259_v33 = vpop.f32.mrf.mxu0 }
 0x4de   :  { %v1260_v40 = vadd.f32 %v2761_v30, %v1259_v33 }
 0x4df   :  { %v2350_v34 = vpop.f32.mrf.mxu0 }
 0x4e7   :  { %v2501_v36 = vpop.eup %2500 }
 0x4e8   :  { %v1267_v37 = vadd.f32 1.0, %v2501_v36  ;;  %v2503_v38 = vpop.eup %2502 }
 0x4e9   :  { %v1274_v39 = vadd.f32 1.0, %v2503_v38  ;;  %v1529_v38 = vld [vmem:[#allocation3 + $0x28] sm:$0x3] }
 0x4ea   :  { %2504 = vrcp.f32 %v1267_v37 }
 0x4eb   :  { %2506 = vrcp.f32 %v1274_v39 }
 0x4f7   :  { %v2505_v41 = vpop.eup %2504 }
 0x4f8   :  { %v1277_v43 = vmul.f32 %v2505_v41, %v1260_v40  ;;  %v2507_v45 = vpop.eup %2506 }
 0x4f9   :  { %v1281_v46 = vsub.f32 1.0, %v2507_v45  ;;  %v1280_v48 = vmul.f32 %v2507_v45, %v1043_v22 }
 0x4fa   :  { %v1278_v44 = vadd.f32 %v1277_v43, %v1049_v42 }
 0x4fc   :  { %2508 = vtanh.f32 %v1278_v44 }
 0x509   :  { %v2509_v47 = vpop.eup %2508 }
 0x50a   :  { %v1282_v49 = vmul.f32 %v2509_v47, %v1281_v46  ;;  %v1767_v47 = vld [vmem:[#allocation3 + $0x2a] sm:$0x3] }
 0x50c   :  { %v1283_v50 = vadd.f32 %v1282_v49, %v1280_v48 }
 0x50e   :  { %2360 = vmatmul.mubr.msk.f32.vlgmr.msra.gmra.mxu1 %vm83_vm2, %v1283_v50  ;;  %1285 = vst.msk [vmem:[#allocation9 + $0x8] sm:$0x3] %vm62_vm1, %v1283_v50  ;;  %2371 = vmatmul.mubr.msk.f32.vlgmr.msra.gmra.mxu0 %vm83_vm2, %v1283_v50 }
 0x50f   :  { %2374 = vmatpush3.msra.mxu1 %v2711_v10  ;;  %2381 = vmatprep.mubr.msk.f32.mxu1 %vm2634_vm0, %v2633_v0 }
 0x510   :  { %2375 = vmatprep.subr.mxu1 %v2633_v0  ;;  %2385 = vmatpush3.msra.mxu0 %v2679_v1 }
 0x511   :  { %2376 = vmatpush3.msra.mxu1 %v2720_v12  ;;  %2386 = vmatprep.subr.mxu0 %v2633_v0 }
 0x512   :  { %2377 = vmatprep.subr.mxu1 %v2633_v0  ;;  %2387 = vmatpush3.msra.mxu0 %v2681_v2 }
 0x513   :  { %2378 = vmatpush3.msra.mxu1 %v2726_v13  ;;  %2388 = vmatprep.subr.mxu0 %v2633_v0 }
 0x514   :  { %2379 = vmatprep.subr.mxu1 %v2633_v0  ;;  %2389 = vmatpush3.msra.mxu0 %v2687_v5 }
 0x515   :  { %2380 = vmatpush3.msra.mxu1 %v2732_v14  ;;  %2390 = vmatprep.subr.mxu0 %v2633_v0 }
 0x516   :  { %2382 = vmatmul.mubr.msk.f32.vlgmr.msra.gmra.mxu1 %vm83_vm2, %v1283_v50  ;;  %2395 = vmatprep.subr.mxu1 %v2633_v0 }
 0x517   :  { %2396 = vmatpush3.msra.mxu1 %v2684_v4  ;;  %2391 = vmatpush3.msra.mxu0 %v2698_v8 }
 0x518   :  { %2397 = vmatprep.subr.mxu1 %v2633_v0  ;;  %2392 = vmatprep.mubr.msk.f32.mxu0 %vm2634_vm0, %v2633_v0 }
 0x519   :  { %2398 = vmatpush3.msra.mxu1 %v2691_v6  ;;  %2403 = vmatprep.mubr.msk.f32.mxu1 %vm2634_vm0, %v2633_v0 }
 0x51a   :  { %2399 = vmatprep.subr.mxu1 %v2633_v0  ;;  %2406 = vmatprep.subr.mxu0 %v2633_v0 }
 0x51b   :  { %2400 = vmatpush3.msra.mxu1 %v2695_v7 }
 0x51c   :  { %2401 = vmatprep.subr.mxu1 %v2633_v0 }
 0x51d   :  { %2402 = vmatpush3.msra.mxu1 %v2703_v9 }
 0x51e   :  { %2417 = vmatprep.subr.mxu1 %v2633_v0 }
 0x5ce   :  { %v1359_v52 = vpop.f32.mrf.mxu1  ;;  %v1429_v53 = vpop.f32.mrf.mxu0 }
 0x5cf   :  { %v1503_v54 = vadd.f32 %v1359_v52, %v1287_v51  ;;  %v1510_v59 = vadd.f32 %v1429_v53, %v1288_v58  ;;  %v1768_v53 = vld [vmem:[#allocation3 + $0x2c] sm:$0x3] }
 0x5d0   :  { %v2361_v55 = vpop.f32.mrf.mxu1  ;;  %v2372_v56 = vpop.f32.mrf.mxu0 }
 0x5d1   :  { %v2054_v57 = vmul.f32 -1.442695, %v1503_v54  ;;  %v2055_v62 = vmul.f32 -1.442695, %v1510_v59 }
 0x5d3   :  { %2510 = vpow2.f32 %v2054_v57 }
 0x5d4   :  { %2512 = vpow2.f32 %v2055_v62 }
 0x5d6   :  { %v1499_v60 = vpop.f32.mrf.mxu1 }
 0x5d7   :  { %v1500_v16 = vadd.f32 %v2761_v30, %v1499_v60  ;;  %v1769_v60 = vld [vmem:[#allocation3 + $0x2e] sm:$0x3] }
 0x5d8   :  { %v2383_v61 = vpop.f32.mrf.mxu1 }
 0x5e0   :  { %v2511_v63 = vpop.eup %2510 }
 0x5e1   :  { %v1507_v3 = vadd.f32 1.0, %v2511_v63  ;;  %v2513_v11 = vpop.eup %2512 }
 0x5e2   :  { %v1514_v15 = vadd.f32 1.0, %v2513_v11 }
 0x5e3   :  { %2514 = vrcp.f32 %v1507_v3 }
 0x5e4   :  { %2516 = vrcp.f32 %v1514_v15 }
 0x5f0   :  { %v2515_v17 = vpop.eup %2514 }
 0x5f1   :  { %v1517_v19 = vmul.f32 %v2515_v17, %v1500_v16  ;;  %v2517_v21 = vpop.eup %2516 }
 0x5f2   :  { %v1521_v22 = vsub.f32 1.0, %v2517_v21  ;;  %v1520_v24 = vmul.f32 %v2517_v21, %v1283_v50 }
 0x5f3   :  { %v1518_v20 = vadd.f32 %v1517_v19, %v1289_v18 }
 0x5f5   :  { %2518 = vtanh.f32 %v1518_v20 }
 0x602   :  { %v2519_v23 = vpop.eup %2518 }
 0x603   :  { %v1522_v25 = vmul.f32 %v2519_v23, %v1521_v22 }
 0x605   :  { %v1523_v26 = vadd.f32 %v1522_v25, %v1520_v24 }
 0x607   :  { %2393 = vmatmul.mubr.msk.f32.vlgmr.msra.gmra.mxu0 %vm83_vm2, %v1523_v26  ;;  %1525 = vst.msk [vmem:[#allocation9 + $0xa] sm:$0x3] %vm62_vm1, %v1523_v26  ;;  %2404 = vmatmul.mubr.msk.f32.vlgmr.msra.gmra.mxu1 %vm83_vm2, %v1523_v26 }
 0x608   :  { %2407 = vmatpush3.msra.mxu0 %v2711_v10  ;;  %2414 = vmatprep.mubr.msk.f32.mxu0 %vm2634_vm0, %v2633_v0 }
 0x609   :  { %2408 = vmatprep.subr.mxu0 %v2633_v0  ;;  %2418 = vmatpush3.msra.mxu1 %v2679_v1  ;;  %v1527_v1 = vld [vmem:[#allocation3 + $0x24] sm:$0x3] }
 0x60a   :  { %2409 = vmatpush3.msra.mxu0 %v2720_v12  ;;  %2419 = vmatprep.subr.mxu1 %v2633_v0 }
 0x60b   :  { %2410 = vmatprep.subr.mxu0 %v2633_v0  ;;  %2420 = vmatpush3.msra.mxu1 %v2681_v2 }
 0x60c   :  { %2411 = vmatpush3.msra.mxu0 %v2726_v13  ;;  %2421 = vmatprep.subr.mxu1 %v2633_v0 }
 0x60d   :  { %2412 = vmatprep.subr.mxu0 %v2633_v0  ;;  %2422 = vmatpush3.msra.mxu1 %v2687_v5 }
 0x60e   :  { %2413 = vmatpush3.msra.mxu0 %v2732_v14  ;;  %2423 = vmatprep.subr.mxu1 %v2633_v0 }
 0x60f   :  { %2415 = vmatmul.mubr.msk.f32.vlgmr.msra.gmra.mxu0 %vm83_vm2, %v1523_v26  ;;  %2428 = vmatprep.subr.mxu0 %v2633_v0 }
 0x610   :  { %2429 = vmatpush3.msra.mxu0 %v2684_v4  ;;  %2424 = vmatpush3.msra.mxu1 %v2698_v8 }
 0x611   :  { %2430 = vmatprep.subr.mxu0 %v2633_v0  ;;  %2425 = vmatprep.mubr.msk.f32.mxu1 %vm2634_vm0, %v2633_v0 }
 0x612   :  { %2431 = vmatpush3.msra.mxu0 %v2691_v6  ;;  %2436 = vmatprep.mubr.msk.f32.mxu0 %vm2634_vm0, %v2633_v0 }
 0x613   :  { %2432 = vmatprep.subr.mxu0 %v2633_v0  ;;  %2439 = vmatprep.subr.mxu1 %v2633_v0 }
 0x614   :  { %2433 = vmatpush3.msra.mxu0 %v2695_v7 }
 0x615   :  { %2434 = vmatprep.subr.mxu0 %v2633_v0 }
 0x616   :  { %2435 = vmatpush3.msra.mxu0 %v2703_v9 }
 0x6c7   :  { %v1599_v2 = vpop.f32.mrf.mxu0  ;;  %v1669_v4 = vpop.f32.mrf.mxu1 }
 0x6c8   :  { %v1743_v5 = vadd.f32 %v1599_v2, %v1527_v1  ;;  %v1750_v29 = vadd.f32 %v1669_v4, %v1528_v28 }
 0x6c9   :  { %v2394_v8 = vpop.f32.mrf.mxu0  ;;  %v2405_v27 = vpop.f32.mrf.mxu1 }
 0x6ca   :  { %v2059_v6 = vmul.f32 -1.442695, %v1743_v5  ;;  %v2060_v33 = vmul.f32 -1.442695, %v1750_v29 }
 0x6cc   :  { %2520 = vpow2.f32 %v2059_v6 }
 0x6cd   :  { %2522 = vpow2.f32 %v2060_v33 }
 0x6cf   :  { %v1739_v31 = vpop.f32.mrf.mxu0 }
 0x6d0   :  { %v1740_v9 = vadd.f32 %v2761_v30, %v1739_v31 }
 0x6d1   :  { %v2416_v32 = vpop.f32.mrf.mxu0 }
 0x6d9   :  { %v2521_v34 = vpop.eup %2520 }
 0x6da   :  { %v1747_v7 = vadd.f32 1.0, %v2521_v34  ;;  %v2523_v35 = vpop.eup %2522 }
 0x6db   :  { %v1754_v36 = vadd.f32 1.0, %v2523_v35 }
 0x6dc   :  { %2524 = vrcp.f32 %v1747_v7 }
 0x6dd   :  { %2526 = vrcp.f32 %v1754_v36 }
 0x6e9   :  { %v2525_v37 = vpop.eup %2524 }
 0x6ea   :  { %v1757_v39 = vmul.f32 %v2525_v37, %v1740_v9  ;;  %v2527_v41 = vpop.eup %2526 }
 0x6eb   :  { %v1761_v42 = vsub.f32 1.0, %v2527_v41  ;;  %v1760_v44 = vmul.f32 %v2527_v41, %v1523_v26 }
 0x6ec   :  { %v1758_v40 = vadd.f32 %v1757_v39, %v1529_v38 }
 0x6ee   :  { %2528 = vtanh.f32 %v1758_v40 }
 0x6fb   :  { %v2529_v43 = vpop.eup %2528 }
 0x6fc   :  { %v1762_v45 = vmul.f32 %v2529_v43, %v1761_v42 }
 0x6fe   :  { %v1763_v46 = vadd.f32 %v1762_v45, %v1760_v44 }
 0x700   :  { %2426 = vmatmul.mubr.msk.f32.vlgmr.msra.gmra.mxu1 %vm83_vm2, %v1763_v46  ;;  %1765 = vst.msk [vmem:[#allocation9 + $0xc] sm:$0x3] %vm62_vm1, %v1763_v46  ;;  %2437 = vmatmul.mubr.msk.f32.vlgmr.msra.gmra.mxu0 %vm83_vm2, %v1763_v46 }
 0x701   :  { %2440 = vmatpush3.msra.mxu1 %v2711_v10  ;;  %2447 = vmatprep.mubr.msk.f32.mxu1 %vm2634_vm0, %v2633_v0 }
 0x702   :  { %2441 = vmatprep.subr.mxu1 %v2633_v0 }
 0x703   :  { %2442 = vmatpush3.msra.mxu1 %v2720_v12 }
 0x704   :  { %2443 = vmatprep.subr.mxu1 %v2633_v0 }
 0x705   :  { %2444 = vmatpush3.msra.mxu1 %v2726_v13 }
 0x706   :  { %2445 = vmatprep.subr.mxu1 %v2633_v0 }
 0x707   :  { %2446 = vmatpush3.msra.mxu1 %v2732_v14 }
 0x708   :  { %2448 = vmatmul.mubr.msk.f32.vlgmr.msra.gmra.mxu1 %vm83_vm2, %v1763_v46 }
 0x7c0   :  { %v1839_v48 = vpop.f32.mrf.mxu1  ;;  %v1909_v10 = vpop.f32.mrf.mxu0 }
 0x7c1   :  { %v1983_v49 = vadd.f32 %v1839_v48, %v1767_v47  ;;  %v1990_v12 = vadd.f32 %v1909_v10, %v1768_v53 }
 0x7c2   :  { %v2427_v50 = vpop.f32.mrf.mxu1  ;;  %v2438_v51 = vpop.f32.mrf.mxu0 }
 0x7c3   :  { %v2064_v52 = vmul.f32 -1.442695, %v1983_v49  ;;  %v2065_v56 = vmul.f32 -1.442695, %v1990_v12 }
 0x7c5   :  { %2530 = vpow2.f32 %v2064_v52 }
 0x7c6   :  { %2532 = vpow2.f32 %v2065_v56 }
 0x7c8   :  { %v1979_v54 = vpop.f32.mrf.mxu1 }
 0x7c9   :  { %v1980_v58 = vadd.f32 %v2761_v30, %v1979_v54 }
 0x7ca   :  { %v2449_v55 = vpop.f32.mrf.mxu1 }
 0x7d2   :  { %v2531_v13 = vpop.eup %2530 }
 0x7d3   :  { %v1987_v0 = vadd.f32 1.0, %v2531_v13  ;;  %v2533_v14 = vpop.eup %2532 }
 0x7d4   :  { %v1994_v57 = vadd.f32 1.0, %v2533_v14 }
 0x7d5   :  { %2534 = vrcp.f32 %v1987_v0 }
 0x7d6   :  { %2536 = vrcp.f32 %v1994_v57 }
 0x7e2   :  { %v2535_v59 = vpop.eup %2534 }
 0x7e3   :  { %v1997_v61 = vmul.f32 %v2535_v59, %v1980_v58  ;;  %v2537_v63 = vpop.eup %2536 }
 0x7e4   :  { %v2001_v3 = vsub.f32 1.0, %v2537_v63  ;;  %v2000_v15 = vmul.f32 %v2537_v63, %v1763_v46 }
 0x7e5   :  { %v1998_v62 = vadd.f32 %v1997_v61, %v1769_v60 }
 0x7e7   :  { %2538 = vtanh.f32 %v1998_v62 }
 0x7f4   :  { %v2539_v11 = vpop.eup %2538 }
 0x7f5   :  { %v2002_v16 = vmul.f32 %v2539_v11, %v2001_v3 }
 0x7f7   :  { %v2003_v17 = vadd.f32 %v2002_v16, %v2000_v15 }
 0x7f9   :  { %2006 = vst.msk [vmem:[#allocation2] sm:$0x3] %vm62_vm1, %v2003_v17  ;;  %2005 = vst.msk [vmem:[#allocation9 + $0xe] sm:$0x3] %vm62_vm1, %v2003_v17 }
 0x7fa   :  { %2611 = shalt.err (!%p2608_p5)
}
 0x7fb   :  { %2018 = dma.vmem_to_hbm [thread:$0]  %s2013_s7, 256, %s3000_s4, [#allocation5], %s2628_s23, %s2628_s23, %s2629_s24  }
 0x7fc   :  { %2624 = dma.done.wait [#allocation5], 256  }
 0x7fd   :  { %2625 = vsyncadd [#allocation5], 4294967040 }
 0x7fe   :  { %2022 = vsyncpa [#allocation4], 1 }
 0x7ff   :  { %2023 = vsyncpa [#allocation7], 1 }
 0x800   :  { %2024 = vsyncpa [#allocation5], 1 }

// kernel: tpu_custom_call.1
= control target key start
LH: loop header
LB: loop body
LE: loop exit
PB: predicated region body
PF: predicated region fallthrough
CT: control target
= control target key end

     0   :  { %9 = vsyncpa [#allocation4], 0  ;;  %s2996_s0 = inlined_call_operand.hbm [shape: f32[8,3,2,32], index: 0, kind: input, shape index: {}]   ;;  %s2997_s1 = inlined_call_operand.hbm [shape: f32[2,32], index: 1, kind: input, shape index: {}]   ;;  %s2998_s2 = inlined_call_operand.hbm [shape: f32[3,32,32], index: 2, kind: input, shape index: {}]   ;;  %s2999_s3 = inlined_call_operand.vmem [shape: f32[1,32], index: 3, kind: input, shape index: {}]   ;;  %s3000_s4 = inlined_call_operand.hbm [shape: f32[8,2,32], index: 4, kind: output, shape index: {}]  }
   0x1   :  { %10 = vsyncpa [#allocation7], 0 }
   0x2   :  { %11 = vsyncpa [#allocation5], 0  ;;  %s2626_s15 = smov [#allocation6]   ;;  %s2627_s17 = smov [#allocation3]  }
   0x3   :  { %s30_s16 = sshll.u32 %s2626_s15, 4  ;;  %s17_s18 = sshll.u32 %s2627_s17, 4  ;;  %s31_s16 = int_to_ptr.vmem [resolvable:$true] %s30_s16  ;;  %s18_s18 = int_to_ptr.vmem [resolvable:$true] %s17_s18 }
   0x4   :  { %s2548_s19 = scalar_lea.vmem %s31_s16, 32  ;;  %p2553_p1 = scmp.lt.s32.totalorder %s31_s16, %s31_s16 }
   0x5   :  { %p2549_p0 = scmp.ne.s32.totalorder %s31_s16, %s2548_s19  ;;  %p2554_p2 = scmp.lt.s32.totalorder %s2548_s19, %s2548_s19 }
   0x7   :  { %p2555_p3 = por %p2554_p2, %p2553_p1 }
   0x9   :  { %p2556_p4 = pnand %p2555_p3, %p2549_p0 }
   0xb   :  { %2559 = shalt.err (!%p2556_p4)
}
   0xc   :  { %33 = dma.hbm_to_vmem [thread:$0]  %s2997_s1, 32, %s31_s16, [#allocation7]  }
   0xd   :  { %s2568_s22 = scalar_lea.vmem %s18_s18, 768  ;;  %p2573_p6 = scmp.lt.s32.totalorder %s18_s18, %s18_s18 }
   0xe   :  { %p2569_p5 = scmp.ne.s32.totalorder %s18_s18, %s2568_s22  ;;  %p2574_p7 = scmp.lt.s32.totalorder %s2568_s22, %s2568_s22 }
  0x10   :  { %p2575_p8 = por %p2574_p7, %p2573_p6 }
  0x12   :  { %p2576_p9 = pnand %p2575_p8, %p2569_p5 }
  0x14   :  { %2579 = shalt.err (!%p2576_p9)
}
  0x15   :  { %s2628_s23 = smov 32   ;;  %s2629_s24 = smov 2  }
  0x16   :  { %23 = dma.hbm_to_vmem [thread:$0]  %s2996_s0, 768, %s18_s18, [#allocation4], %s2628_s23, %s2628_s23, %s2629_s24  }
  0x17   :  { %s2630_s27 = smov [#allocation8]  }
  0x18   :  { %s39_s28 = sshll.u32 %s2630_s27, 4  ;;  %s40_s28 = int_to_ptr.vmem [resolvable:$true] %s39_s28 }
  0x19   :  { %s2588_s1 = scalar_lea.vmem %s40_s28, 1536  ;;  %p2593_p11 = scmp.lt.s32.totalorder %s40_s28, %s40_s28 }
  0x1a   :  { %p2589_p10 = scmp.ne.s32.totalorder %s40_s28, %s2588_s1  ;;  %p2594_p12 = scmp.lt.s32.totalorder %s2588_s1, %s2588_s1 }
  0x1c   :  { %p2595_p13 = por %p2594_p12, %p2593_p11 }
  0x1e   :  { %p2596_p0 = pnand %p2595_p13, %p2589_p10 }
  0x20   :  { %2599 = shalt.err (!%p2596_p0)
}
  0x21   :  { %s2631_s29 = smov 128   ;;  %s2632_s30 = smov 8  }
  0x22   :  { %45 = dma.hbm_to_vmem [thread:$0]  %s2998_s2, 1536, %s40_s28, [#allocation7], %s2631_s29, %s2631_s29, %s2632_s30  }
  0x23   :  { %2620 = dma.done.wait [#allocation4], 768  }
  0x24   :  { %2621 = vsyncadd [#allocation4], 4294966528 }
  0x25   :  { %2622 = dma.done.wait [#allocation7], 1568  }
  0x26   :  { %2623 = vsyncadd [#allocation7], 4294965728  ;;  %v2633_v0 = vmov 0.0   ;;  %vm2634_vm0 = vmmov 0   ;;  %vm62_vm1 = vcmask 254976   ;;  %v2679_v1 = vld [vmem:[#allocation8 + $0x18] sm:$0xff] }
  0x27   :  { %2186 = vmatprep.subr.mxu0 %v2633_v0  ;;  %2194 = vmatprep.mubr.msk.f32.mxu0 %vm2634_vm0, %v2633_v0  ;;  %v2681_v2 = vld [vmem:[#allocation8 + $0x10] sm:$0xff]  ;;  %v61_v3 = vld [vmem:[#allocation6] sm:$0x3]  ;;  %v2687_v5 = vld [vmem:[#allocation8 + $0x8] sm:$0xff]  ;;  %vm83_vm2 = vcmask 261120  }
  0x28   :  { %2197 = vmatprep.subr.mxu1 %v2633_v0  ;;  %2205 = vmatprep.mubr.msk.f32.mxu1 %vm2634_vm0, %v2633_v0  ;;  %v2684_v4 = vld [vmem:[#allocation8 + $0x38] sm:$0xff]  ;;  %63 = vst.msk [vmem:[#allocation2] sm:$0x3] %vm62_vm1, %v61_v3  ;;  %v2691_v6 = vld [vmem:[#allocation8 + $0x30] sm:$0xff]  ;;  %v2695_v7 = vld [vmem:[#allocation8 + $0x28] sm:$0xff] }
  0x29   :  { %2187 = vmatpush3.msra.mxu0 %v2679_v1  ;;  %2198 = vmatpush3.msra.mxu1 %v2684_v4  ;;  %v2698_v8 = vld [vmem:[#allocation8] sm:$0xff]  ;;  %v2711_v10 = vld [vmem:[#allocation8 + $0x58] sm:$0xff]  ;;  %v2720_v12 = vld [vmem:[#allocation8 + $0x50] sm:$0xff] }
  0x2a   :  { %2188 = vmatprep.subr.mxu0 %v2633_v0  ;;  %2199 = vmatprep.subr.mxu1 %v2633_v0  ;;  %v2703_v9 = vld [vmem:[#allocation8 + $0x20] sm:$0xff]  ;;  %v2726_v13 = vld [vmem:[#allocation8 + $0x48] sm:$0xff]  ;;  %v81_v20 = vld [vmem:[#allocation3 + $0x2] sm:$0x3] }
  0x2b   :  { %2189 = vmatpush3.msra.mxu0 %v2681_v2  ;;  %2200 = vmatpush3.msra.mxu1 %v2691_v6  ;;  %v2732_v14 = vld [vmem:[#allocation8 + $0x40] sm:$0xff]  ;;  %v80_v15 = vld [vmem:[#allocation3] sm:$0x3]  ;;  %v2761_v30 = vld [vmem:[%s2999_s3] ss:$0 sm:$0xff]  ;;  %s2635_s3 = smov [#allocation9]  }
  0x2c   :  { %2190 = vmatprep.subr.mxu0 %v2633_v0  ;;  %2201 = vmatprep.subr.mxu1 %v2633_v0  ;;  %v82_v34 = vld [vmem:[#allocation3 + $0x4] sm:$0x3]  ;;  %v327_v43 = vld [vmem:[#allocation3 + $0x6] sm:$0x3]  ;;  %v328_v50 = vld [vmem:[#allocation3 + $0x8] sm:$0x3] }
  0x2d   :  { %2191 = vmatpush3.msra.mxu0 %v2687_v5  ;;  %2202 = vmatpush3.msra.mxu1 %v2695_v7  ;;  %v329_v61 = vld [vmem:[#allocation3 + $0xa] sm:$0x3]  ;;  %s2012_s7 = sshll.u32 %s2635_s3, 4  ;;  %s2013_s7 = int_to_ptr.vmem [resolvable:$true] %s2012_s7 }
  0x2e   :  { %2192 = vmatprep.subr.mxu0 %v2633_v0  ;;  %2203 = vmatprep.subr.mxu1 %v2633_v0  ;;  %s2600_s8 = scalar_lea.vmem %s2013_s7, 256  ;;  %p2605_p2 = scmp.lt.s32.totalorder %s2013_s7, %s2013_s7 }
  0x2f   :  { %2193 = vmatpush3.msra.mxu0 %v2698_v8  ;;  %2204 = vmatpush3.msra.mxu1 %v2703_v9  ;;  %v2713_v11 = vld [vmem:[#allocation2] sm:$0x3]  ;;  %p2601_p1 = scmp.ne.s32.totalorder %s2013_s7, %s2600_s8  ;;  %p2606_p3 = scmp.lt.s32.totalorder %s2600_s8, %s2600_s8 }
  0x30   :  { %2208 = vmatprep.subr.mxu0 %v2633_v0  ;;  %2219 = vmatprep.subr.mxu1 %v2633_v0 }
  0x31   :  { %2195 = vmatmul.mubr.msk.f32.vlgmr.msra.gmra.mxu0 %vm83_vm2, %v2713_v11  ;;  %2206 = vmatmul.mubr.msk.f32.vlgmr.msra.gmra.mxu1 %vm83_vm2, %v2713_v11  ;;  %p2607_p4 = por %p2606_p3, %p2605_p2 }
  0x32   :  { %2209 = vmatpush3.msra.mxu0 %v2711_v10  ;;  %2216 = vmatprep.mubr.msk.f32.mxu0 %vm2634_vm0, %v2633_v0 }
  0x33   :  { %2210 = vmatprep.subr.mxu0 %v2633_v0  ;;  %2220 = vmatpush3.msra.mxu1 %v2679_v1  ;;  %p2608_p5 = pnand %p2607_p4, %p2601_p1 }
  0x34   :  { %2211 = vmatpush3.msra.mxu0 %v2720_v12  ;;  %2221 = vmatprep.subr.mxu1 %v2633_v0 }
  0x35   :  { %2212 = vmatprep.subr.mxu0 %v2633_v0  ;;  %2222 = vmatpush3.msra.mxu1 %v2681_v2 }
  0x36   :  { %2213 = vmatpush3.msra.mxu0 %v2726_v13  ;;  %2223 = vmatprep.subr.mxu1 %v2633_v0 }
  0x37   :  { %2214 = vmatprep.subr.mxu0 %v2633_v0  ;;  %2224 = vmatpush3.msra.mxu1 %v2687_v5 }
  0x38   :  { %2215 = vmatpush3.msra.mxu0 %v2732_v14  ;;  %2225 = vmatprep.subr.mxu1 %v2633_v0 }
  0x39   :  { %2217 = vmatmul.mubr.msk.f32.vlgmr.msra.gmra.mxu0 %vm83_vm2, %v2713_v11  ;;  %2230 = vmatprep.subr.mxu0 %v2633_v0 }
  0x3a   :  { %2231 = vmatpush3.msra.mxu0 %v2684_v4  ;;  %2226 = vmatpush3.msra.mxu1 %v2698_v8 }
  0x3b   :  { %2232 = vmatprep.subr.mxu0 %v2633_v0  ;;  %2227 = vmatprep.mubr.msk.f32.mxu1 %vm2634_vm0, %v2633_v0 }
  0x3c   :  { %2233 = vmatpush3.msra.mxu0 %v2691_v6  ;;  %2238 = vmatprep.mubr.msk.f32.mxu0 %vm2634_vm0, %v2633_v0 }
  0x3d   :  { %2234 = vmatprep.subr.mxu0 %v2633_v0  ;;  %2241 = vmatprep.subr.mxu1 %v2633_v0 }
  0x3e   :  { %2235 = vmatpush3.msra.mxu0 %v2695_v7 }
  0x3f   :  { %2236 = vmatprep.subr.mxu0 %v2633_v0 }
  0x40   :  { %2237 = vmatpush3.msra.mxu0 %v2703_v9 }
  0x41   :  { %2252 = vmatprep.subr.mxu0 %v2633_v0 }
  0xf1   :  { %v153_v16 = vpop.f32.mrf.mxu0  ;;  %v223_v17 = vpop.f32.mrf.mxu1 }
  0xf2   :  { %v303_v18 = vadd.f32 %v153_v16, %v80_v15  ;;  %v310_v23 = vadd.f32 %v223_v17, %v81_v20 }
  0xf3   :  { %v2196_v19 = vpop.f32.mrf.mxu0  ;;  %v2207_v21 = vpop.f32.mrf.mxu1 }
  0xf4   :  { %v2029_v22 = vmul.f32 -1.442695, %v303_v18  ;;  %v2030_v25 = vmul.f32 -1.442695, %v310_v23  ;;  %v567_v19 = vld [vmem:[#allocation3 + $0xc] sm:$0x3] }
  0xf6   :  { %2460 = vpow2.f32 %v2029_v22 }
  0xf7   :  { %2462 = vpow2.f32 %v2030_v25 }
  0xf9   :  { %v299_v24 = vpop.f32.mrf.mxu0 }
  0xfa   :  { %v300_v32 = vadd.f32 %v2761_v30, %v299_v24 }
  0xfb   :  { %v2218_v26 = vpop.f32.mrf.mxu0 }
  0xfc   :  { %v568_v26 = vld [vmem:[#allocation3 + $0xe] sm:$0x3] }
 0x103   :  { %v2461_v27 = vpop.eup %2460 }
 0x104   :  { %v307_v28 = vadd.f32 1.0, %v2461_v27  ;;  %v2463_v29 = vpop.eup %2462 }
 0x105   :  { %v314_v31 = vadd.f32 1.0, %v2463_v29 }
 0x106   :  { %2464 = vrcp.f32 %v307_v28 }
 0x107   :  { %2466 = vrcp.f32 %v314_v31 }
 0x113   :  { %v2465_v33 = vpop.eup %2464 }
 0x114   :  { %v317_v35 = vmul.f32 %v2465_v33, %v300_v32  ;;  %v2467_v37 = vpop.eup %2466 }
 0x115   :  { %v321_v38 = vsub.f32 1.0, %v2467_v37  ;;  %v320_v40 = vmul.f32 %v2467_v37, %v2713_v11 }
 0x116   :  { %v318_v36 = vadd.f32 %v317_v35, %v82_v34 }
 0x118   :  { %2468 = vtanh.f32 %v318_v36 }
 0x125   :  { %v2469_v39 = vpop.eup %2468 }
 0x126   :  { %v322_v41 = vmul.f32 %v2469_v39, %v321_v38  ;;  %v569_v38 = vld [vmem:[#allocation3 + $0x10] sm:$0x3] }
 0x128   :  { %v323_v42 = vadd.f32 %v322_v41, %v320_v40 }
 0x12a   :  { %2228 = vmatmul.mubr.msk.f32.vlgmr.msra.gmra.mxu1 %vm83_vm2, %v323_v42  ;;  %325 = vst.msk [vmem:[#allocation9] sm:$0x3] %vm62_vm1, %v323_v42  ;;  %2239 = vmatmul.mubr.msk.f32.vlgmr.msra.gmra.mxu0 %vm83_vm2, %v323_v42 }
 0x12b   :  { %2242 = vmatpush3.msra.mxu1 %v2711_v10  ;;  %2249 = vmatprep.mubr.msk.f32.mxu1 %vm2634_vm0, %v2633_v0 }
 0x12c   :  { %2243 = vmatprep.subr.mxu1 %v2633_v0  ;;  %2253 = vmatpush3.msra.mxu0 %v2679_v1 }
 0x12d   :  { %2244 = vmatpush3.msra.mxu1 %v2720_v12  ;;  %2254 = vmatprep.subr.mxu0 %v2633_v0 }
 0x12e   :  { %2245 = vmatprep.subr.mxu1 %v2633_v0  ;;  %2255 = vmatpush3.msra.mxu0 %v2681_v2 }
 0x12f   :  { %2246 = vmatpush3.msra.mxu1 %v2726_v13  ;;  %2256 = vmatprep.subr.mxu0 %v2633_v0 }
 0x130   :  { %2247 = vmatprep.subr.mxu1 %v2633_v0  ;;  %2257 = vmatpush3.msra.mxu0 %v2687_v5 }
 0x131   :  { %2248 = vmatpush3.msra.mxu1 %v2732_v14  ;;  %2258 = vmatprep.subr.mxu0 %v2633_v0 }
 0x132   :  { %2250 = vmatmul.mubr.msk.f32.vlgmr.msra.gmra.mxu1 %vm83_vm2, %v323_v42  ;;  %2263 = vmatprep.subr.mxu1 %v2633_v0 }
 0x133   :  { %2264 = vmatpush3.msra.mxu1 %v2684_v4  ;;  %2259 = vmatpush3.msra.mxu0 %v2698_v8 }
 0x134   :  { %2265 = vmatprep.subr.mxu1 %v2633_v0  ;;  %2260 = vmatprep.mubr.msk.f32.mxu0 %vm2634_vm0, %v2633_v0 }
 0x135   :  { %2266 = vmatpush3.msra.mxu1 %v2691_v6  ;;  %2271 = vmatprep.mubr.msk.f32.mxu1 %vm2634_vm0, %v2633_v0 }
 0x136   :  { %2267 = vmatprep.subr.mxu1 %v2633_v0  ;;  %2274 = vmatprep.subr.mxu0 %v2633_v0 }
 0x137   :  { %2268 = vmatpush3.msra.mxu1 %v2695_v7 }
 0x138   :  { %2269 = vmatprep.subr.mxu1 %v2633_v0 }
 0x139   :  { %2270 = vmatpush3.msra.mxu1 %v2703_v9 }
 0x13a   :  { %2285 = vmatprep.subr.mxu1 %v2633_v0 }
 0x1ea   :  { %v399_v44 = vpop.f32.mrf.mxu1  ;;  %v469_v45 = vpop.f32.mrf.mxu0 }
 0x1eb   :  { %v543_v46 = vadd.f32 %v399_v44, %v327_v43  ;;  %v550_v51 = vadd.f32 %v469_v45, %v328_v50 }
 0x1ec   :  { %v2229_v47 = vpop.f32.mrf.mxu1  ;;  %v2240_v48 = vpop.f32.mrf.mxu0 }
 0x1ed   :  { %v2034_v49 = vmul.f32 -1.442695, %v543_v46  ;;  %v2035_v54 = vmul.f32 -1.442695, %v550_v51  ;;  %v807_v47 = vld [vmem:[#allocation3 + $0x12] sm:$0x3] }
 0x1ef   :  { %2470 = vpow2.f32 %v2034_v49 }
 0x1f0   :  { %2472 = vpow2.f32 %v2035_v54  ;;  %v808_v54 = vld [vmem:[#allocation3 + $0x14] sm:$0x3] }
 0x1f2   :  { %v539_v52 = vpop.f32.mrf.mxu1 }
 0x1f3   :  { %v540_v59 = vadd.f32 %v2761_v30, %v539_v52 }
 0x1f4   :  { %v2251_v53 = vpop.f32.mrf.mxu1 }
 0x1fc   :  { %v2471_v55 = vpop.eup %2470 }
 0x1fd   :  { %v547_v56 = vadd.f32 1.0, %v2471_v55  ;;  %v2473_v57 = vpop.eup %2472 }
 0x1fe   :  { %v554_v58 = vadd.f32 1.0, %v2473_v57 }
 0x1ff   :  { %2474 = vrcp.f32 %v547_v56 }
 0x200   :  { %2476 = vrcp.f32 %v554_v58 }
 0x20c   :  { %v2475_v60 = vpop.eup %2474 }
 0x20d   :  { %v557_v62 = vmul.f32 %v2475_v60, %v540_v59  ;;  %v2477_v3 = vpop.eup %2476 }
 0x20e   :  { %v561_v11 = vsub.f32 1.0, %v2477_v3  ;;  %v560_v16 = vmul.f32 %v2477_v3, %v323_v42 }
 0x20f   :  { %v558_v63 = vadd.f32 %v557_v62, %v329_v61 }
 0x211   :  { %2478 = vtanh.f32 %v558_v63 }
 0x21e   :  { %v2479_v15 = vpop.eup %2478 }
 0x21f   :  { %v562_v17 = vmul.f32 %v2479_v15, %v561_v11  ;;  %v809_v11 = vld [vmem:[#allocation3 + $0x16] sm:$0x3] }
 0x221   :  { %v563_v18 = vadd.f32 %v562_v17, %v560_v16 }
 0x223   :  { %2261 = vmatmul.mubr.msk.f32.vlgmr.msra.gmra.mxu0 %vm83_vm2, %v563_v18  ;;  %565 = vst.msk [vmem:[#allocation9 + $0x2] sm:$0x3] %vm62_vm1, %v563_v18  ;;  %2272 = vmatmul.mubr.msk.f32.vlgmr.msra.gmra.mxu1 %vm83_vm2, %v563_v18 }
 0x224   :  { %2275 = vmatpush3.msra.mxu0 %v2711_v10  ;;  %2282 = vmatprep.mubr.msk.f32.mxu0 %vm2634_vm0, %v2633_v0 }
 0x225   :  { %2276 = vmatprep.subr.mxu0 %v2633_v0  ;;  %2286 = vmatpush3.msra.mxu1 %v2679_v1 }
 0x226   :  { %2277 = vmatpush3.msra.mxu0 %v2720_v12  ;;  %2287 = vmatprep.subr.mxu1 %v2633_v0 }
 0x227   :  { %2278 = vmatprep.subr.mxu0 %v2633_v0  ;;  %2288 = vmatpush3.msra.mxu1 %v2681_v2 }
 0x228   :  { %2279 = vmatpush3.msra.mxu0 %v2726_v13  ;;  %2289 = vmatprep.subr.mxu1 %v2633_v0 }
 0x229   :  { %2280 = vmatprep.subr.mxu0 %v2633_v0  ;;  %2290 = vmatpush3.msra.mxu1 %v2687_v5 }
 0x22a   :  { %2281 = vmatpush3.msra.mxu0 %v2732_v14  ;;  %2291 = vmatprep.subr.mxu1 %v2633_v0 }
 0x22b   :  { %2283 = vmatmul.mubr.msk.f32.vlgmr.msra.gmra.mxu0 %vm83_vm2, %v563_v18  ;;  %2296 = vmatprep.subr.mxu0 %v2633_v0 }
 0x22c   :  { %2297 = vmatpush3.msra.mxu0 %v2684_v4  ;;  %2292 = vmatpush3.msra.mxu1 %v2698_v8 }
 0x22d   :  { %2298 = vmatprep.subr.mxu0 %v2633_v0  ;;  %2293 = vmatprep.mubr.msk.f32.mxu1 %vm2634_vm0, %v2633_v0 }
 0x22e   :  { %2299 = vmatpush3.msra.mxu0 %v2691_v6  ;;  %2304 = vmatprep.mubr.msk.f32.mxu0 %vm2634_vm0, %v2633_v0 }
 0x22f   :  { %2300 = vmatprep.subr.mxu0 %v2633_v0  ;;  %2307 = vmatprep.subr.mxu1 %v2633_v0 }
 0x230   :  { %2301 = vmatpush3.msra.mxu0 %v2695_v7 }
 0x231   :  { %2302 = vmatprep.subr.mxu0 %v2633_v0 }
 0x232   :  { %2303 = vmatpush3.msra.mxu0 %v2703_v9 }
 0x233   :  { %2318 = vmatprep.subr.mxu0 %v2633_v0 }
 0x2e3   :  { %v639_v20 = vpop.f32.mrf.mxu0  ;;  %v709_v21 = vpop.f32.mrf.mxu1 }
 0x2e4   :  { %v783_v22 = vadd.f32 %v639_v20, %v567_v19  ;;  %v790_v27 = vadd.f32 %v709_v21, %v568_v26 }
 0x2e5   :  { %v2262_v23 = vpop.f32.mrf.mxu0  ;;  %v2273_v24 = vpop.f32.mrf.mxu1 }
 0x2e6   :  { %v2039_v25 = vmul.f32 -1.442695, %v783_v22  ;;  %v2040_v31 = vmul.f32 -1.442695, %v790_v27  ;;  %v1047_v23 = vld [vmem:[#allocation3 + $0x18] sm:$0x3] }
 0x2e8   :  { %2480 = vpow2.f32 %v2039_v25 }
 0x2e9   :  { %2482 = vpow2.f32 %v2040_v31  ;;  %v1048_v31 = vld [vmem:[#allocation3 + $0x1a] sm:$0x3] }
 0x2eb   :  { %v779_v28 = vpop.f32.mrf.mxu0 }
 0x2ec   :  { %v780_v36 = vadd.f32 %v2761_v30, %v779_v28 }
 0x2ed   :  { %v2284_v29 = vpop.f32.mrf.mxu0 }
 0x2f5   :  { %v2481_v32 = vpop.eup %2480 }
 0x2f6   :  { %v787_v33 = vadd.f32 1.0, %v2481_v32  ;;  %v2483_v34 = vpop.eup %2482 }
 0x2f7   :  { %v794_v35 = vadd.f32 1.0, %v2483_v34 }
 0x2f8   :  { %2484 = vrcp.f32 %v787_v33 }
 0x2f9   :  { %2486 = vrcp.f32 %v794_v35 }
 0x305   :  { %v2485_v37 = vpop.eup %2484 }
 0x306   :  { %v797_v39 = vmul.f32 %v2485_v37, %v780_v36  ;;  %v2487_v41 = vpop.eup %2486 }
 0x307   :  { %v801_v42 = vsub.f32 1.0, %v2487_v41  ;;  %v800_v44 = vmul.f32 %v2487_v41, %v563_v18 }
 0x308   :  { %v798_v40 = vadd.f32 %v797_v39, %v569_v38 }
 0x30a   :  { %2488 = vtanh.f32 %v798_v40 }
 0x317   :  { %v2489_v43 = vpop.eup %2488 }
 0x318   :  { %v802_v45 = vmul.f32 %v2489_v43, %v801_v42  ;;  %v1049_v42 = vld [vmem:[#allocation3 + $0x1c] sm:$0x3] }
 0x31a   :  { %v803_v46 = vadd.f32 %v802_v45, %v800_v44 }
 0x31c   :  { %2294 = vmatmul.mubr.msk.f32.vlgmr.msra.gmra.mxu1 %vm83_vm2, %v803_v46  ;;  %805 = vst.msk [vmem:[#allocation9 + $0x4] sm:$0x3] %vm62_vm1, %v803_v46  ;;  %2305 = vmatmul.mubr.msk.f32.vlgmr.msra.gmra.mxu0 %vm83_vm2, %v803_v46 }
 0x31d   :  { %2308 = vmatpush3.msra.mxu1 %v2711_v10  ;;  %2315 = vmatprep.mubr.msk.f32.mxu1 %vm2634_vm0, %v2633_v0 }
 0x31e   :  { %2309 = vmatprep.subr.mxu1 %v2633_v0  ;;  %2319 = vmatpush3.msra.mxu0 %v2679_v1 }
 0x31f   :  { %2310 = vmatpush3.msra.mxu1 %v2720_v12  ;;  %2320 = vmatprep.subr.mxu0 %v2633_v0 }
 0x320   :  { %2311 = vmatprep.subr.mxu1 %v2633_v0  ;;  %2321 = vmatpush3.msra.mxu0 %v2681_v2 }
 0x321   :  { %2312 = vmatpush3.msra.mxu1 %v2726_v13  ;;  %2322 = vmatprep.subr.mxu0 %v2633_v0 }
 0x322   :  { %2313 = vmatprep.subr.mxu1 %v2633_v0  ;;  %2323 = vmatpush3.msra.mxu0 %v2687_v5 }
 0x323   :  { %2314 = vmatpush3.msra.mxu1 %v2732_v14  ;;  %2324 = vmatprep.subr.mxu0 %v2633_v0 }
 0x324   :  { %2316 = vmatmul.mubr.msk.f32.vlgmr.msra.gmra.mxu1 %vm83_vm2, %v803_v46  ;;  %2329 = vmatprep.subr.mxu1 %v2633_v0 }
 0x325   :  { %2330 = vmatpush3.msra.mxu1 %v2684_v4  ;;  %2325 = vmatpush3.msra.mxu0 %v2698_v8 }
 0x326   :  { %2331 = vmatprep.subr.mxu1 %v2633_v0  ;;  %2326 = vmatprep.mubr.msk.f32.mxu0 %vm2634_vm0, %v2633_v0 }
 0x327   :  { %2332 = vmatpush3.msra.mxu1 %v2691_v6  ;;  %2337 = vmatprep.mubr.msk.f32.mxu1 %vm2634_vm0, %v2633_v0 }
 0x328   :  { %2333 = vmatprep.subr.mxu1 %v2633_v0  ;;  %2340 = vmatprep.subr.mxu0 %v2633_v0 }
 0x329   :  { %2334 = vmatpush3.msra.mxu1 %v2695_v7 }
 0x32a   :  { %2335 = vmatprep.subr.mxu1 %v2633_v0 }
 0x32b   :  { %2336 = vmatpush3.msra.mxu1 %v2703_v9 }
 0x32c   :  { %2351 = vmatprep.subr.mxu1 %v2633_v0 }
 0x3dc   :  { %v879_v48 = vpop.f32.mrf.mxu1  ;;  %v949_v49 = vpop.f32.mrf.mxu0 }
 0x3dd   :  { %v1023_v50 = vadd.f32 %v879_v48, %v807_v47  ;;  %v1030_v55 = vadd.f32 %v949_v49, %v808_v54 }
 0x3de   :  { %v2295_v51 = vpop.f32.mrf.mxu1  ;;  %v2306_v52 = vpop.f32.mrf.mxu0 }
 0x3df   :  { %v2044_v53 = vmul.f32 -1.442695, %v1023_v50  ;;  %v2045_v58 = vmul.f32 -1.442695, %v1030_v55  ;;  %v1287_v51 = vld [vmem:[#allocation3 + $0x1e] sm:$0x3] }
 0x3e1   :  { %2490 = vpow2.f32 %v2044_v53 }
 0x3e2   :  { %2492 = vpow2.f32 %v2045_v58  ;;  %v1288_v58 = vld [vmem:[#allocation3 + $0x20] sm:$0x3] }
 0x3e4   :  { %v1019_v56 = vpop.f32.mrf.mxu1 }
 0x3e5   :  { %v1020_v63 = vadd.f32 %v2761_v30, %v1019_v56 }
 0x3e6   :  { %v2317_v57 = vpop.f32.mrf.mxu1 }
 0x3ee   :  { %v2491_v59 = vpop.eup %2490 }
 0x3ef   :  { %v1027_v60 = vadd.f32 1.0, %v2491_v59  ;;  %v2493_v61 = vpop.eup %2492 }
 0x3f0   :  { %v1034_v62 = vadd.f32 1.0, %v2493_v61 }
 0x3f1   :  { %2494 = vrcp.f32 %v1027_v60 }
 0x3f2   :  { %2496 = vrcp.f32 %v1034_v62 }
 0x3fe   :  { %v2495_v3 = vpop.eup %2494 }
 0x3ff   :  { %v1037_v15 = vmul.f32 %v2495_v3, %v1020_v63  ;;  %v2497_v17 = vpop.eup %2496 }
 0x400   :  { %v1041_v18 = vsub.f32 1.0, %v2497_v17  ;;  %v1040_v20 = vmul.f32 %v2497_v17, %v803_v46 }
 0x401   :  { %v1038_v16 = vadd.f32 %v1037_v15, %v809_v11 }
 0x403   :  { %2498 = vtanh.f32 %v1038_v16 }
 0x410   :  { %v2499_v19 = vpop.eup %2498 }
 0x411   :  { %v1042_v21 = vmul.f32 %v2499_v19, %v1041_v18  ;;  %v1289_v18 = vld [vmem:[#allocation3 + $0x22] sm:$0x3] }
 0x413   :  { %v1043_v22 = vadd.f32 %v1042_v21, %v1040_v20 }
 0x415   :  { %2327 = vmatmul.mubr.msk.f32.vlgmr.msra.gmra.mxu0 %vm83_vm2, %v1043_v22  ;;  %1045 = vst.msk [vmem:[#allocation9 + $0x6] sm:$0x3] %vm62_vm1, %v1043_v22  ;;  %2338 = vmatmul.mubr.msk.f32.vlgmr.msra.gmra.mxu1 %vm83_vm2, %v1043_v22 }
 0x416   :  { %2341 = vmatpush3.msra.mxu0 %v2711_v10  ;;  %2348 = vmatprep.mubr.msk.f32.mxu0 %vm2634_vm0, %v2633_v0 }
 0x417   :  { %2342 = vmatprep.subr.mxu0 %v2633_v0  ;;  %2352 = vmatpush3.msra.mxu1 %v2679_v1 }
 0x418   :  { %2343 = vmatpush3.msra.mxu0 %v2720_v12  ;;  %2353 = vmatprep.subr.mxu1 %v2633_v0 }
 0x419   :  { %2344 = vmatprep.subr.mxu0 %v2633_v0  ;;  %2354 = vmatpush3.msra.mxu1 %v2681_v2 }
 0x41a   :  { %2345 = vmatpush3.msra.mxu0 %v2726_v13  ;;  %2355 = vmatprep.subr.mxu1 %v2633_v0 }
 0x41b   :  { %2346 = vmatprep.subr.mxu0 %v2633_v0  ;;  %2356 = vmatpush3.msra.mxu1 %v2687_v5 }
 0x41c   :  { %2347 = vmatpush3.msra.mxu0 %v2732_v14  ;;  %2357 = vmatprep.subr.mxu1 %v2633_v0 }
 0x41d   :  { %2349 = vmatmul.mubr.msk.f32.vlgmr.msra.gmra.mxu0 %vm83_vm2, %v1043_v22  ;;  %2362 = vmatprep.subr.mxu0 %v2633_v0 }
 0x41e   :  { %2363 = vmatpush3.msra.mxu0 %v2684_v4  ;;  %2358 = vmatpush3.msra.mxu1 %v2698_v8 }
 0x41f   :  { %2364 = vmatprep.subr.mxu0 %v2633_v0  ;;  %2359 = vmatprep.mubr.msk.f32.mxu1 %vm2634_vm0, %v2633_v0 }
 0x420   :  { %2365 = vmatpush3.msra.mxu0 %v2691_v6  ;;  %2370 = vmatprep.mubr.msk.f32.mxu0 %vm2634_vm0, %v2633_v0 }
 0x421   :  { %2366 = vmatprep.subr.mxu0 %v2633_v0  ;;  %2373 = vmatprep.subr.mxu1 %v2633_v0 }
 0x422   :  { %2367 = vmatpush3.msra.mxu0 %v2695_v7 }
 0x423   :  { %2368 = vmatprep.subr.mxu0 %v2633_v0 }
 0x424   :  { %2369 = vmatpush3.msra.mxu0 %v2703_v9 }
 0x425   :  { %2384 = vmatprep.subr.mxu0 %v2633_v0 }
 0x4d5   :  { %v1119_v24 = vpop.f32.mrf.mxu0  ;;  %v1189_v25 = vpop.f32.mrf.mxu1 }
 0x4d6   :  { %v1263_v26 = vadd.f32 %v1119_v24, %v1047_v23  ;;  %v1270_v32 = vadd.f32 %v1189_v25, %v1048_v31 }
 0x4d7   :  { %v2328_v27 = vpop.f32.mrf.mxu0  ;;  %v2339_v28 = vpop.f32.mrf.mxu1 }
 0x4d8   :  { %v2049_v29 = vmul.f32 -1.442695, %v1263_v26  ;;  %v2050_v35 = vmul.f32 -1.442695, %v1270_v32  ;;  %v1528_v28 = vld [vmem:[#allocation3 + $0x26] sm:$0x3] }
 0x4da   :  { %2500 = vpow2.f32 %v2049_v29 }
 0x4db   :  { %2502 = vpow2.f32 %v2050_v35 }
 0x4dd   :  { %v1259_v33 = vpop.f32.mrf.mxu0 }
 0x4de   :  { %v1260_v40 = vadd.f32 %v2761_v30, %v1259_v33 }
 0x4df   :  { %v2350_v34 = vpop.f32.mrf.mxu0 }
 0x4e7   :  { %v2501_v36 = vpop.eup %2500 }
 0x4e8   :  { %v1267_v37 = vadd.f32 1.0, %v2501_v36  ;;  %v2503_v38 = vpop.eup %2502 }
 0x4e9   :  { %v1274_v39 = vadd.f32 1.0, %v2503_v38  ;;  %v1529_v38 = vld [vmem:[#allocation3 + $0x28] sm:$0x3] }
 0x4ea   :  { %2504 = vrcp.f32 %v1267_v37 }
 0x4eb   :  { %2506 = vrcp.f32 %v1274_v39 }
 0x4f7   :  { %v2505_v41 = vpop.eup %2504 }
 0x4f8   :  { %v1277_v43 = vmul.f32 %v2505_v41, %v1260_v40  ;;  %v2507_v45 = vpop.eup %2506 }
 0x4f9   :  { %v1281_v46 = vsub.f32 1.0, %v2507_v45  ;;  %v1280_v48 = vmul.f32 %v2507_v45, %v1043_v22 }
 0x4fa   :  { %v1278_v44 = vadd.f32 %v1277_v43, %v1049_v42 }
 0x4fc   :  { %2508 = vtanh.f32 %v1278_v44 }
 0x509   :  { %v2509_v47 = vpop.eup %2508 }
 0x50a   :  { %v1282_v49 = vmul.f32 %v2509_v47, %v1281_v46  ;;  %v1767_v47 = vld [vmem:[#allocation3 + $0x2a] sm:$0x3] }
 0x50c   :  { %v1283_v50 = vadd.f32 %v1282_v49, %v1280_v48 }
 0x50e   :  { %2360 = vmatmul.mubr.msk.f32.vlgmr.msra.gmra.mxu1 %vm83_vm2, %v1283_v50  ;;  %1285 = vst.msk [vmem:[#allocation9 + $0x8] sm:$0x3] %vm62_vm1, %v1283_v50  ;;  %2371 = vmatmul.mubr.msk.f32.vlgmr.msra.gmra.mxu0 %vm83_vm2, %v1283_v50 }
 0x50f   :  { %2374 = vmatpush3.msra.mxu1 %v2711_v10  ;;  %2381 = vmatprep.mubr.msk.f32.mxu1 %vm2634_vm0, %v2633_v0 }
 0x510   :  { %2375 = vmatprep.subr.mxu1 %v2633_v0  ;;  %2385 = vmatpush3.msra.mxu0 %v2679_v1 }
 0x511   :  { %2376 = vmatpush3.msra.mxu1 %v2720_v12  ;;  %2386 = vmatprep.subr.mxu0 %v2633_v0 }
 0x512   :  { %2377 = vmatprep.subr.mxu1 %v2633_v0  ;;  %2387 = vmatpush3.msra.mxu0 %v2681_v2 }
 0x513   :  { %2378 = vmatpush3.msra.mxu1 %v2726_v13  ;;  %2388 = vmatprep.subr.mxu0 %v2633_v0 }
 0x514   :  { %2379 = vmatprep.subr.mxu1 %v2633_v0  ;;  %2389 = vmatpush3.msra.mxu0 %v2687_v5 }
 0x515   :  { %2380 = vmatpush3.msra.mxu1 %v2732_v14  ;;  %2390 = vmatprep.subr.mxu0 %v2633_v0 }
 0x516   :  { %2382 = vmatmul.mubr.msk.f32.vlgmr.msra.gmra.mxu1 %vm83_vm2, %v1283_v50  ;;  %2395 = vmatprep.subr.mxu1 %v2633_v0 }
 0x517   :  { %2396 = vmatpush3.msra.mxu1 %v2684_v4  ;;  %2391 = vmatpush3.msra.mxu0 %v2698_v8 }
 0x518   :  { %2397 = vmatprep.subr.mxu1 %v2633_v0  ;;  %2392 = vmatprep.mubr.msk.f32.mxu0 %vm2634_vm0, %v2633_v0 }
 0x519   :  { %2398 = vmatpush3.msra.mxu1 %v2691_v6  ;;  %2403 = vmatprep.mubr.msk.f32.mxu1 %vm2634_vm0, %v2633_v0 }
 0x51a   :  { %2399 = vmatprep.subr.mxu1 %v2633_v0  ;;  %2406 = vmatprep.subr.mxu0 %v2633_v0 }
 0x51b   :  { %2400 = vmatpush3.msra.mxu1 %v2695_v7 }
 0x51c   :  { %2401 = vmatprep.subr.mxu1 %v2633_v0 }
 0x51d   :  { %2402 = vmatpush3.msra.mxu1 %v2703_v9 }
 0x51e   :  { %2417 = vmatprep.subr.mxu1 %v2633_v0 }
 0x5ce   :  { %v1359_v52 = vpop.f32.mrf.mxu1  ;;  %v1429_v53 = vpop.f32.mrf.mxu0 }
 0x5cf   :  { %v1503_v54 = vadd.f32 %v1359_v52, %v1287_v51  ;;  %v1510_v59 = vadd.f32 %v1429_v53, %v1288_v58  ;;  %v1768_v53 = vld [vmem:[#allocation3 + $0x2c] sm:$0x3] }
 0x5d0   :  { %v2361_v55 = vpop.f32.mrf.mxu1  ;;  %v2372_v56 = vpop.f32.mrf.mxu0 }
 0x5d1   :  { %v2054_v57 = vmul.f32 -1.442695, %v1503_v54  ;;  %v2055_v62 = vmul.f32 -1.442695, %v1510_v59 }
 0x5d3   :  { %2510 = vpow2.f32 %v2054_v57 }
 0x5d4   :  { %2512 = vpow2.f32 %v2055_v62 }
 0x5d6   :  { %v1499_v60 = vpop.f32.mrf.mxu1 }
 0x5d7   :  { %v1500_v16 = vadd.f32 %v2761_v30, %v1499_v60  ;;  %v1769_v60 = vld [vmem:[#allocation3 + $0x2e] sm:$0x3] }
 0x5d8   :  { %v2383_v61 = vpop.f32.mrf.mxu1 }
 0x5e0   :  { %v2511_v63 = vpop.eup %2510 }
 0x5e1   :  { %v1507_v3 = vadd.f32 1.0, %v2511_v63  ;;  %v2513_v11 = vpop.eup %2512 }
 0x5e2   :  { %v1514_v15 = vadd.f32 1.0, %v2513_v11 }
 0x5e3   :  { %2514 = vrcp.f32 %v1507_v3 }
 0x5e4   :  { %2516 = vrcp.f32 %v1514_v15 }
 0x5f0   :  { %v2515_v17 = vpop.eup %2514 }
 0x5f1   :  { %v1517_v19 = vmul.f32 %v2515_v17, %v1500_v16  ;;  %v2517_v21 = vpop.eup %2516 }
 0x5f2   :  { %v1521_v22 = vsub.f32 1.0, %v2517_v21  ;;  %v1520_v24 = vmul.f32 %v2517_v21, %v1283_v50 }
 0x5f3   :  { %v1518_v20 = vadd.f32 %v1517_v19, %v1289_v18 }
 0x5f5   :  { %2518 = vtanh.f32 %v1518_v20 }
 0x602   :  { %v2519_v23 = vpop.eup %2518 }
 0x603   :  { %v1522_v25 = vmul.f32 %v2519_v23, %v1521_v22 }
 0x605   :  { %v1523_v26 = vadd.f32 %v1522_v25, %v1520_v24 }
 0x607   :  { %2393 = vmatmul.mubr.msk.f32.vlgmr.msra.gmra.mxu0 %vm83_vm2, %v1523_v26  ;;  %1525 = vst.msk [vmem:[#allocation9 + $0xa] sm:$0x3] %vm62_vm1, %v1523_v26  ;;  %2404 = vmatmul.mubr.msk.f32.vlgmr.msra.gmra.mxu1 %vm83_vm2, %v1523_v26 }
 0x608   :  { %2407 = vmatpush3.msra.mxu0 %v2711_v10  ;;  %2414 = vmatprep.mubr.msk.f32.mxu0 %vm2634_vm0, %v2633_v0 }
 0x609   :  { %2408 = vmatprep.subr.mxu0 %v2633_v0  ;;  %2418 = vmatpush3.msra.mxu1 %v2679_v1  ;;  %v1527_v1 = vld [vmem:[#allocation3 + $0x24] sm:$0x3] }
 0x60a   :  { %2409 = vmatpush3.msra.mxu0 %v2720_v12  ;;  %2419 = vmatprep.subr.mxu1 %v2633_v0 }
 0x60b   :  { %2410 = vmatprep.subr.mxu0 %v2633_v0  ;;  %2420 = vmatpush3.msra.mxu1 %v2681_v2 }
 0x60c   :  { %2411 = vmatpush3.msra.mxu0 %v2726_v13  ;;  %2421 = vmatprep.subr.mxu1 %v2633_v0 }
 0x60d   :  { %2412 = vmatprep.subr.mxu0 %v2633_v0  ;;  %2422 = vmatpush3.msra.mxu1 %v2687_v5 }
 0x60e   :  { %2413 = vmatpush3.msra.mxu0 %v2732_v14  ;;  %2423 = vmatprep.subr.mxu1 %v2633_v0 }
 0x60f   :  { %2415 = vmatmul.mubr.msk.f32.vlgmr.msra.gmra.mxu0 %vm83_vm2, %v1523_v26  ;;  %2428 = vmatprep.subr.mxu0 %v2633_v0 }
 0x610   :  { %2429 = vmatpush3.msra.mxu0 %v2684_v4  ;;  %2424 = vmatpush3.msra.mxu1 %v2698_v8 }
 0x611   :  { %2430 = vmatprep.subr.mxu0 %v2633_v0  ;;  %2425 = vmatprep.mubr.msk.f32.mxu1 %vm2634_vm0, %v2633_v0 }
 0x612   :  { %2431 = vmatpush3.msra.mxu0 %v2691_v6  ;;  %2436 = vmatprep.mubr.msk.f32.mxu0 %vm2634_vm0, %v2633_v0 }
 0x613   :  { %2432 = vmatprep.subr.mxu0 %v2633_v0  ;;  %2439 = vmatprep.subr.mxu1 %v2633_v0 }
 0x614   :  { %2433 = vmatpush3.msra.mxu0 %v2695_v7 }
 0x615   :  { %2434 = vmatprep.subr.mxu0 %v2633_v0 }
 0x616   :  { %2435 = vmatpush3.msra.mxu0 %v2703_v9 }
 0x6c7   :  { %v1599_v2 = vpop.f32.mrf.mxu0  ;;  %v1669_v4 = vpop.f32.mrf.mxu1 }
 0x6c8   :  { %v1743_v5 = vadd.f32 %v1599_v2, %v1527_v1  ;;  %v1750_v29 = vadd.f32 %v1669_v4, %v1528_v28 }
 0x6c9   :  { %v2394_v8 = vpop.f32.mrf.mxu0  ;;  %v2405_v27 = vpop.f32.mrf.mxu1 }
 0x6ca   :  { %v2059_v6 = vmul.f32 -1.442695, %v1743_v5  ;;  %v2060_v33 = vmul.f32 -1.442695, %v1750_v29 }
 0x6cc   :  { %2520 = vpow2.f32 %v2059_v6 }
 0x6cd   :  { %2522 = vpow2.f32 %v2060_v33 }
 0x6cf   :  { %v1739_v31 = vpop.f32.mrf.mxu0 }
 0x6d0   :  { %v1740_v9 = vadd.f32 %v2761_v30, %v1739_v31 }
 0x6d1   :  { %v2416_v32 = vpop.f32.mrf.mxu0 }
 0x6d9   :  { %v2521_v34 = vpop.eup %2520 }
 0x6da   :  { %v1747_v7 = vadd.f32 1.0, %v2521_v34  ;;  %v2523_v35 = vpop.eup %2522 }
 0x6db   :  { %v1754_v36 = vadd.f32 1.0, %v2523_v35 }
 0x6dc   :  { %2524 = vrcp.f32 %v1747_v7 }
 0x6dd   :  { %2526 = vrcp.f32 %v1754_v36 }
 0x6e9   :  { %v2525_v37 = vpop.eup %2524 }
 0x6ea   :  { %v1757_v39 = vmul.f32 %v2525_v37, %v1740_v9  ;;  %v2527_v41 = vpop.eup %2526 }
 0x6eb   :  { %v1761_v42 = vsub.f32 1.0, %v2527_v41  ;;  %v1760_v44 = vmul.f32 %v2527_v41, %v1523_v26 }
 0x6ec   :  { %v1758_v40 = vadd.f32 %v1757_v39, %v1529_v38 }
 0x6ee   :  { %2528 = vtanh.f32 %v1758_v40 }
 0x6fb   :  { %v2529_v43 = vpop.eup %2528 }
 0x6fc   :  { %v1762_v45 = vmul.f32 %v2529_v43, %v1761_v42 }
 0x6fe   :  { %v1763_v46 = vadd.f32 %v1762_v45, %v1760_v44 }
 0x700   :  { %2426 = vmatmul.mubr.msk.f32.vlgmr.msra.gmra.mxu1 %vm83_vm2, %v1763_v46  ;;  %1765 = vst.msk [vmem:[#allocation9 + $0xc] sm:$0x3] %vm62_vm1, %v1763_v46  ;;  %2437 = vmatmul.mubr.msk.f32.vlgmr.msra.gmra.mxu0 %vm83_vm2, %v1763_v46 }
 0x701   :  { %2440 = vmatpush3.msra.mxu1 %v2711_v10  ;;  %2447 = vmatprep.mubr.msk.f32.mxu1 %vm2634_vm0, %v2633_v0 }
 0x702   :  { %2441 = vmatprep.subr.mxu1 %v2633_v0 }
 0x703   :  { %2442 = vmatpush3.msra.mxu1 %v2720_v12 }
 0x704   :  { %2443 = vmatprep.subr.mxu1 %v2633_v0 }
 0x705   :  { %2444 = vmatpush3.msra.mxu1 %v2726_v13 }
 0x706   :  { %2445 = vmatprep.subr.mxu1 %v2633_v0 }
 0x707   :  { %2446 = vmatpush3.msra.mxu1 %v2732_v14 }
 0x708   :  { %2448 = vmatmul.mubr.msk.f32.vlgmr.msra.gmra.mxu1 %vm83_vm2, %v1763_v46 }
 0x7c0   :  { %v1839_v48 = vpop.f32.mrf.mxu1  ;;  %v1909_v10 = vpop.f32.mrf.mxu0 }
 0x7c1   :  { %v1983_v49 = vadd.f32 %v1839_v48, %v1767_v47  ;;  %v1990_v12 = vadd.f32 %v1909_v10, %v1768_v53 }
 0x7c2   :  { %v2427_v50 = vpop.f32.mrf.mxu1  ;;  %v2438_v51 = vpop.f32.mrf.mxu0 }
 0x7c3   :  { %v2064_v52 = vmul.f32 -1.442695, %v1983_v49  ;;  %v2065_v56 = vmul.f32 -1.442695, %v1990_v12 }
 0x7c5   :  { %2530 = vpow2.f32 %v2064_v52 }
 0x7c6   :  { %2532 = vpow2.f32 %v2065_v56 }
 0x7c8   :  { %v1979_v54 = vpop.f32.mrf.mxu1 }
 0x7c9   :  { %v1980_v58 = vadd.f32 %v2761_v30, %v1979_v54 }
 0x7ca   :  { %v2449_v55 = vpop.f32.mrf.mxu1 }
 0x7d2   :  { %v2531_v13 = vpop.eup %2530 }
 0x7d3   :  { %v1987_v0 = vadd.f32 1.0, %v2531_v13  ;;  %v2533_v14 = vpop.eup %2532 }
 0x7d4   :  { %v1994_v57 = vadd.f32 1.0, %v2533_v14 }
 0x7d5   :  { %2534 = vrcp.f32 %v1987_v0 }
 0x7d6   :  { %2536 = vrcp.f32 %v1994_v57 }
 0x7e2   :  { %v2535_v59 = vpop.eup %2534 }
 0x7e3   :  { %v1997_v61 = vmul.f32 %v2535_v59, %v1980_v58  ;;  %v2537_v63 = vpop.eup %2536 }
 0x7e4   :  { %v2001_v3 = vsub.f32 1.0, %v2537_v63  ;;  %v2000_v15 = vmul.f32 %v2537_v63, %v1763_v46 }
 0x7e5   :  { %v1998_v62 = vadd.f32 %v1997_v61, %v1769_v60 }
 0x7e7   :  { %2538 = vtanh.f32 %v1998_v62 }
 0x7f4   :  { %v2539_v11 = vpop.eup %2538 }
 0x7f5   :  { %v2002_v16 = vmul.f32 %v2539_v11, %v2001_v3 }
 0x7f7   :  { %v2003_v17 = vadd.f32 %v2002_v16, %v2000_v15 }
 0x7f9   :  { %2006 = vst.msk [vmem:[#allocation2] sm:$0x3] %vm62_vm1, %v2003_v17  ;;  %2005 = vst.msk [vmem:[#allocation9 + $0xe] sm:$0x3] %vm62_vm1, %v2003_v17 }
 0x7fa   :  { %2611 = shalt.err (!%p2608_p5)
}
 0x7fb   :  { %2018 = dma.vmem_to_hbm [thread:$0]  %s2013_s7, 256, %s3000_s4, [#allocation5], %s2628_s23, %s2628_s23, %s2629_s24  }
 0x7fc   :  { %2624 = dma.done.wait [#allocation5], 256  }
 0x7fd   :  { %2625 = vsyncadd [#allocation5], 4294967040 }
 0x7fe   :  { %2022 = vsyncpa [#allocation4], 1 }
 0x7ff   :  { %2023 = vsyncpa [#allocation7], 1 }
 0x800   :  { %2024 = vsyncpa [#allocation5], 1 }

</bundles_post_ra>
